<compile_context>
chip_gen: v7x
topology: tpu7x:2x2x1
jax: 0.10.0
libtpu: 0.0.40
codegen_flags: <defaults>
</compile_context>

<pallas_src>
import math
import functools

import jax
import jax.numpy as jnp
from jax import lax
from jax.experimental import pallas as pl
from jax.experimental.pallas import tpu as pltpu

NEG_INF = -1.0e30  # finite "masked" score; avoids -inf arithmetic


def _ring_attn_kernel(qi_ref, ki_ref, last_ref,        # scalar prefetch (SMEM)
                      q_ref, k_ref, v_ref,              # VMEM input tiles
                      o_ref,                            # VMEM output tile
                      q_sc, m_sc, l_sc, acc_sc,         # VMEM scratch
                      *, scale, tq, tk, hg, hd, causal,
                      compute_dtype, exp_dtype):
    t = pl.program_id(2)
    qi = qi_ref[t]
    ki = ki_ref[t]

    # ---- init at the first KV tile of each q tile (ring step 0) ----
    @pl.when(ki == 0)
    def _init():
        q_all = q_ref[...]                                    # (tq, hg*hd)
        for h in range(hg):
            # Hoisted: scale + cast once per q tile, reused for every KV step.
            q_sc[h] = (q_all[:, h * hd:(h + 1) * hd] * scale).astype(compute_dtype)
        m_sc[...] = jnp.full_like(m_sc, NEG_INF)
        l_sc[...] = jnp.zeros_like(l_sc)
        acc_sc[...] = jnp.zeros_like(acc_sc)

    k_all = k_ref[...].astype(compute_dtype)                  # (tk, hg*hd)
    v_all = v_ref[...].astype(compute_dtype)

    def _update(apply_mask):
        if apply_mask:
            # Broadcast compare of a (tq,1) and a (1,tk) iota -- no full
            # (tq,tk) int32 materializations.
            q_pos = qi * tq + lax.broadcasted_iota(jnp.int32, (tq, 1), 0)
            k_pos = ki * tk + lax.broadcasted_iota(jnp.int32, (1, tk), 1)
            mask = q_pos >= k_pos                              # (tq, tk)
        for h in range(hg):
            kh = k_all[:, h * hd:(h + 1) * hd]                 # (tk, hd)
            vh = v_all[:, h * hd:(h + 1) * hd]
            # scores = q @ k^T, contracting last dims directly (no .T relayout)
            s = lax.dot_general(q_sc[h], kh,
                                dimension_numbers=(((1,), (1,)), ((), ())),
                                preferred_element_type=jnp.float32)
            if apply_mask:
                s = jnp.where(mask, s, NEG_INF)
            # Online softmax == the ring _combine_block_outputs LSE merge.
            m_prev = m_sc[h]                                   # (tq, 1)
            m_new = jnp.maximum(m_prev, jnp.max(s, axis=-1, keepdims=True))
            alpha = jnp.exp(m_prev - m_new)                    # (tq,1), f32
            # exp in bf16 (EUP throughput); reductions stay in f32.
            p = jnp.exp((s - m_new).astype(exp_dtype))         # (tq, tk)
            l_sc[h] = alpha * l_sc[h] + jnp.sum(
                p.astype(jnp.float32), axis=-1, keepdims=True)
            acc_sc[h] = alpha * acc_sc[h] + jnp.dot(
                p.astype(compute_dtype), vh, preferred_element_type=jnp.float32)
            m_sc[h] = m_new

    if causal:
        # The triangular schedule guarantees every step is needed; only
        # diagonal-straddling tiles pay the mask cost.
        needs_mask = ki * tk + (tk - 1) > qi * tq

        @pl.when(needs_mask)
        def _diag():
            _update(True)

        @pl.when(jnp.logical_not(needs_mask))
        def _interior():
            _update(False)
    else:
        _update(False)

    # ---- finalize at the last KV tile of this q tile (prefetched flag) ----
    @pl.when(last_ref[t] == 1)
    def _finalize():
        parts = []
        for h in range(hg):
            inv_l = pl.reciprocal(l_sc[h], approx=True)
            parts.append((acc_sc[h] * inv_l).astype(o_ref.dtype))
        # Lane-dense single store (hg*hd wide).
        o_ref[...] = parts[0] if hg == 1 else jnp.concatenate(parts, axis=-1)


def ring_attention(query, key, value, *, causal=True, block_q=512, block_k=512,
                   compute_dtype=jnp.bfloat16, exp_dtype=jnp.bfloat16):
    """Ring/flash attention forward.

    query/key/value: [batch, seq, heads, head_dim] -> output same shape.
    Matmul operands run in `compute_dtype` (bf16, matching the module's amp
    cast); accumulation stays f32.  No layout round trips: head flattening is
    a free reshape and the kernel tiles the fused head dim directly.
    """
    B, S, H, D = query.shape
    assert key.shape == (B, S, H, D) and value.shape == (B, S, H, D)

    block_q = min(block_q, S)
    block_k = min(block_k, S)
    assert S % block_q == 0 and S % block_k == 0, "seq must divide tile sizes"
    assert block_q % 8 == 0, "block_q must be a multiple of 8"

    # Head grouping: smallest group so the block's minor dim is a multiple of
    # 128 lanes (lane-dense MXU output / unmasked stores) or covers all heads
    # (== full array dim, always legal).  D=64 -> 2 heads per kernel instance.
    hg = H
    for g in range(1, H + 1):
        if H % g == 0 and ((g * D) % 128 == 0 or g == H):
            hg = g
            break
    HG = H // hg
    fd = hg * D

    scale = 1.0 / math.sqrt(D)

    # Free (no-copy) reshapes: trailing dims are contiguous.
    qf = query.reshape(B, S, H * D)
    kf = key.reshape(B, S, H * D)
    vf = value.reshape(B, S, H * D)

    nq = S // block_q
    nk = S // block_k

    # Flattened (qi, ki) schedule: lower-triangular when causal, so skipped
    # tiles never exist as grid steps.  Prefetched to SMEM.
    qis, kis, lasts = [], [], []
    for qi in range(nq):
        last_k = ((qi + 1) * block_q - 1) // block_k if causal else nk - 1
        for ki in range(last_k + 1):
            qis.append(qi)
            kis.append(ki)
            lasts.append(1 if ki == last_k else 0)
    qi_arr = jnp.asarray(qis, dtype=jnp.int32)
    ki_arr = jnp.asarray(kis, dtype=jnp.int32)
    last_arr = jnp.asarray(lasts, dtype=jnp.int32)
    T = len(qis)

    grid = (B, HG, T)

    def q_index_map(b, hgrp, t, qi_r, ki_r, last_r):
        return (b, qi_r[t], hgrp)

    def kv_index_map(b, hgrp, t, qi_r, ki_r, last_r):
        return (b, ki_r[t], hgrp)

    kernel = functools.partial(
        _ring_attn_kernel, scale=scale, tq=block_q, tk=block_k, hg=hg, hd=D,
        causal=causal, compute_dtype=compute_dtype, exp_dtype=exp_dtype)

    # Explicit VMEM budget (double buffers + scratch + f32 score temporaries);
    # keeps large-tile sweeps from tripping the per-chip scoped defaults
    # (16 MiB on v5e, 32 MiB on v6e/v7x) without exceeding v7x's 64 MiB.
    in_bytes = jnp.dtype(query.dtype).itemsize
    cd_bytes = jnp.dtype(compute_dtype).itemsize
    est = (2 * block_q * fd * in_bytes          # q double buffer
           + 4 * block_k * fd * in_bytes        # k, v double buffers
           + 2 * block_q * fd * in_bytes        # out double buffer
           + hg * block_q * (D * cd_bytes + 8 + 4 * D)   # scratch
           + 4 * block_q * block_k * 4)         # s / p temporaries headroom
    vmem_limit = int(min(max(2 * est, 32 * 1024 * 1024), 64 * 1024 * 1024))

    out_f = pl.pallas_call(
        kernel,
        out_shape=jax.ShapeDtypeStruct((B, S, H * D), query.dtype),
        grid_spec=pltpu.PrefetchScalarGridSpec(
            num_scalar_prefetch=3,
            grid=grid,
            in_specs=[
                pl.BlockSpec((pl.Squeezed(), block_q, fd), q_index_map),
                pl.BlockSpec((pl.Squeezed(), block_k, fd), kv_index_map),
                pl.BlockSpec((pl.Squeezed(), block_k, fd), kv_index_map),
            ],
            out_specs=pl.BlockSpec((pl.Squeezed(), block_q, fd), q_index_map),
            scratch_shapes=[
                pltpu.VMEM((hg, block_q, D), compute_dtype),  # scaled q
                pltpu.VMEM((hg, block_q, 1), jnp.float32),    # running max (m)
                pltpu.VMEM((hg, block_q, 1), jnp.float32),    # running sum-exp
                pltpu.VMEM((hg, block_q, D), jnp.float32),    # output accum
            ],
        ),
        compiler_params=pltpu.CompilerParams(
            dimension_semantics=("parallel", "parallel", "arbitrary"),
            vmem_limit_bytes=vmem_limit),
    )(qi_arr, ki_arr, last_arr, qf, kf, vf)

    return out_f.reshape(B, S, H, D)   # free reshape back


def _reference_attention(q, k, v, causal=True, compute_dtype=jnp.float32):
    """Pure-JAX reference matching the ring-attention math (inputs cast to
    compute_dtype to mirror the module's amp cast and the kernel operands)."""
    B, S, H, D = q.shape

    def prep(x):
        return jnp.transpose(x, (0, 2, 1, 3)).astype(compute_dtype).astype(jnp.float32)

    qt, kt, vt = prep(q), prep(k), prep(v)
    s = jnp.einsum("bhqd,bhkd->bhqk", qt, kt) / math.sqrt(D)
    if causal:
        mask = jnp.tril(jnp.ones((S, S), dtype=bool))
        s = jnp.where(mask[None, None], s, -jnp.inf)
    p = jax.nn.softmax(s, axis=-1)
    o = jnp.einsum("bhqk,bhkd->bhqd", p, vt)
    return jnp.transpose(o, (0, 2, 1, 3)).astype(q.dtype)


if __name__ == "__main__":
    # Small deterministic problem: batch=2, seq=256, heads=4, head_dim=64.
    B, S, H, D = 2, 256, 4, 64
    kq, kk, kv = jax.random.split(jax.random.PRNGKey(0), 3)
    q = jax.random.normal(kq, (B, S, H, D), dtype=jnp.float32)
    k = jax.random.normal(kk, (B, S, H, D), dtype=jnp.float32)
    v = jax.random.normal(kv, (B, S, H, D), dtype=jnp.float32)

    # Small blocks so the test exercises the triangular schedule, multi-step
    # online-softmax accumulation, and both masked/unmasked branches.
    out = jax.block_until_ready(
        ring_attention(q, k, v, causal=True, block_q=64, block_k=128))

    ref = _reference_attention(q, k, v, causal=True, compute_dtype=jnp.bfloat16)
    assert out.shape == (B, S, H, D)
    abs_err = jnp.abs(out - ref)
    max_err = float(jnp.max(abs_err))
    mean_err = float(jnp.mean(abs_err))
    # bf16 operands + bf16 exp vs an f32-softmax reference: loose max, tight mean.
    assert jnp.allclose(out, ref, atol=4e-2, rtol=4e-2), (
        f"mismatch: max_err={max_err}")
    assert mean_err < 4e-3, f"mean error too large: {mean_err}"

    print("KERNEL_OK")
</pallas_src>

<mosaic_0001>
module attributes {stable_mosaic.version = 11 : i64} {
  func.func @_ring_attn_kernel(%arg0: i32, %arg1: i32, %arg2: i32, %arg3: memref<6xi32, #tpu.memory_space<smem>>, %arg4: memref<6xi32, #tpu.memory_space<smem>>, %arg5: memref<6xi32, #tpu.memory_space<smem>>, %arg6: memref<1x64x128xf32, #tpu.memory_space<vmem>>, %arg7: memref<1x128x128xf32, #tpu.memory_space<vmem>>, %arg8: memref<1x128x128xf32, #tpu.memory_space<vmem>>, %arg9: memref<1x64x128xf32, #tpu.memory_space<vmem>>, %arg10: memref<2x64x64xbf16, #tpu.memory_space<vmem>>, %arg11: memref<2x64x1xf32, #tpu.memory_space<vmem>>, %arg12: memref<2x64x1xf32, #tpu.memory_space<vmem>>, %arg13: memref<2x64x64xf32, #tpu.memory_space<vmem>>) attributes {dimension_semantics = [#tpu.dimension_semantics<parallel>, #tpu.dimension_semantics<parallel>, #tpu.dimension_semantics<arbitrary>], iteration_bounds = array<i64: 2, 2, 6>, scalar_prefetch = 3 : i64, scratch_operands = 4 : i64, tpu.core_type = #tpu.core_type<tc>, window_params = [{transform_indices = @transform_0, window_bounds = array<i64: 1, 64, 128>}, {transform_indices = @transform_1, window_bounds = array<i64: 1, 128, 128>}, {transform_indices = @transform_2, window_bounds = array<i64: 1, 128, 128>}, {transform_indices = @transform_3, window_bounds = array<i64: 1, 64, 128>}]} {
    %0 = arith.index_cast %arg2 : i32 to index
    %1 = memref.load %arg3[%0] : memref<6xi32, #tpu.memory_space<smem>>
    %2 = arith.index_cast %arg2 : i32 to index
    %3 = memref.load %arg4[%2] : memref<6xi32, #tpu.memory_space<smem>>
    %c0_i32 = arith.constant 0 : i32
    %4 = arith.cmpi eq, %3, %c0_i32 : i32
    %5 = arith.extui %4 : i1 to i32
    %c0_i32_0 = arith.constant 0 : i32
    %6 = arith.cmpi ne, %5, %c0_i32_0 : i32
    scf.if %6 {
      %c0_9 = arith.constant 0 : index
      %c0_10 = arith.constant 0 : index
      %c0_11 = arith.constant 0 : index
      %27 = vector.load %arg6[%c0_9, %c0_10, %c0_11] : memref<1x64x128xf32, #tpu.memory_space<vmem>>, vector<1x64x128xf32>
      %28 = vector.shape_cast %27 : vector<1x64x128xf32> to vector<64x128xf32>
      %29 = vector.extract_strided_slice %28 {offsets = [0, 0], sizes = [64, 64], strides = [1, 1]} : vector<64x128xf32> to vector<64x64xf32>
      %cst = arith.constant 1.250000e-01 : f32
      %30 = vector.broadcast %cst : f32 to vector<64x64xf32>
      %31 = arith.mulf %29, %30 : vector<64x64xf32>
      %32 = arith.truncf %31 : vector<64x64xf32> to vector<64x64xbf16>
      %c0_12 = arith.constant 0 : index
      %c0_13 = arith.constant 0 : index
      %c0_14 = arith.constant 0 : index
      %33 = vector.load %arg10[%c0_12, %c0_13, %c0_14] : memref<2x64x64xbf16, #tpu.memory_space<vmem>>, vector<1x64x64xbf16>
      %34 = vector.shape_cast %33 : vector<1x64x64xbf16> to vector<64x64xbf16>
      %35 = vector.shape_cast %32 : vector<64x64xbf16> to vector<1x64x64xbf16>
      tpu.vector_store %arg10[%c0_12, %c0_13, %c0_14], %35 {strides = array<i32>} : memref<2x64x64xbf16, #tpu.memory_space<vmem>>, vector<1x64x64xbf16>,
      %36 = vector.extract_strided_slice %28 {offsets = [0, 64], sizes = [64, 64], strides = [1, 1]} : vector<64x128xf32> to vector<64x64xf32>
      %cst_15 = arith.constant 1.250000e-01 : f32
      %37 = vector.broadcast %cst_15 : f32 to vector<64x64xf32>
      %38 = arith.mulf %36, %37 : vector<64x64xf32>
      %39 = arith.truncf %38 : vector<64x64xf32> to vector<64x64xbf16>
      %c1 = arith.constant 1 : index
      %c0_16 = arith.constant 0 : index
      %c0_17 = arith.constant 0 : index
      %40 = vector.load %arg10[%c1, %c0_16, %c0_17] : memref<2x64x64xbf16, #tpu.memory_space<vmem>>, vector<1x64x64xbf16>
      %41 = vector.shape_cast %40 : vector<1x64x64xbf16> to vector<64x64xbf16>
      %42 = vector.shape_cast %39 : vector<64x64xbf16> to vector<1x64x64xbf16>
      tpu.vector_store %arg10[%c1, %c0_16, %c0_17], %42 {strides = array<i32>} : memref<2x64x64xbf16, #tpu.memory_space<vmem>>, vector<1x64x64xbf16>,
      %cst_18 = arith.constant -1.000000e+30 : f32
      %43 = vector.broadcast %cst_18 : f32 to vector<2x64x1xf32>
      %c0_19 = arith.constant 0 : index
      %c0_20 = arith.constant 0 : index
      %c0_21 = arith.constant 0 : index
      %44 = vector.load %arg11[%c0_19, %c0_20, %c0_21] : memref<2x64x1xf32, #tpu.memory_space<vmem>>, vector<2x64x1xf32>
      tpu.vector_store %arg11[%c0_19, %c0_20, %c0_21], %43 {strides = array<i32>} : memref<2x64x1xf32, #tpu.memory_space<vmem>>, vector<2x64x1xf32>,
      %cst_22 = arith.constant 0.000000e+00 : f32
      %45 = vector.broadcast %cst_22 : f32 to vector<2x64x1xf32>
      %c0_23 = arith.constant 0 : index
      %c0_24 = arith.constant 0 : index
      %c0_25 = arith.constant 0 : index
      %46 = vector.load %arg12[%c0_23, %c0_24, %c0_25] : memref<2x64x1xf32, #tpu.memory_space<vmem>>, vector<2x64x1xf32>
      tpu.vector_store %arg12[%c0_23, %c0_24, %c0_25], %45 {strides = array<i32>} : memref<2x64x1xf32, #tpu.memory_space<vmem>>, vector<2x64x1xf32>,
      %cst_26 = arith.constant 0.000000e+00 : f32
      %47 = vector.broadcast %cst_26 : f32 to vector<2x64x64xf32>
      %c0_27 = arith.constant 0 : index
      %c0_28 = arith.constant 0 : index
      %c0_29 = arith.constant 0 : index
      %48 = vector.load %arg13[%c0_27, %c0_28, %c0_29] : memref<2x64x64xf32, #tpu.memory_space<vmem>>, vector<2x64x64xf32>
      tpu.vector_store %arg13[%c0_27, %c0_28, %c0_29], %47 {strides = array<i32>} : memref<2x64x64xf32, #tpu.memory_space<vmem>>, vector<2x64x64xf32>,
    } else {
    }
    %c0 = arith.constant 0 : index
    %c0_1 = arith.constant 0 : index
    %c0_2 = arith.constant 0 : index
    %7 = vector.load %arg7[%c0, %c0_1, %c0_2] : memref<1x128x128xf32, #tpu.memory_space<vmem>>, vector<1x128x128xf32>
    %8 = vector.shape_cast %7 : vector<1x128x128xf32> to vector<128x128xf32>
    %9 = arith.truncf %8 : vector<128x128xf32> to vector<128x128xbf16>
    %c0_3 = arith.constant 0 : index
    %c0_4 = arith.constant 0 : index
    %c0_5 = arith.constant 0 : index
    %10 = vector.load %arg8[%c0_3, %c0_4, %c0_5] : memref<1x128x128xf32, #tpu.memory_space<vmem>>, vector<1x128x128xf32>
    %11 = vector.shape_cast %10 : vector<1x128x128xf32> to vector<128x128xf32>
    %12 = arith.truncf %11 : vector<128x128xf32> to vector<128x128xbf16>
    %c128_i32 = arith.constant 128 : i32
    %13 = arith.muli %3, %c128_i32 : i32
    %c127_i32 = arith.constant 127 : i32
    %14 = arith.addi %13, %c127_i32 : i32
    %c64_i32 = arith.constant 64 : i32
    %15 = arith.muli %1, %c64_i32 : i32
    %16 = arith.cmpi sgt, %14, %15 : i32
    %17 = arith.extui %16 : i1 to i32
    %c0_i32_6 = arith.constant 0 : i32
    %18 = arith.cmpi ne, %17, %c0_i32_6 : i32
    scf.if %18 {
      %c64_i32_9 = arith.constant 64 : i32
      %27 = arith.muli %1, %c64_i32_9 : i32
      %28 = tpu.iota {dimensions = array<i32: 0>} : vector<64x1xi32>
      %29 = vector.broadcast %27 : i32 to vector<64x1xi32>
      %30 = arith.addi %29, %28 : vector<64x1xi32>
      %c128_i32_10 = arith.constant 128 : i32
      %31 = arith.muli %3, %c128_i32_10 : i32
      %32 = tpu.iota {dimensions = array<i32: 1>} : vector<1x128xi32>
      %33 = vector.broadcast %31 : i32 to vector<1x128xi32>
      %34 = arith.addi %33, %32 : vector<1x128xi32>
      %35 = vector.broadcast %30 : vector<64x1xi32> to vector<64x128xi32>
      %36 = vector.broadcast %34 : vector<1x128xi32> to vector<64x128xi32>
      %37 = arith.cmpi sge, %35, %36 : vector<64x128xi32>
      %38 = vector.extract_strided_slice %9 {offsets = [0, 0], sizes = [128, 64], strides = [1, 1]} : vector<128x128xbf16> to vector<128x64xbf16>
      %39 = vector.extract_strided_slice %12 {offsets = [0, 0], sizes = [128, 64], strides = [1, 1]} : vector<128x128xbf16> to vector<128x64xbf16>
      %c0_11 = arith.constant 0 : index
      %c0_12 = arith.constant 0 : index
      %c0_13 = arith.constant 0 : index
      %40 = vector.load %arg10[%c0_11, %c0_12, %c0_13] : memref<2x64x64xbf16, #tpu.memory_space<vmem>>, vector<1x64x64xbf16>
      %41 = vector.shape_cast %40 : vector<1x64x64xbf16> to vector<64x64xbf16>
      %cst = arith.constant dense<0.000000e+00> : vector<64x128xf32>
      %42 = tpu.matmul %41, %38, %cst {dimension_numbers = #tpu.dot_dimension_numbers<[1], [1], [0], [0], [0, 0, 1, 0], [], []>} : vector<64x64xbf16>, vector<128x64xbf16>, vector<64x128xf32> -> vector<64x128xf32>
      %cst_14 = arith.constant -1.000000e+30 : f32
      %43 = vector.broadcast %cst_14 : f32 to vector<64x128xf32>
      %44 = arith.select %37, %42, %43 : vector<64x128xi1>, vector<64x128xf32>
      %c0_15 = arith.constant 0 : index
      %c0_16 = arith.constant 0 : index
      %c0_17 = arith.constant 0 : index
      %45 = vector.load %arg11[%c0_15, %c0_16, %c0_17] : memref<2x64x1xf32, #tpu.memory_space<vmem>>, vector<1x64x1xf32>
      %46 = vector.shape_cast %45 : vector<1x64x1xf32> to vector<64x1xf32>
      %cst_18 = arith.constant dense<0xFF800000> : vector<64xf32>
      %47 = vector.multi_reduction <maximumf>, %44, %cst_18 [1] : vector<64x128xf32> to vector<64xf32>
      %48 = vector.shape_cast %47 : vector<64xf32> to vector<64x1xf32>
      %49 = arith.maximumf %46, %48 : vector<64x1xf32>
      %50 = arith.subf %46, %49 : vector<64x1xf32>
      %51 = math.exp %50 : vector<64x1xf32>
      %52 = vector.broadcast %49 : vector<64x1xf32> to vector<64x128xf32>
      %53 = arith.subf %44, %52 : vector<64x128xf32>
      %54 = arith.truncf %53 : vector<64x128xf32> to vector<64x128xbf16>
      %55 = math.exp %54 : vector<64x128xbf16>
      %c0_19 = arith.constant 0 : index
      %c0_20 = arith.constant 0 : index
      %c0_21 = arith.constant 0 : index
      %56 = vector.load %arg12[%c0_19, %c0_20, %c0_21] : memref<2x64x1xf32, #tpu.memory_space<vmem>>, vector<1x64x1xf32>
      %57 = vector.shape_cast %56 : vector<1x64x1xf32> to vector<64x1xf32>
      %58 = arith.mulf %51, %57 : vector<64x1xf32>
      %59 = arith.extf %55 : vector<64x128xbf16> to vector<64x128xf32>
      %cst_22 = arith.constant dense<0.000000e+00> : vector<64xf32>
      %60 = vector.multi_reduction <add>, %59, %cst_22 [1] : vector<64x128xf32> to vector<64xf32>
      %61 = vector.shape_cast %60 : vector<64xf32> to vector<64x1xf32>
      %62 = arith.addf %58, %61 : vector<64x1xf32>
      %c0_23 = arith.constant 0 : index
      %c0_24 = arith.constant 0 : index
      %c0_25 = arith.constant 0 : index
      %63 = vector.load %arg12[%c0_23, %c0_24, %c0_25] : memref<2x64x1xf32, #tpu.memory_space<vmem>>, vector<1x64x1xf32>
      %64 = vector.shape_cast %63 : vector<1x64x1xf32> to vector<64x1xf32>
      %65 = vector.shape_cast %62 : vector<64x1xf32> to vector<1x64x1xf32>
      tpu.vector_store %arg12[%c0_23, %c0_24, %c0_25], %65 {strides = array<i32>} : memref<2x64x1xf32, #tpu.memory_space<vmem>>, vector<1x64x1xf32>,
      %c0_26 = arith.constant 0 : index
      %c0_27 = arith.constant 0 : index
      %c0_28 = arith.constant 0 : index
      %66 = vector.load %arg13[%c0_26, %c0_27, %c0_28] : memref<2x64x64xf32, #tpu.memory_space<vmem>>, vector<1x64x64xf32>
      %67 = vector.shape_cast %66 : vector<1x64x64xf32> to vector<64x64xf32>
      %68 = vector.broadcast %51 : vector<64x1xf32> to vector<64x64xf32>
      %69 = arith.mulf %68, %67 : vector<64x64xf32>
      %cst_29 = arith.constant dense<0.000000e+00> : vector<64x64xf32>
      %70 = tpu.matmul %55, %39, %cst_29 {dimension_numbers = #tpu.dot_dimension_numbers<[1], [0], [0], [1], [0, 0, 1, 1], [], []>} : vector<64x128xbf16>, vector<128x64xbf16>, vector<64x64xf32> -> vector<64x64xf32>
      %71 = arith.addf %69, %70 : vector<64x64xf32>
      %c0_30 = arith.constant 0 : index
      %c0_31 = arith.constant 0 : index
      %c0_32 = arith.constant 0 : index
      %72 = vector.load %arg13[%c0_30, %c0_31, %c0_32] : memref<2x64x64xf32, #tpu.memory_space<vmem>>, vector<1x64x64xf32>
      %73 = vector.shape_cast %72 : vector<1x64x64xf32> to vector<64x64xf32>
      %74 = vector.shape_cast %71 : vector<64x64xf32> to vector<1x64x64xf32>
      tpu.vector_store %arg13[%c0_30, %c0_31, %c0_32], %74 {strides = array<i32>} : memref<2x64x64xf32, #tpu.memory_space<vmem>>, vector<1x64x64xf32>,
      %c0_33 = arith.constant 0 : index
      %c0_34 = arith.constant 0 : index
      %c0_35 = arith.constant 0 : index
      %75 = vector.load %arg11[%c0_33, %c0_34, %c0_35] : memref<2x64x1xf32, #tpu.memory_space<vmem>>, vector<1x64x1xf32>
      %76 = vector.shape_cast %75 : vector<1x64x1xf32> to vector<64x1xf32>
      %77 = vector.shape_cast %49 : vector<64x1xf32> to vector<1x64x1xf32>
      tpu.vector_store %arg11[%c0_33, %c0_34, %c0_35], %77 {strides = array<i32>} : memref<2x64x1xf32, #tpu.memory_space<vmem>>, vector<1x64x1xf32>,
      %78 = vector.extract_strided_slice %9 {offsets = [0, 64], sizes = [128, 64], strides = [1, 1]} : vector<128x128xbf16> to vector<128x64xbf16>
      %79 = vector.extract_strided_slice %12 {offsets = [0, 64], sizes = [128, 64], strides = [1, 1]} : vector<128x128xbf16> to vector<128x64xbf16>
      %c1 = arith.constant 1 : index
      %c0_36 = arith.constant 0 : index
      %c0_37 = arith.constant 0 : index
      %80 = vector.load %arg10[%c1, %c0_36, %c0_37] : memref<2x64x64xbf16, #tpu.memory_space<vmem>>, vector<1x64x64xbf16>
      %81 = vector.shape_cast %80 : vector<1x64x64xbf16> to vector<64x64xbf16>
      %cst_38 = arith.constant dense<0.000000e+00> : vector<64x128xf32>
      %82 = tpu.matmul %81, %78, %cst_38 {dimension_numbers = #tpu.dot_dimension_numbers<[1], [1], [0], [0], [0, 0, 1, 0], [], []>} : vector<64x64xbf16>, vector<128x64xbf16>, vector<64x128xf32> -> vector<64x128xf32>
      %cst_39 = arith.constant -1.000000e+30 : f32
      %83 = vector.broadcast %cst_39 : f32 to vector<64x128xf32>
      %84 = arith.select %37, %82, %83 : vector<64x128xi1>, vector<64x128xf32>
      %c1_40 = arith.constant 1 : index
      %c0_41 = arith.constant 0 : index
      %c0_42 = arith.constant 0 : index
      %85 = vector.load %arg11[%c1_40, %c0_41, %c0_42] : memref<2x64x1xf32, #tpu.memory_space<vmem>>, vector<1x64x1xf32>
      %86 = vector.shape_cast %85 : vector<1x64x1xf32> to vector<64x1xf32>
      %cst_43 = arith.constant dense<0xFF800000> : vector<64xf32>
      %87 = vector.multi_reduction <maximumf>, %84, %cst_43 [1] : vector<64x128xf32> to vector<64xf32>
      %88 = vector.shape_cast %87 : vector<64xf32> to vector<64x1xf32>
      %89 = arith.maximumf %86, %88 : vector<64x1xf32>
      %90 = arith.subf %86, %89 : vector<64x1xf32>
      %91 = math.exp %90 : vector<64x1xf32>
      %92 = vector.broadcast %89 : vector<64x1xf32> to vector<64x128xf32>
      %93 = arith.subf %84, %92 : vector<64x128xf32>
      %94 = arith.truncf %93 : vector<64x128xf32> to vector<64x128xbf16>
      %95 = math.exp %94 : vector<64x128xbf16>
      %c1_44 = arith.constant 1 : index
      %c0_45 = arith.constant 0 : index
      %c0_46 = arith.constant 0 : index
      %96 = vector.load %arg12[%c1_44, %c0_45, %c0_46] : memref<2x64x1xf32, #tpu.memory_space<vmem>>, vector<1x64x1xf32>
      %97 = vector.shape_cast %96 : vector<1x64x1xf32> to vector<64x1xf32>
      %98 = arith.mulf %91, %97 : vector<64x1xf32>
      %99 = arith.extf %95 : vector<64x128xbf16> to vector<64x128xf32>
      %cst_47 = arith.constant dense<0.000000e+00> : vector<64xf32>
      %100 = vector.multi_reduction <add>, %99, %cst_47 [1] : vector<64x128xf32> to vector<64xf32>
      %101 = vector.shape_cast %100 : vector<64xf32> to vector<64x1xf32>
      %102 = arith.addf %98, %101 : vector<64x1xf32>
      %c1_48 = arith.constant 1 : index
      %c0_49 = arith.constant 0 : index
      %c0_50 = arith.constant 0 : index
      %103 = vector.load %arg12[%c1_48, %c0_49, %c0_50] : memref<2x64x1xf32, #tpu.memory_space<vmem>>, vector<1x64x1xf32>
      %104 = vector.shape_cast %103 : vector<1x64x1xf32> to vector<64x1xf32>
      %105 = vector.shape_cast %102 : vector<64x1xf32> to vector<1x64x1xf32>
      tpu.vector_store %arg12[%c1_48, %c0_49, %c0_50], %105 {strides = array<i32>} : memref<2x64x1xf32, #tpu.memory_space<vmem>>, vector<1x64x1xf32>,
      %c1_51 = arith.constant 1 : index
      %c0_52 = arith.constant 0 : index
      %c0_53 = arith.constant 0 : index
      %106 = vector.load %arg13[%c1_51, %c0_52, %c0_53] : memref<2x64x64xf32, #tpu.memory_space<vmem>>, vector<1x64x64xf32>
      %107 = vector.shape_cast %106 : vector<1x64x64xf32> to vector<64x64xf32>
      %108 = vector.broadcast %91 : vector<64x1xf32> to vector<64x64xf32>
      %109 = arith.mulf %108, %107 : vector<64x64xf32>
      %cst_54 = arith.constant dense<0.000000e+00> : vector<64x64xf32>
      %110 = tpu.matmul %95, %79, %cst_54 {dimension_numbers = #tpu.dot_dimension_numbers<[1], [0], [0], [1], [0, 0, 1, 1], [], []>} : vector<64x128xbf16>, vector<128x64xbf16>, vector<64x64xf32> -> vector<64x64xf32>
      %111 = arith.addf %109, %110 : vector<64x64xf32>
      %c1_55 = arith.constant 1 : index
      %c0_56 = arith.constant 0 : index
      %c0_57 = arith.constant 0 : index
      %112 = vector.load %arg13[%c1_55, %c0_56, %c0_57] : memref<2x64x64xf32, #tpu.memory_space<vmem>>, vector<1x64x64xf32>
      %113 = vector.shape_cast %112 : vector<1x64x64xf32> to vector<64x64xf32>
      %114 = vector.shape_cast %111 : vector<64x64xf32> to vector<1x64x64xf32>
      tpu.vector_store %arg13[%c1_55, %c0_56, %c0_57], %114 {strides = array<i32>} : memref<2x64x64xf32, #tpu.memory_space<vmem>>, vector<1x64x64xf32>,
      %c1_58 = arith.constant 1 : index
      %c0_59 = arith.constant 0 : index
      %c0_60 = arith.constant 0 : index
      %115 = vector.load %arg11[%c1_58, %c0_59, %c0_60] : memref<2x64x1xf32, #tpu.memory_space<vmem>>, vector<1x64x1xf32>
      %116 = vector.shape_cast %115 : vector<1x64x1xf32> to vector<64x1xf32>
      %117 = vector.shape_cast %89 : vector<64x1xf32> to vector<1x64x1xf32>
      tpu.vector_store %arg11[%c1_58, %c0_59, %c0_60], %117 {strides = array<i32>} : memref<2x64x1xf32, #tpu.memory_space<vmem>>, vector<1x64x1xf32>,
    } else {
    }
    %true = arith.constant true
    %19 = arith.xori %16, %true : i1
    %20 = arith.extui %19 : i1 to i32
    %c0_i32_7 = arith.constant 0 : i32
    %21 = arith.cmpi ne, %20, %c0_i32_7 : i32
    scf.if %21 {
      %27 = vector.extract_strided_slice %9 {offsets = [0, 0], sizes = [128, 64], strides = [1, 1]} : vector<128x128xbf16> to vector<128x64xbf16>
      %28 = vector.extract_strided_slice %12 {offsets = [0, 0], sizes = [128, 64], strides = [1, 1]} : vector<128x128xbf16> to vector<128x64xbf16>
      %c0_9 = arith.constant 0 : index
      %c0_10 = arith.constant 0 : index
      %c0_11 = arith.constant 0 : index
      %29 = vector.load %arg10[%c0_9, %c0_10, %c0_11] : memref<2x64x64xbf16, #tpu.memory_space<vmem>>, vector<1x64x64xbf16>
      %30 = vector.shape_cast %29 : vector<1x64x64xbf16> to vector<64x64xbf16>
      %cst = arith.constant dense<0.000000e+00> : vector<64x128xf32>
      %31 = tpu.matmul %30, %27, %cst {dimension_numbers = #tpu.dot_dimension_numbers<[1], [1], [0], [0], [0, 0, 1, 0], [], []>} : vector<64x64xbf16>, vector<128x64xbf16>, vector<64x128xf32> -> vector<64x128xf32>
      %c0_12 = arith.constant 0 : index
      %c0_13 = arith.constant 0 : index
      %c0_14 = arith.constant 0 : index
      %32 = vector.load %arg11[%c0_12, %c0_13, %c0_14] : memref<2x64x1xf32, #tpu.memory_space<vmem>>, vector<1x64x1xf32>
      %33 = vector.shape_cast %32 : vector<1x64x1xf32> to vector<64x1xf32>
      %cst_15 = arith.constant dense<0xFF800000> : vector<64xf32>
      %34 = vector.multi_reduction <maximumf>, %31, %cst_15 [1] : vector<64x128xf32> to vector<64xf32>
      %35 = vector.shape_cast %34 : vector<64xf32> to vector<64x1xf32>
      %36 = arith.maximumf %33, %35 : vector<64x1xf32>
      %37 = arith.subf %33, %36 : vector<64x1xf32>
      %38 = math.exp %37 : vector<64x1xf32>
      %39 = vector.broadcast %36 : vector<64x1xf32> to vector<64x128xf32>
      %40 = arith.subf %31, %39 : vector<64x128xf32>
      %41 = arith.truncf %40 : vector<64x128xf32> to vector<64x128xbf16>
      %42 = math.exp %41 : vector<64x128xbf16>
      %c0_16 = arith.constant 0 : index
      %c0_17 = arith.constant 0 : index
      %c0_18 = arith.constant 0 : index
      %43 = vector.load %arg12[%c0_16, %c0_17, %c0_18] : memref<2x64x1xf32, #tpu.memory_space<vmem>>, vector<1x64x1xf32>
      %44 = vector.shape_cast %43 : vector<1x64x1xf32> to vector<64x1xf32>
      %45 = arith.mulf %38, %44 : vector<64x1xf32>
      %46 = arith.extf %42 : vector<64x128xbf16> to vector<64x128xf32>
      %cst_19 = arith.constant dense<0.000000e+00> : vector<64xf32>
      %47 = vector.multi_reduction <add>, %46, %cst_19 [1] : vector<64x128xf32> to vector<64xf32>
      %48 = vector.shape_cast %47 : vector<64xf32> to vector<64x1xf32>
      %49 = arith.addf %45, %48 : vector<64x1xf32>
      %c0_20 = arith.constant 0 : index
      %c0_21 = arith.constant 0 : index
      %c0_22 = arith.constant 0 : index
      %50 = vector.load %arg12[%c0_20, %c0_21, %c0_22] : memref<2x64x1xf32, #tpu.memory_space<vmem>>, vector<1x64x1xf32>
      %51 = vector.shape_cast %50 : vector<1x64x1xf32> to vector<64x1xf32>
      %52 = vector.shape_cast %49 : vector<64x1xf32> to vector<1x64x1xf32>
      tpu.vector_store %arg12[%c0_20, %c0_21, %c0_22], %52 {strides = array<i32>} : memref<2x64x1xf32, #tpu.memory_space<vmem>>, vector<1x64x1xf32>,
      %c0_23 = arith.constant 0 : index
      %c0_24 = arith.constant 0 : index
      %c0_25 = arith.constant 0 : index
      %53 = vector.load %arg13[%c0_23, %c0_24, %c0_25] : memref<2x64x64xf32, #tpu.memory_space<vmem>>, vector<1x64x64xf32>
      %54 = vector.shape_cast %53 : vector<1x64x64xf32> to vector<64x64xf32>
      %55 = vector.broadcast %38 : vector<64x1xf32> to vector<64x64xf32>
      %56 = arith.mulf %55, %54 : vector<64x64xf32>
      %cst_26 = arith.constant dense<0.000000e+00> : vector<64x64xf32>
      %57 = tpu.matmul %42, %28, %cst_26 {dimension_numbers = #tpu.dot_dimension_numbers<[1], [0], [0], [1], [0, 0, 1, 1], [], []>} : vector<64x128xbf16>, vector<128x64xbf16>, vector<64x64xf32> -> vector<64x64xf32>
      %58 = arith.addf %56, %57 : vector<64x64xf32>
      %c0_27 = arith.constant 0 : index
      %c0_28 = arith.constant 0 : index
      %c0_29 = arith.constant 0 : index
      %59 = vector.load %arg13[%c0_27, %c0_28, %c0_29] : memref<2x64x64xf32, #tpu.memory_space<vmem>>, vector<1x64x64xf32>
      %60 = vector.shape_cast %59 : vector<1x64x64xf32> to vector<64x64xf32>
      %61 = vector.shape_cast %58 : vector<64x64xf32> to vector<1x64x64xf32>
      tpu.vector_store %arg13[%c0_27, %c0_28, %c0_29], %61 {strides = array<i32>} : memref<2x64x64xf32, #tpu.memory_space<vmem>>, vector<1x64x64xf32>,
      %c0_30 = arith.constant 0 : index
      %c0_31 = arith.constant 0 : index
      %c0_32 = arith.constant 0 : index
      %62 = vector.load %arg11[%c0_30, %c0_31, %c0_32] : memref<2x64x1xf32, #tpu.memory_space<vmem>>, vector<1x64x1xf32>
      %63 = vector.shape_cast %62 : vector<1x64x1xf32> to vector<64x1xf32>
      %64 = vector.shape_cast %36 : vector<64x1xf32> to vector<1x64x1xf32>
      tpu.vector_store %arg11[%c0_30, %c0_31, %c0_32], %64 {strides = array<i32>} : memref<2x64x1xf32, #tpu.memory_space<vmem>>, vector<1x64x1xf32>,
      %65 = vector.extract_strided_slice %9 {offsets = [0, 64], sizes = [128, 64], strides = [1, 1]} : vector<128x128xbf16> to vector<128x64xbf16>
      %66 = vector.extract_strided_slice %12 {offsets = [0, 64], sizes = [128, 64], strides = [1, 1]} : vector<128x128xbf16> to vector<128x64xbf16>
      %c1 = arith.constant 1 : index
      %c0_33 = arith.constant 0 : index
      %c0_34 = arith.constant 0 : index
      %67 = vector.load %arg10[%c1, %c0_33, %c0_34] : memref<2x64x64xbf16, #tpu.memory_space<vmem>>, vector<1x64x64xbf16>
      %68 = vector.shape_cast %67 : vector<1x64x64xbf16> to vector<64x64xbf16>
      %cst_35 = arith.constant dense<0.000000e+00> : vector<64x128xf32>
      %69 = tpu.matmul %68, %65, %cst_35 {dimension_numbers = #tpu.dot_dimension_numbers<[1], [1], [0], [0], [0, 0, 1, 0], [], []>} : vector<64x64xbf16>, vector<128x64xbf16>, vector<64x128xf32> -> vector<64x128xf32>
      %c1_36 = arith.constant 1 : index
      %c0_37 = arith.constant 0 : index
      %c0_38 = arith.constant 0 : index
      %70 = vector.load %arg11[%c1_36, %c0_37, %c0_38] : memref<2x64x1xf32, #tpu.memory_space<vmem>>, vector<1x64x1xf32>
      %71 = vector.shape_cast %70 : vector<1x64x1xf32> to vector<64x1xf32>
      %cst_39 = arith.constant dense<0xFF800000> : vector<64xf32>
      %72 = vector.multi_reduction <maximumf>, %69, %cst_39 [1] : vector<64x128xf32> to vector<64xf32>
      %73 = vector.shape_cast %72 : vector<64xf32> to vector<64x1xf32>
      %74 = arith.maximumf %71, %73 : vector<64x1xf32>
      %75 = arith.subf %71, %74 : vector<64x1xf32>
      %76 = math.exp %75 : vector<64x1xf32>
      %77 = vector.broadcast %74 : vector<64x1xf32> to vector<64x128xf32>
      %78 = arith.subf %69, %77 : vector<64x128xf32>
      %79 = arith.truncf %78 : vector<64x128xf32> to vector<64x128xbf16>
      %80 = math.exp %79 : vector<64x128xbf16>
      %c1_40 = arith.constant 1 : index
      %c0_41 = arith.constant 0 : index
      %c0_42 = arith.constant 0 : index
      %81 = vector.load %arg12[%c1_40, %c0_41, %c0_42] : memref<2x64x1xf32, #tpu.memory_space<vmem>>, vector<1x64x1xf32>
      %82 = vector.shape_cast %81 : vector<1x64x1xf32> to vector<64x1xf32>
      %83 = arith.mulf %76, %82 : vector<64x1xf32>
      %84 = arith.extf %80 : vector<64x128xbf16> to vector<64x128xf32>
      %cst_43 = arith.constant dense<0.000000e+00> : vector<64xf32>
      %85 = vector.multi_reduction <add>, %84, %cst_43 [1] : vector<64x128xf32> to vector<64xf32>
      %86 = vector.shape_cast %85 : vector<64xf32> to vector<64x1xf32>
      %87 = arith.addf %83, %86 : vector<64x1xf32>
      %c1_44 = arith.constant 1 : index
      %c0_45 = arith.constant 0 : index
      %c0_46 = arith.constant 0 : index
      %88 = vector.load %arg12[%c1_44, %c0_45, %c0_46] : memref<2x64x1xf32, #tpu.memory_space<vmem>>, vector<1x64x1xf32>
      %89 = vector.shape_cast %88 : vector<1x64x1xf32> to vector<64x1xf32>
      %90 = vector.shape_cast %87 : vector<64x1xf32> to vector<1x64x1xf32>
      tpu.vector_store %arg12[%c1_44, %c0_45, %c0_46], %90 {strides = array<i32>} : memref<2x64x1xf32, #tpu.memory_space<vmem>>, vector<1x64x1xf32>,
      %c1_47 = arith.constant 1 : index
      %c0_48 = arith.constant 0 : index
      %c0_49 = arith.constant 0 : index
      %91 = vector.load %arg13[%c1_47, %c0_48, %c0_49] : memref<2x64x64xf32, #tpu.memory_space<vmem>>, vector<1x64x64xf32>
      %92 = vector.shape_cast %91 : vector<1x64x64xf32> to vector<64x64xf32>
      %93 = vector.broadcast %76 : vector<64x1xf32> to vector<64x64xf32>
      %94 = arith.mulf %93, %92 : vector<64x64xf32>
      %cst_50 = arith.constant dense<0.000000e+00> : vector<64x64xf32>
      %95 = tpu.matmul %80, %66, %cst_50 {dimension_numbers = #tpu.dot_dimension_numbers<[1], [0], [0], [1], [0, 0, 1, 1], [], []>} : vector<64x128xbf16>, vector<128x64xbf16>, vector<64x64xf32> -> vector<64x64xf32>
      %96 = arith.addf %94, %95 : vector<64x64xf32>
      %c1_51 = arith.constant 1 : index
      %c0_52 = arith.constant 0 : index
      %c0_53 = arith.constant 0 : index
      %97 = vector.load %arg13[%c1_51, %c0_52, %c0_53] : memref<2x64x64xf32, #tpu.memory_space<vmem>>, vector<1x64x64xf32>
      %98 = vector.shape_cast %97 : vector<1x64x64xf32> to vector<64x64xf32>
      %99 = vector.shape_cast %96 : vector<64x64xf32> to vector<1x64x64xf32>
      tpu.vector_store %arg13[%c1_51, %c0_52, %c0_53], %99 {strides = array<i32>} : memref<2x64x64xf32, #tpu.memory_space<vmem>>, vector<1x64x64xf32>,
      %c1_54 = arith.constant 1 : index
      %c0_55 = arith.constant 0 : index
      %c0_56 = arith.constant 0 : index
      %100 = vector.load %arg11[%c1_54, %c0_55, %c0_56] : memref<2x64x1xf32, #tpu.memory_space<vmem>>, vector<1x64x1xf32>
      %101 = vector.shape_cast %100 : vector<1x64x1xf32> to vector<64x1xf32>
      %102 = vector.shape_cast %74 : vector<64x1xf32> to vector<1x64x1xf32>
      tpu.vector_store %arg11[%c1_54, %c0_55, %c0_56], %102 {strides = array<i32>} : memref<2x64x1xf32, #tpu.memory_space<vmem>>, vector<1x64x1xf32>,
    } else {
    }
    %22 = arith.index_cast %arg2 : i32 to index
    %23 = memref.load %arg5[%22] : memref<6xi32, #tpu.memory_space<smem>>
    %c1_i32 = arith.constant 1 : i32
    %24 = arith.cmpi eq, %23, %c1_i32 : i32
    %25 = arith.extui %24 : i1 to i32
    %c0_i32_8 = arith.constant 0 : i32
    %26 = arith.cmpi ne, %25, %c0_i32_8 : i32
    scf.if %26 {
      %c0_9 = arith.constant 0 : index
      %c0_10 = arith.constant 0 : index
      %c0_11 = arith.constant 0 : index
      %27 = vector.load %arg12[%c0_9, %c0_10, %c0_11] : memref<2x64x1xf32, #tpu.memory_space<vmem>>, vector<1x64x1xf32>
      %28 = vector.shape_cast %27 : vector<1x64x1xf32> to vector<64x1xf32>
      %29 = tpu.reciprocal %28 {approx = true} : vector<64x1xf32> -> vector<64x1xf32>
      %c0_12 = arith.constant 0 : index
      %c0_13 = arith.constant 0 : index
      %c0_14 = arith.constant 0 : index
      %30 = vector.load %arg13[%c0_12, %c0_13, %c0_14] : memref<2x64x64xf32, #tpu.memory_space<vmem>>, vector<1x64x64xf32>
      %31 = vector.shape_cast %30 : vector<1x64x64xf32> to vector<64x64xf32>
      %32 = vector.broadcast %29 : vector<64x1xf32> to vector<64x64xf32>
      %33 = arith.mulf %31, %32 : vector<64x64xf32>
      %c1 = arith.constant 1 : index
      %c0_15 = arith.constant 0 : index
      %c0_16 = arith.constant 0 : index
      %34 = vector.load %arg12[%c1, %c0_15, %c0_16] : memref<2x64x1xf32, #tpu.memory_space<vmem>>, vector<1x64x1xf32>
      %35 = vector.shape_cast %34 : vector<1x64x1xf32> to vector<64x1xf32>
      %36 = tpu.reciprocal %35 {approx = true} : vector<64x1xf32> -> vector<64x1xf32>
      %c1_17 = arith.constant 1 : index
      %c0_18 = arith.constant 0 : index
      %c0_19 = arith.constant 0 : index
      %37 = vector.load %arg13[%c1_17, %c0_18, %c0_19] : memref<2x64x64xf32, #tpu.memory_space<vmem>>, vector<1x64x64xf32>
      %38 = vector.shape_cast %37 : vector<1x64x64xf32> to vector<64x64xf32>
      %39 = vector.broadcast %36 : vector<64x1xf32> to vector<64x64xf32>
      %40 = arith.mulf %38, %39 : vector<64x64xf32>
      %41 = tpu.concatenate %33, %40 in 1 : vector<64x64xf32>, vector<64x64xf32> -> vector<64x128xf32>
      %c0_20 = arith.constant 0 : index
      %c0_21 = arith.constant 0 : index
      %c0_22 = arith.constant 0 : index
      %42 = vector.load %arg9[%c0_20, %c0_21, %c0_22] : memref<1x64x128xf32, #tpu.memory_space<vmem>>, vector<1x64x128xf32>
      %43 = vector.shape_cast %42 : vector<1x64x128xf32> to vector<64x128xf32>
      %44 = vector.shape_cast %41 : vector<64x128xf32> to vector<1x64x128xf32>
      tpu.vector_store %arg9[%c0_20, %c0_21, %c0_22], %44 {strides = array<i32>} : memref<1x64x128xf32, #tpu.memory_space<vmem>>, vector<1x64x128xf32>,
    } else {
    }
    return
  }
  func.func @transform_0(%arg0: i32, %arg1: i32, %arg2: i32, %arg3: memref<6xi32, #tpu.memory_space<smem>>, %arg4: memref<6xi32, #tpu.memory_space<smem>>, %arg5: memref<6xi32, #tpu.memory_space<smem>>) -> (i32, i32, i32) {
    %0 = arith.index_cast %arg2 : i32 to index
    %1 = memref.load %arg3[%0] : memref<6xi32, #tpu.memory_space<smem>>
    %c0_i32 = arith.constant 0 : i32
    return %arg0, %1, %arg1 : i32, i32, i32
  }
  func.func @transform_1(%arg0: i32, %arg1: i32, %arg2: i32, %arg3: memref<6xi32, #tpu.memory_space<smem>>, %arg4: memref<6xi32, #tpu.memory_space<smem>>, %arg5: memref<6xi32, #tpu.memory_space<smem>>) -> (i32, i32, i32) {
    %0 = arith.index_cast %arg2 : i32 to index
    %1 = memref.load %arg4[%0] : memref<6xi32, #tpu.memory_space<smem>>
    %c0_i32 = arith.constant 0 : i32
    return %arg0, %1, %arg1 : i32, i32, i32
  }
  func.func @transform_2(%arg0: i32, %arg1: i32, %arg2: i32, %arg3: memref<6xi32, #tpu.memory_space<smem>>, %arg4: memref<6xi32, #tpu.memory_space<smem>>, %arg5: memref<6xi32, #tpu.memory_space<smem>>) -> (i32, i32, i32) {
    %0 = arith.index_cast %arg2 : i32 to index
    %1 = memref.load %arg4[%0] : memref<6xi32, #tpu.memory_space<smem>>
    %c0_i32 = arith.constant 0 : i32
    return %arg0, %1, %arg1 : i32, i32, i32
  }
  func.func @transform_3(%arg0: i32, %arg1: i32, %arg2: i32, %arg3: memref<6xi32, #tpu.memory_space<smem>>, %arg4: memref<6xi32, #tpu.memory_space<smem>>, %arg5: memref<6xi32, #tpu.memory_space<smem>>) -> (i32, i32, i32) {
    %0 = arith.index_cast %arg2 : i32 to index
    %1 = memref.load %arg3[%0] : memref<6xi32, #tpu.memory_space<smem>>
    %c0_i32 = arith.constant 0 : i32
    return %arg0, %1, %arg1 : i32, i32, i32
  }
}

</mosaic_0001>

<bundles_post_ra>
// kernel: tpu_custom_call.1
= control target key start
LH: loop header
LB: loop body
LE: loop exit
PB: predicated region body
PF: predicated region fallthrough
CT: control target
= control target key end

     0   :  { %s5712_s0 = inlined_call_operand.hbm [shape: s32[6], index: 0, kind: input, shape index: {}]   ;;  %s5713_s3 = inlined_call_operand.hbm [shape: f32[2,256,256], index: 3, kind: input, shape index: {}]   ;;  %s5714_s4 = inlined_call_operand.hbm [shape: f32[2,256,256], index: 4, kind: input, shape index: {}]   ;;  %s5715_s5 = inlined_call_operand.hbm [shape: f32[2,256,256], index: 5, kind: input, shape index: {}]   ;;  %s5716_s6 = inlined_call_operand.hbm [shape: f32[2,256,256], index: 6, kind: output, shape index: {}]   ;;  %s5717_s1 = inlined_call_operand.vmem [shape: s32[6], index: 1, kind: input, shape index: {}]   ;;  %s5718_s2 = inlined_call_operand.vmem [shape: s32[6], index: 2, kind: input, shape index: {}]  }
   0x1   :  { %5778 = sst [smem:[#allocation61_spill]] %s5713_s3  ;;  %s3469_s23 = scalar_lea.hbm %s5712_s0, 16 }
   0x2   :  { %5779 = sst [smem:[#allocation62_spill]] %s5714_s4  ;;  %p3470_p0 = scmp.ne.s32.totalorder %s5712_s0, %s3469_s23 }
   0x3   :  { %5780 = sst [smem:[#allocation63_spill]] %s5715_s5  ;;  %p3473_p1 = scmp.lt.u32.totalorder %s3469_s23, %s5712_s0 }
   0x4   :  { %5781 = sst [smem:[#allocation64_spill]] %s5716_s6 }
   0x5   :  { %p3475_p2 = pnand %p3473_p1, %p3470_p0 }
   0x7   :  { %3478 = shalt.err (!%p3475_p2)  }
   0x8   :  { %s3791_s28 = smov [#allocation7]   ;;  %s13_s9 = sshll.u32 %s5717_s1, 4  ;;  %s14_s9 = int_to_ptr.vmem [resolvable:$true] %s13_s9 }
   0x9   :  { %12 = dma.hbm_to_smem %s5712_s0, 16, %s3791_s28, [#allocation6] }
   0xa   :  { %s17_s12 = sshll.u32 %s5718_s2, 4  ;;  %s3479_s13 = scalar_lea.vmem %s14_s9, 16  ;;  %s18_s12 = int_to_ptr.vmem [resolvable:$true] %s17_s12 }
   0xb   :  { %p3480_p3 = scmp.ne.s32.totalorder %s14_s9, %s3479_s13  ;;  %p3484_p4 = scmp.lt.s32.totalorder %s14_s9, %s14_s9 }
   0xc   :  { %p3485_p5 = scmp.lt.s32.totalorder %s3479_s13, %s3479_s13 }
   0xe   :  { %p3486_p6 = por %p3485_p5, %p3484_p4 }
  0x10   :  { %p3487_p7 = pnand %p3486_p6, %p3480_p3 }
  0x12   :  { %3490 = shalt.err (!%p3487_p7)  }
  0x13   :  { %s3792_s14 = smov [#allocation8]   ;;  %s3491_s0 = scalar_lea.vmem %s18_s12, 16 }
  0x14   :  { %16 = dma.vmem_to_smem %s14_s9, 16, %s3792_s14, [#allocation6] }
  0x15   :  { %p3492_p8 = scmp.ne.s32.totalorder %s18_s12, %s3491_s0  ;;  %p3496_p9 = scmp.lt.s32.totalorder %s18_s12, %s18_s12 }
  0x16   :  { %p3497_p10 = scmp.lt.s32.totalorder %s3491_s0, %s3491_s0 }
  0x18   :  { %p3498_p11 = por %p3497_p10, %p3496_p9 }
  0x1a   :  { %p3499_p12 = pnand %p3498_p11, %p3492_p8 }
  0x1c   :  { %3502 = shalt.err (!%p3499_p12)  }
  0x1d   :  { %s3793_s1 = smov [#allocation9]  }
  0x1e   :  { %20 = dma.vmem_to_smem %s18_s12, 16, %s3793_s1, [#allocation6] }
  0x1f   :  { %3697 = dma.done.wait [#allocation6], 48 }
  0x20   :  { %3698 = vsyncadd [#allocation6], 4294967248 }
  0x21   :  { %22 = sfence }
  0x22   :  { %23 = vsyncpa [#allocation11], 0 }
  0x23   :  { %25 = vsyncpa [#allocation11 + $0x1], 0 }
  0x24   :  { %26 = vsyncpa [#allocation14], 0 }
  0x25   :  { %28 = vsyncpa [#allocation14 + $0x1], 0 }
  0x26   :  { %29 = vsyncpa [#allocation12], 0 }
  0x27   :  { %31 = vsyncpa [#allocation12 + $0x1], 0  ;;  %s3866_s2 = smov 0   ;;  %s3868_s15 = smov 0  }
  0x28   :  { %s3870_s16 = smov 0   ;;  %s3872_s17 = smov 0  }
  0x29   :  { %s3874_s18 = smov 0   ;;  %s3876_s19 = smov 0  }
  0x2a   :  { %s3878_s20 = smov 0   ;;  %s3880_s21 = smov 0  }
  0x2b   :  { %s3882_s22 = smov 0   ;;  %s3884_s23 = smov 0  }
  0x2c   :  { %s3886_s24 = smov 0   ;;  %s3888_s25 = smov 0  }
  0x2d   :  { %s3890_s26 = smov 0   ;;  %s3892_s27 = smov 0  }
  0x2e   :  { %s3894_s28 = smov 0   ;;  %s3896_s29 = smov 0  }
  0x2f   :  { %s3898_s30 = smov 0   ;;  %s3900_s7 = smov 0  }
  0x30   :  { %s3902_s8 = smov 0  }
  0x31 LB: > { %5782 = sst [smem:[#allocation29_spill]] %s3717_s2  ;;  %s3962_s9 = sadd.s32 4294967295, %s3789_s8   ;;  %s3789_s8 = sphi %s3902_s8, %s37_s8   ;;  %s3785_s7 = sphi %s3900_s7, %s5933_s7   ;;  %s3781_s30 = sphi %s3898_s30, %s5932_s30   ;;  %s3777_s29 = sphi %s3896_s29, %s5919_s29   ;;  %s3773_s28 = sphi %s3894_s28, %s5918_s28   ;;  %s3769_s27 = sphi %s3892_s27, %s5931_s27   ;;  %s3765_s26 = sphi %s3890_s26, %s5917_s26   ;;  %s3761_s25 = sphi %s3888_s25, %s5930_s25   ;;  %s3757_s24 = sphi %s3886_s24, %s5929_s24   ;;  %s3753_s23 = sphi %s3884_s23, %s5928_s23   ;;  %s3749_s22 = sphi %s3882_s22, %s5914_s22   ;;  %s3745_s21 = sphi %s3880_s21, %s5927_s21   ;;  %s3741_s20 = sphi %s3878_s20, %s5926_s20   ;;  %s3737_s19 = sphi %s3876_s19, %s5925_s19   ;;  %s3733_s18 = sphi %s3874_s18, %s5924_s18   ;;  %s3729_s17 = sphi %s3872_s17, %s5922_s17   ;;  %s3725_s16 = sphi %s3870_s16, %s5911_s16   ;;  %s3721_s15 = sphi %s3868_s15, %s5910_s15   ;;  %s3717_s2 = sphi %s3866_s2, %s5909_s2  }
  0x32   : > { %5783 = sst [smem:[#allocation30_spill]] %s3721_s15  ;;  %s49_s10 = sadd.s32 1, %s3777_s29 }
  0x33   : > { %5784 = sst [smem:[#allocation31_spill]] %s3725_s16  ;;  %p50_p13 = scmp.ge.s32.totalorder %s49_s10, 6 }
  0x34   : > { %5785 = sst [smem:[#allocation32_spill]] %s3729_s17  ;;  %s52_s11 = sadd.s32 1, %s3781_s30 }
  0x35   : > { %5786 = sst [smem:[#allocation33_spill]] %s3745_s21  ;;  %s56_s13 = sadd.s32 1, %s3785_s7 }
  0x36   : > { %5787 = sst [smem:[#allocation34_spill]] %s3749_s22  ;;  %s5935_s10 = smov (%p50_p13, %s49_s10), 0 }
  0x37   : > { %5788 = sst [smem:[#allocation35_spill]] %s3761_s25  ;;  %s5937_s11 = smov (!%p50_p13, %s52_s11), %s3781_s30 }
  0x38   : > { %5789 = sst [smem:[#allocation36_spill]] %s3765_s26  ;;  %p54_p0 = scmp.ge.s32.totalorder %s5937_s11, 2 }
  0x39   : > { %5790 = sst [smem:[#allocation37_spill]] %s3769_s27  ;;  %p5739_p1 = scmp.eq.s32.totalorder %s3789_s8, 0 }
  0x3a   : > { %5791 = sst [smem:[#allocation38_spill]] %s3773_s28  ;;  %p5738_p2 = scmp.eq.s32.totalorder %s3962_s9, 0 }
  0x3b   : > { %5792 = sst [smem:[#allocation39_spill]] %s3777_s29  ;;  %p114_p3 = scmp.ne.s32.totalorder %s3745_s21, %s3741_s20 }
  0x3c   : > { %5793 = sst [smem:[#allocation40_spill]] %s3785_s7  ;;  %s5939_s11 = smov (%p54_p0, %s5937_s11), 0 }
  0x3d   : > { %5794 = sst [smem:[#allocation41_spill]] %s5935_s10  ;;  %s5941_s13 = smov (!%p54_p0, %s56_s13), %s3785_s7 }
  0x3e   : > { %s92_s14 = sld [smem:[#allocation8 + %s3777_s29]]  ;;  %s3982_s1 = ssub.s32 %s3781_s30, %s5939_s11 }
  0x3f   : > { %s93_s0 = sld [smem:[#allocation8 + %s5935_s10]]  ;;  %s101_s12 = sadd.s32 1, %s3749_s22 }
  0x40   : > { %5795 = sst [smem:[#allocation42_spill]] %s5939_s11  ;;  %p58_p4 = scmp.ge.s32.totalorder %s5941_s13, 2 }
  0x41   : > { %p3987_p5 = por %p114_p3, %p5738_p2  ;;  %s124_s27 = sld [smem:[#allocation8 + %s3777_s29]] }
  0x42   : > { %s5943_s13 = smov (%p58_p4, %s5941_s13), 0  ;;  %s125_s11 = sld [smem:[#allocation8 + %s5935_s10]] }
  0x43   : > { %s5796_s20 = scalar_select %p3987_p5, 1, 0 }
  0x44   : > { %5798 = sst [smem:[#allocation44_spill]] %s5943_s13  ;;  %s3998_s26 = ssub.s32 %s3785_s7, %s5943_s13 }
  0x45   : > { %s95_s6 = ssub.s32 %s92_s14, %s93_s0  ;;  %5797 = sst [smem:[#allocation43_spill]] %s5796_s20 }
  0x46   : > { %s156_s28 = sld [smem:[#allocation7 + %s3777_s29]]  ;;  %s96_s0 = sor.u32 %s95_s6, %s3998_s26 }
  0x47   : > { %s157_s14 = sld [smem:[#allocation7 + %s5935_s10]]  ;;  %p108_p6 = scmp.ne.s32.totalorder %s3749_s22, %s3745_s21 }
  0x48   : > { %s98_s20 = sor.u32 %s96_s0, %s3982_s1  ;;  %p175_p7 = scmp.ne.s32.totalorder %s3725_s16, %s3721_s15 }
  0x49   : > { %p99_p8 = scmp.eq.s32.totalorder %s98_s20, 0  ;;  %p176_p9 = scmp.eq.s32.totalorder %s3962_s9, 23 }
  0x4a   : > { %p181_p10 = scmp.ne.s32.totalorder %s3721_s15, %s3717_s2  ;;  %s5799_s5 = sadd.s32 4294967294, %s3789_s8  }
  0x4b   : > { %p182_p11 = scmp.eq.s32.totalorder %s5799_s5, 23  ;;  %s127_s3 = ssub.s32 %s124_s27, %s125_s11 }
  0x4c   : > { %s4013_s13 = scalar_select %p99_p8, %s3749_s22, %s101_s12  }
  0x4d   : > { %s159_s6 = ssub.s32 %s156_s28, %s157_s14  ;;  %p4017_p12 = por %p108_p6, %p5739_p1 }
  0x4e   : > { %5800 = sst [smem:[#allocation45_spill]] %s4013_s13  ;;  %s160_s20 = sor.u32 %s159_s6, %s3998_s26 }
  0x4f   : > { %s162_s0 = sor.u32 %s160_s20, %s3982_s1  ;;  %s165_s5 = sadd.s32 1, %s3725_s16 }
  0x50   : > { %s4025_s2 = sor.u32 %s127_s3, %s3998_s26  ;;  %p163_p13 = scmp.eq.s32.totalorder %s162_s0, 0 }
  0x51   : > { %p4030_p0 = por %p176_p9, %p175_p7  ;;  %p4034_p3 = por %p182_p11, %p181_p10 }
  0x52   : > { %s4039_s11 = scalar_select %p163_p13, %s3725_s16, %s165_s5  }
  0x53   : > { %s5802_s27 = scalar_select %p4030_p0, 1, 0 }
  0x54   : > { %s5804_s28 = scalar_select %p4034_p3, 1, 0 }
  0x55   : > { %5803 = sst [smem:[#allocation46_spill]] %s5802_s27  ;;  %p5737_p4 = scmp.lt.s32.totalorder %s3789_s8, 24 }
  0x56   : > { %5805 = sst [smem:[#allocation47_spill]] %s5804_s28  ;;  %s4043_s12 = sshll.u32 %s3785_s7, 6 }
  0x57   : > { %5806 = sst [smem:[#allocation48_spill]] %s4039_s11  ;;  %s228_s14 = sand.u32 1, %s3789_s8  }
  0x58   : > { %s230_s3 = sand.u32 1, %s3749_s22   ;;  %p4051_p6 = pnand %p5737_p4, %p4017_p12 }
  0x59   : > { %s2759_s6 = sshll.u32 %s230_s3, 7  ;;  %p2769_p7 = scmp.ge.s32.totalorder %s3789_s8, 1 }
  0x5a   : > { %s3130_s0 = scalar_select %p4017_p12, [#allocation8], [#allocation18] }
  0x5b   : > { %s3131_s5 = scalar_select %p4017_p12, %s3777_s29, 0 }
  0x5c   : > { %s5945_s0 = smov (!%p5737_p4, %s3130_s0), [#allocation22]  ;;  %s232_s7 = scalar_lea.vmem [#allocation13], %s2759_s6 }
  0x5d   : > { %s5947_s5 = smov (!%p5737_p4, %s3131_s5), 0  ;;  %s244_s13 = sshll.u32 %s232_s7, 4  ;;  %s4064_s13 = int_to_ptr.vmem [resolvable:$true] %s244_s13 }
  0x5e   : > { %s233_s22 = sld [smem:[%s5945_s0 + %s5947_s5]]  ;;  %p278_p8 = scmp.lt.s32.totalorder %s3789_s8, 25 }
  0x5f   : > { %s5809_s4 = sld [smem:[#allocation62_spill]]  ;;  %s4079_s7 = scalar_lea.sflag [#allocation14], %s228_s14 }
  0x60   : > { %p4068_p9 = pnand %p2769_p7, %p278_p8  ;;  %p3505_p11 = pneg %p4051_p6 }
  0x62   : > { %s5808_s3 = scalar_select %p4068_p9, 1, 0 }
  0x64   : > { %s2804_s11 = sshll.u32 %s233_s22, 5 }
  0x65   : > { %s239_s21 = sadd.s32 %s3781_s30, %s2804_s11  ;;  %s3508_s15 = scalar_lea.hbm %s5809_s4, 16384 }
  0x66   : > { %s241_s16 = sadd.s32 %s4043_s12, %s239_s21 }
  0x67   : > { %s2763_s28 = sshll.u32 %s241_s16, 7 }
  0x68   : > { %s4077_s17 = scalar_lea.hbm %s5809_s4, %s2763_s28 }
  0x69   : > { %s3503_s6 = scalar_lea.hbm %s4077_s17, 2048  ;;  %p3509_p7 = scmp.lt.u32.totalorder %s4077_s17, %s5809_s4 }
  0x6a   : > { %p3504_p10 = scmp.ne.s32.totalorder %s4077_s17, %s3503_s6  ;;  %p3510_p8 = scmp.lt.u32.totalorder %s3508_s15, %s3503_s6 }
  0x6b   : > { %p3512_p2 = scmp.lt.u32.totalorder %s3503_s6, %s4077_s17 }
  0x6c   : > { %p3506_p12 = pnand %p3505_p11, %p3504_p10  ;;  %p3511_p4 = por %p3510_p8, %p3509_p7 }
  0x6e   : > { %p3507_p13 = pneg %p3506_p12  ;;  %p3513_p1 = por %p3512_p2, %p3511_p4 }
  0x70   : > { %p3514_p3 = pnand %p3513_p1, %p3507_p13 }
  0x72   : > { %3517 = shalt.err (!%p3514_p3)
}
  0x73   : > { %s3518_s11 = scalar_lea.vmem %s4064_s13, 2048  ;;  %s3794_s14 = smov [#allocation13]  }
  0x74   : > { %p3519_p10 = scmp.ne.s32.totalorder %s4064_s13, %s3518_s11  ;;  %s3523_s0 = sshll.u32 %s3794_s14, 4  ;;  %s3524_s0 = int_to_ptr.vmem [resolvable:$false] %s3523_s0 }
  0x75   : > { %s3525_s5 = scalar_lea.vmem %s3524_s0, 4096  ;;  %p3526_p5 = scmp.lt.s32.totalorder %s4064_s13, %s3524_s0 }
  0x76   : > { %p3521_p12 = pnand %p3519_p10, %p3505_p11  ;;  %p3527_p7 = scmp.lt.s32.totalorder %s3525_s5, %s3518_s11 }
  0x78   : > { %p3522_p0 = pneg %p3521_p12  ;;  %p3528_p8 = por %p3527_p7, %p3526_p5 }
  0x7a   : > { %p3529_p2 = pnand %p3528_p8, %p3522_p0 }
  0x7c   : > { %3532 = shalt.err (!%p3529_p2)
}
  0x7d   : > { %s5742_s21 = smov 256   ;;  %s5744_s6 = smov 128  }
  0x7e   : > { %s5746_s16 = smov 8   ;;  %s60_s22 = sld [smem:[#allocation7 + %s3777_s29]] }
  0x7f   : > { %3153 = dma.hbm_to_vmem [thread:$0]  (!%p4051_p6), %s4077_s17, 2048, %s4064_s13, %s4079_s7, %s5742_s21, %s5744_s6, %s5746_s16  }
  0x80   : > { %s61_s15 = sld [smem:[#allocation7 + %s5935_s10]]  ;;  %s130_s27 = sor.u32 %s4025_s2, %s3982_s1 }
  0x81   : > { %p76_p1 = scmp.ne.s32.totalorder %s3761_s25, %s3757_s24  ;;  %p82_p5 = scmp.ne.s32.totalorder %s3757_s24, %s3753_s23 }
  0x82   : > { %s202_s28 = sand.u32 1, %s3761_s25   ;;  %p5810_p0 = scmp.eq.s32.totalorder %s3789_s8, 0 }
  0x83   : > { %p5812_p4 = scmp.eq.s32.totalorder %s3962_s9, 0  ;;  %s2754_s2 = sshll.u32 %s202_s28, 6 }
  0x84   : > { %p4121_p3 = por %p5810_p0, %p76_p1  ;;  %p4133_p11 = scmp.eq.s32.totalorder %s130_s27, 0 }
  0x85   : > { %p4127_p6 = por %p5812_p4, %p82_p5  ;;  %p5815_p13 = scmp.lt.s32.totalorder %s3789_s8, 24 }
  0x86   : > { %s63_s20 = ssub.s32 %s60_s22, %s61_s15  ;;  %s5817_s14 = sld [smem:[#allocation32_spill]] }
  0x87   : > { %s5813_s17 = scalar_select %p4127_p6, 1, 0 }
  0x88   : > { %p4141_p10 = pnand %p5815_p13, %p4121_p3  ;;  %s69_s0 = sadd.s32 1, %s3761_s25 }
  0x89   : > { %s64_s5 = sor.u32 %s63_s20, %s3998_s26  ;;  %p5819_p7 = pmov %p5815_p13 }
  0x8a   : > { %s66_s27 = sor.u32 %s3982_s1, %s64_s5  ;;  %s206_s26 = scalar_lea.vmem [#allocation10], %s2754_s2 }
  0x8b   : > { %p67_p12 = scmp.eq.s32.totalorder %s66_s27, 0  ;;  %p5820_p8 = pmov %p5819_p7 }
  0x8c   : > { %s3127_s21 = scalar_select %p4121_p3, [#allocation7], [#allocation17] }
  0x8d   : > { %s4151_s6 = scalar_select %p67_p12, %s3761_s25, %s69_s0  }
  0x8e   : > { %s3128_s16 = scalar_select %p4121_p3, %s3777_s29, 0 }
  0x8f   : > { %5818 = sst [smem:[#allocation49_spill]] %s4151_s6  ;;  %s5949_s21 = smov (!%p5819_p7, %s3127_s21), [#allocation21] }
  0x90   : > { %s5951_s16 = smov (!%p5820_p8, %s3128_s16), 0  ;;  %s218_s15 = sshll.u32 %s206_s26, 4  ;;  %s4177_s15 = int_to_ptr.vmem [resolvable:$true] %s218_s15 }
  0x91   : > { %s207_s22 = sld [smem:[%s5949_s21 + %s5951_s16]]  ;;  %s133_s1 = sadd.s32 1, %s3737_s19 }
  0x92   : > { %s4164_s20 = scalar_select %p4133_p11, %s3737_s19, %s133_s1  }
  0x93   : > { %p140_p2 = scmp.ne.s32.totalorder %s3737_s19, %s3733_s18  ;;  %p146_p1 = scmp.ne.s32.totalorder %s3733_s18, %s5817_s14 }
  0x94   : > { %p5821_p5 = pmov %p5812_p4  ;;  %p5824_p3 = scmp.eq.s32.totalorder %s3789_s8, 0 }
  0x95   : > { %s5826_s26 = sld [smem:[#allocation61_spill]]  ;;  %p3535_p13 = pneg %p4141_p10 }
  0x96   : > { %p4172_p0 = por %p146_p1, %p5821_p5  ;;  %p4182_p4 = por %p140_p2, %p5824_p3 }
  0x97   : > { %s2803_s11 = sshll.u32 %s207_s22, 4  ;;  %s256_s22 = sand.u32 1, %s3737_s19  }
  0x98   : > { %s5822_s0 = scalar_select %p4172_p0, 1, 0 }
  0x99   : > { %s213_s5 = sadd.s32 %s3781_s30, %s2803_s11  ;;  %s4194_s11 = scalar_lea.sflag [#allocation11], %s202_s28 }
  0x9a   : > { %5823 = sst [smem:[#allocation32_spill]] %s5822_s0  ;;  %s215_s21 = sadd.s32 %s4043_s12, %s213_s5 }
  0x9b   : > { %s2758_s2 = sshll.u32 %s215_s21, 7  ;;  %s5827_s1 = smov %s5826_s26 }
  0x9c   : > { %s4189_s14 = scalar_lea.hbm %s5826_s26, %s2758_s2  ;;  %s3538_s2 = scalar_lea.hbm %s5827_s1, 16384 }
  0x9d   : > { %s3533_s5 = scalar_lea.hbm %s4189_s14, 1024  ;;  %p3539_p8 = scmp.lt.u32.totalorder %s4189_s14, %s5827_s1 }
  0x9e   : > { %p3534_p11 = scmp.ne.s32.totalorder %s4189_s14, %s3533_s5  ;;  %p3540_p2 = scmp.lt.u32.totalorder %s3538_s2, %s3533_s5 }
  0x9f   : > { %p3542_p5 = scmp.lt.u32.totalorder %s3533_s5, %s4189_s14 }
  0xa0   : > { %p3536_p12 = pnand %p3535_p13, %p3534_p11  ;;  %p3541_p1 = por %p3540_p2, %p3539_p8 }
  0xa2   : > { %p3537_p7 = pneg %p3536_p12  ;;  %p3543_p3 = por %p3542_p5, %p3541_p1 }
  0xa4   : > { %p3544_p0 = pnand %p3543_p3, %p3537_p7 }
  0xa6   : > { %3547 = shalt.err (!%p3544_p0)
}
  0xa7   : > { %s3548_s28 = scalar_lea.vmem %s4177_s15, 1024  ;;  %s3798_s21 = smov [#allocation10]  }
  0xa8   : > { %p3549_p11 = scmp.ne.s32.totalorder %s4177_s15, %s3548_s28  ;;  %s3553_s23 = sshll.u32 %s3798_s21, 4  ;;  %s3554_s23 = int_to_ptr.vmem [resolvable:$false] %s3553_s23 }
  0xa9   : > { %s3555_s27 = scalar_lea.vmem %s3554_s23, 2048  ;;  %p3556_p9 = scmp.lt.s32.totalorder %s4177_s15, %s3554_s23 }
  0xaa   : > { %p3551_p12 = pnand %p3549_p11, %p3535_p13  ;;  %p3557_p8 = scmp.lt.s32.totalorder %s3555_s27, %s3548_s28 }
  0xac   : > { %p3552_p6 = pneg %p3551_p12  ;;  %p3558_p2 = por %p3557_p8, %p3556_p9 }
  0xae   : > { %p3559_p1 = pnand %p3558_p2, %p3552_p6 }
  0xb0   : > { %3562 = shalt.err (!%p3559_p1)
}
  0xb1   : > { %s5828_s5 = smov 8   ;;  %s5829_s2 = smov 128  }
  0xb2   : > { %s5830_s26 = smov 256   ;;  %p5831_p9 = scmp.lt.s32.totalorder %s3789_s8, 24 }
  0xb3   : > { %3148 = dma.hbm_to_vmem [thread:$0]  (!%p4141_p10), %s4189_s14, 1024, %s4177_s15, %s4194_s11, %s5830_s26, %s5829_s2, %s5828_s5  }
  0xb4   : > { %s3133_s28 = scalar_select %p4182_p4, [#allocation8], [#allocation19] }
  0xb5   : > { %s3134_s13 = scalar_select %p4182_p4, %s3777_s29, 0 }
  0xb6   : > { %s5953_s28 = smov (!%p5831_p9, %s3133_s28), [#allocation23]  ;;  %p5832_p6 = pmov %p5831_p9 }
  0xb7   : > { %s2764_s21 = sshll.u32 %s256_s22, 7  ;;  %s5835_s22 = sld [smem:[#allocation63_spill]] }
  0xb8   : > { %s5955_s13 = smov (!%p5832_p6, %s3134_s13), 0  ;;  %p5833_p0 = pmov %p5832_p6 }
  0xb9   : > { %s259_s27 = sld [smem:[%s5953_s28 + %s5955_s13]]  ;;  %s258_s15 = scalar_lea.vmem [#allocation15], %s2764_s21 }
  0xba   : > { %p4240_p13 = pnand %p5833_p0, %p4182_p4  ;;  %s270_s14 = sshll.u32 %s258_s15, 4  ;;  %s4246_s14 = int_to_ptr.vmem [resolvable:$true] %s270_s14 }
  0xbc   : > { %p3565_p4 = pneg %p4240_p13 }
  0xbd   : > { %s5836_s0 = smov %s5835_s22 }
  0xbf   : > { %s2805_s11 = sshll.u32 %s259_s27, 5 }
  0xc0   : > { %s265_s1 = sadd.s32 %s3781_s30, %s2805_s11 }
  0xc1   : > { %s267_s4 = sadd.s32 %s4043_s12, %s265_s1 }
  0xc2   : > { %s2768_s10 = sshll.u32 %s267_s4, 7  ;;  %s3568_s4 = scalar_lea.hbm %s5836_s0, 16384 }
  0xc3   : > { %s4251_s16 = scalar_lea.hbm %s5835_s22, %s2768_s10 }
  0xc4   : > { %s3563_s25 = scalar_lea.hbm %s4251_s16, 2048  ;;  %p3569_p3 = scmp.lt.u32.totalorder %s4251_s16, %s5836_s0 }
  0xc5   : > { %p3564_p10 = scmp.ne.s32.totalorder %s4251_s16, %s3563_s25  ;;  %p3570_p11 = scmp.lt.u32.totalorder %s3568_s4, %s3563_s25 }
  0xc6   : > { %p3572_p8 = scmp.lt.u32.totalorder %s3563_s25, %s4251_s16 }
  0xc7   : > { %p3566_p7 = pnand %p3565_p4, %p3564_p10  ;;  %p3571_p12 = por %p3570_p11, %p3569_p3 }
  0xc9   : > { %p3567_p5 = pneg %p3566_p7  ;;  %p3573_p2 = por %p3572_p8, %p3571_p12 }
  0xcb   : > { %p3574_p1 = pnand %p3573_p2, %p3567_p5 }
  0xcd   : > { %3577 = shalt.err (!%p3574_p1)
}
  0xce   : > { %s3578_s10 = scalar_lea.vmem %s4246_s14, 2048  ;;  %s3799_s6 = smov [#allocation15]  }
  0xcf   : > { %p3579_p9 = scmp.ne.s32.totalorder %s4246_s14, %s3578_s10  ;;  %s3583_s13 = sshll.u32 %s3799_s6, 4  ;;  %s3584_s13 = int_to_ptr.vmem [resolvable:$false] %s3583_s13 }
  0xd0   : > { %s3585_s21 = scalar_lea.vmem %s3584_s13, 4096  ;;  %p3586_p10 = scmp.lt.s32.totalorder %s4246_s14, %s3584_s13 }
  0xd1   : > { %p3581_p6 = pnand %p3579_p9, %p3565_p4  ;;  %p3587_p7 = scmp.lt.s32.totalorder %s3585_s21, %s3578_s10 }
  0xd3   : > { %p3582_p0 = pneg %p3581_p6  ;;  %p3588_p3 = por %p3587_p7, %p3586_p10 }
  0xd5   : > { %p3589_p11 = pnand %p3588_p3, %p3582_p0 }
  0xd7   : > { %3592 = shalt.err (!%p3589_p11)
}
  0xd8   : > { %3158 = dma.hbm_to_vmem [thread:$0]  (!%p4240_p13), %s4251_s16, 2048, %s4246_s14, %s4079_s7, %s5830_s26, %s5829_s2, %s5828_s5  }
  0xd9   : > { %p5837_p4 = scmp.ne.s32.totalorder %s5808_s3, 0 }
  0xdb   : > { %282 = sbr.rel (%p5837_p4) target bundleno = 3499 (0xdab), region = 32 }
  0xe2   : > { %s284_s25 = sand.u32 1, %s3757_s24   ;;  %p5838_p5 = scmp.ne.s32.totalorder %s5813_s17, 0 }
  0xe3   : > { %s2770_s27 = sshll.u32 %s284_s25, 6  ;;  %s285_s15 = scalar_lea.sflag [#allocation11], %s284_s25 }
  0xe4   : > { %s4285_s11 = scalar_lea.vmem [#allocation10], %s2770_s27 }
  0xe5   : > { %3700 = dma.done.wait (%p5838_p5), %s285_s15, 1024  }
  0xe6   : > { %3702 = vsyncadd (%p5838_p5), %s285_s15, 4294966272  ;;  %s5839_s23 = sld [smem:[#allocation33_spill]]  ;;  %s293_s12 = sand.u32 1, %s3962_s9  }
  0xe7   : > { %s5840_s22 = sld [smem:[#allocation43_spill]]  ;;  %s294_s3 = scalar_lea.sflag [#allocation14], %s293_s12 }
  0xec   : > { %s295_s7 = sand.u32 1, %s5839_s23  }
  0xed   : > { %s2771_s5 = sshll.u32 %s295_s7, 7  ;;  %p5841_p13 = scmp.ne.s32.totalorder %s5840_s22, 0 }
  0xee   : > { %s4293_s2 = scalar_lea.vmem [#allocation13], %s2771_s5 }
  0xef   : > { %3704 = dma.done.wait (%p5841_p13), %s294_s3, 2048  }
  0xf0   : > { %3706 = vsyncadd (%p5841_p13), %s294_s3, 4294965248  ;;  %s5842_s26 = sld [smem:[#allocation32_spill]]  ;;  %s304_s14 = sand.u32 1, %s3733_s18  }
  0xf1   : > { %s2772_s16 = sshll.u32 %s304_s14, 7 }
  0xf2   : > { %s4300_s17 = scalar_lea.vmem [#allocation15], %s2772_s16 }
  0xf6   : > { %p5843_p12 = scmp.ne.s32.totalorder %s5842_s26, 0 }
  0xf8   : > { %3708 = dma.done.wait (%p5843_p12), %s294_s3, 2048  }
  0xf9   : > { %3710 = vsyncadd (%p5843_p12), %s294_s3, 4294965248  ;;  %s5844_s9 = sld [smem:[#allocation30_spill]]  ;;  %s5845_s1 = sld [smem:[#allocation36_spill]] }
  0xff   : > { %s336_s4 = sand.u32 1, %s5844_s9   ;;  %s4308_s28 = sld [smem:[#allocation7 + %s5845_s1]] }
 0x100   : > { %s4311_s29 = sld [smem:[#allocation8 + %s5845_s1]]  ;;  %s2773_s10 = sshll.u32 %s336_s4, 6 }
 0x101   : > { %s4315_s6 = scalar_lea.vmem [#allocation16], %s2773_s10 }
 0x106   : > { %p2774_p8 = scmp.ne.s32.totalorder %s4311_s29, 0 }
 0x107   : > { %v358_v0 = vld [vmem:[%s4285_s11 + $0x20] sm:$0xff] (!%p2774_p8)  ;;  %v359_v1 = vld [vmem:[%s4285_s11 + $0x28] sm:$0xff] (!%p2774_p8)  ;;  %vm374_vm0 = vcmask (!%p2774_p8), 523264   ;;  %vm400_vm1 = vcmask (!%p2774_p8), 7168   ;;  %v3800_v4 = vmov (!%p2774_p8), 0.0   ;;  %v360_v10 = vld [vmem:[%s4285_s11 + $0x30] sm:$0xff] (!%p2774_p8) }
 0x108   : > { %353 = sbr.rel (%p2774_p8) target bundleno = 390 (0x186), region = 48  ;;  %v366_v2 = vmul.f32 (!%p2774_p8), 0.125, %v358_v0  ;;  %v367_v3 = vmul.f32 (!%p2774_p8), 0.125, %v359_v1  ;;  %417 = vst.msk [vmem:[#allocation4] sm:$0xff] (!%p2774_p8), %vm400_vm1, %v3800_v4  ;;  %418 = vst.msk [vmem:[#allocation4 + $0x8] sm:$0xff] (!%p2774_p8), %vm400_vm1, %v3800_v4  ;;  %v354_v5 = vld [vmem:[%s4285_s11] sm:$0xff] (!%p2774_p8) }
 0x109   : > { %419 = vst.msk [vmem:[#allocation4 + $0x10] sm:$0xff] (!%p2774_p8), %vm400_vm1, %v3800_v4  ;;  %420 = vst.msk [vmem:[#allocation4 + $0x18] sm:$0xff] (!%p2774_p8), %vm400_vm1, %v3800_v4  ;;  %v355_v6 = vld [vmem:[%s4285_s11 + $0x8] sm:$0xff] (!%p2774_p8)  ;;  %v3801_v7 = vmov (!%p2774_p8), -1e+30   ;;  %v362_v8 = vmul.f32 (!%p2774_p8), 0.125, %v354_v5 }
 0x10a   : > { %421 = vst.msk [vmem:[#allocation4 + $0x20] sm:$0xff] (!%p2774_p8), %vm400_vm1, %v3800_v4  ;;  %422 = vst.msk [vmem:[#allocation4 + $0x28] sm:$0xff] (!%p2774_p8), %vm400_vm1, %v3800_v4  ;;  %v363_v9 = vmul.f32 (!%p2774_p8), 0.125, %v355_v6  ;;  %v361_v11 = vld [vmem:[%s4285_s11 + $0x38] sm:$0xff] (!%p2774_p8)  ;;  %v356_v12 = vld [vmem:[%s4285_s11 + $0x10] sm:$0xff] (!%p2774_p8)  ;;  %v372_v13 = vpack.c.bf16 (!%p2774_p8), %v367_v3, %v366_v2  ;;  %v368_v14 = vmul.f32 (!%p2774_p8), 0.125, %v360_v10 }
 0x10b   : > { %423 = vst.msk [vmem:[#allocation4 + $0x30] sm:$0xff] (!%p2774_p8), %vm400_vm1, %v3800_v4  ;;  %424 = vst.msk [vmem:[#allocation4 + $0x38] sm:$0xff] (!%p2774_p8), %vm400_vm1, %v3800_v4  ;;  %v369_v15 = vmul.f32 (!%p2774_p8), 0.125, %v361_v11  ;;  %v357_v16 = vld [vmem:[%s4285_s11 + $0x18] sm:$0xff] (!%p2774_p8)  ;;  %v364_v17 = vmul.f32 (!%p2774_p8), 0.125, %v356_v12  ;;  %s3802_s13 = smov (!%p2774_p8), 64  }
 0x10c   : > { %425 = vst.msk [vmem:[#allocation4 + $0x40] sm:$0xff] (!%p2774_p8), %vm400_vm1, %v3800_v4  ;;  %426 = vst.msk [vmem:[#allocation4 + $0x48] sm:$0xff] (!%p2774_p8), %vm400_vm1, %v3800_v4  ;;  %v370_v18 = vpack.c.bf16 (!%p2774_p8), %v363_v9, %v362_v8  ;;  %v365_v19 = vmul.f32 (!%p2774_p8), 0.125, %v357_v16  ;;  %387 = vrot.lane.b32.xlu1 (!%p2774_p8), %v372_v13, %s3802_s13 }
 0x10d   : > { %427 = vst.msk [vmem:[#allocation4 + $0x50] sm:$0xff] (!%p2774_p8), %vm400_vm1, %v3800_v4  ;;  %428 = vst.msk [vmem:[#allocation4 + $0x58] sm:$0xff] (!%p2774_p8), %vm400_vm1, %v3800_v4  ;;  %v373_v20 = vpack.c.bf16 (!%p2774_p8), %v369_v15, %v368_v14 }
 0x10e   : > { %429 = vst.msk [vmem:[#allocation4 + $0x60] sm:$0xff] (!%p2774_p8), %vm400_vm1, %v3800_v4  ;;  %430 = vst.msk [vmem:[#allocation4 + $0x68] sm:$0xff] (!%p2774_p8), %vm400_vm1, %v3800_v4  ;;  %383 = vrot.lane.b32.xlu0 (!%p2774_p8), %v370_v18, %s3802_s13  ;;  %v371_v21 = vpack.c.bf16 (!%p2774_p8), %v365_v19, %v364_v17 }
 0x10f   : > { %431 = vst.msk [vmem:[#allocation4 + $0x70] sm:$0xff] %vm400_vm1, %v3800_v4  ;;  %432 = vst.msk [vmem:[#allocation4 + $0x78] sm:$0xff] %vm400_vm1, %v3800_v4 }
 0x110   : > { %433 = vst.msk [vmem:[#allocation5] sm:$0xff] %vm374_vm0, %v3800_v4  ;;  %434 = vst.msk [vmem:[#allocation5 + $0x8] sm:$0xff] %vm374_vm0, %v3800_v4  ;;  %389 = vrot.lane.b32.xlu1 %v373_v20, %s3802_s13 }
 0x111   : > { %435 = vst.msk [vmem:[#allocation5 + $0x10] sm:$0xff] %vm374_vm0, %v3800_v4  ;;  %436 = vst.msk [vmem:[#allocation5 + $0x18] sm:$0xff] %vm374_vm0, %v3800_v4 }
 0x112   : > { %437 = vst.msk [vmem:[#allocation5 + $0x20] sm:$0xff] %vm374_vm0, %v3800_v4  ;;  %438 = vst.msk [vmem:[#allocation5 + $0x28] sm:$0xff] %vm374_vm0, %v3800_v4  ;;  %385 = vrot.lane.b32.xlu0 %v371_v21, %s3802_s13 }
 0x113   : > { %439 = vst.msk [vmem:[#allocation5 + $0x30] sm:$0xff] %vm374_vm0, %v3800_v4  ;;  %440 = vst.msk [vmem:[#allocation5 + $0x38] sm:$0xff] %vm374_vm0, %v3800_v4 }
 0x114   : > { %441 = vst.msk [vmem:[#allocation5 + $0x40] sm:$0xff] %vm374_vm0, %v3800_v4  ;;  %442 = vst.msk [vmem:[#allocation5 + $0x48] sm:$0xff] %vm374_vm0, %v3800_v4 }
 0x115   : > { %443 = vst.msk [vmem:[#allocation5 + $0x50] sm:$0xff] %vm374_vm0, %v3800_v4  ;;  %444 = vst.msk [vmem:[#allocation5 + $0x58] sm:$0xff] %vm374_vm0, %v3800_v4 }
 0x116   : > { %445 = vst.msk [vmem:[#allocation5 + $0x60] sm:$0xff] %vm374_vm0, %v3800_v4  ;;  %446 = vst.msk [vmem:[#allocation5 + $0x68] sm:$0xff] %vm374_vm0, %v3800_v4 }
 0x117   : > { %447 = vst.msk [vmem:[#allocation5 + $0x70] sm:$0xff] %vm374_vm0, %v3800_v4  ;;  %448 = vst.msk [vmem:[#allocation5 + $0x78] sm:$0xff] %vm374_vm0, %v3800_v4 }
 0x118   : > { %401 = vst.msk [vmem:[#allocation3] sm:$0xff] %vm400_vm1, %v3801_v7  ;;  %402 = vst.msk [vmem:[#allocation3 + $0x8] sm:$0xff] %vm400_vm1, %v3801_v7 }
 0x119   : > { %403 = vst.msk [vmem:[#allocation3 + $0x10] sm:$0xff] %vm400_vm1, %v3801_v7  ;;  %404 = vst.msk [vmem:[#allocation3 + $0x18] sm:$0xff] %vm400_vm1, %v3801_v7 }
 0x11a   : > { %405 = vst.msk [vmem:[#allocation3 + $0x20] sm:$0xff] %vm400_vm1, %v3801_v7  ;;  %406 = vst.msk [vmem:[#allocation3 + $0x28] sm:$0xff] %vm400_vm1, %v3801_v7 }
 0x11b   : > { %407 = vst.msk [vmem:[#allocation3 + $0x30] sm:$0xff] %vm400_vm1, %v3801_v7  ;;  %408 = vst.msk [vmem:[#allocation3 + $0x38] sm:$0xff] %vm400_vm1, %v3801_v7 }
 0x11c   : > { %409 = vst.msk [vmem:[#allocation3 + $0x40] sm:$0xff] %vm400_vm1, %v3801_v7  ;;  %410 = vst.msk [vmem:[#allocation3 + $0x48] sm:$0xff] %vm400_vm1, %v3801_v7 }
 0x11d   : > { %411 = vst.msk [vmem:[#allocation3 + $0x50] sm:$0xff] %vm400_vm1, %v3801_v7  ;;  %412 = vst.msk [vmem:[#allocation3 + $0x58] sm:$0xff] %vm400_vm1, %v3801_v7 }
 0x11e   : > { %413 = vst.msk [vmem:[#allocation3 + $0x60] sm:$0xff] %vm400_vm1, %v3801_v7  ;;  %414 = vst.msk [vmem:[#allocation3 + $0x68] sm:$0xff] %vm400_vm1, %v3801_v7 }
 0x11f   : > { %415 = vst.msk [vmem:[#allocation3 + $0x70] sm:$0xff] %vm400_vm1, %v3801_v7  ;;  %416 = vst.msk [vmem:[#allocation3 + $0x78] sm:$0xff] %vm400_vm1, %v3801_v7 }
 0x120   : > { %377 = vst.msk [vmem:[#allocation2 + $0x10] sm:$0xff] %vm374_vm0, %v372_v13  ;;  %375 = vst.msk [vmem:[#allocation2] sm:$0xff] %vm374_vm0, %v370_v18 }
 0x121   : > { %378 = vst.msk [vmem:[#allocation2 + $0x18] sm:$0xff] %vm374_vm0, %v373_v20  ;;  %376 = vst.msk [vmem:[#allocation2 + $0x8] sm:$0xff] %vm374_vm0, %v371_v21 }
 0x17e   : > { %v388_v22 = vpop.permute.xlu1 %387 }
 0x17f   : > { %398 = vst.msk [vmem:[#allocation2 + $0x30] sm:$0xff] %vm374_vm0, %v388_v22 }
 0x180   : > { %v384_v23 = vpop.permute.xlu0 %383 }
 0x181   : > { %396 = vst.msk [vmem:[#allocation2 + $0x20] sm:$0xff] %vm374_vm0, %v384_v23 }
 0x182   : > { %v390_v24 = vpop.permute.xlu1 %389 }
 0x183   : > { %399 = vst.msk [vmem:[#allocation2 + $0x38] sm:$0xff] %vm374_vm0, %v390_v24 }
 0x184   : > { %v386_v25 = vpop.permute.xlu0 %385 }
 0x185   : > { %397 = vst.msk [vmem:[#allocation2 + $0x28] sm:$0xff] %vm374_vm0, %v386_v25 }
 0x186 PF: > { %v449_v26 = vld [vmem:[%s4293_s2] sm:$0xff]  ;;  %v450_v27 = vld [vmem:[%s4293_s2 + $0x8] sm:$0xff]  ;;  %v451_v28 = vld [vmem:[%s4293_s2 + $0x10] sm:$0xff]  ;;  %s2775_s21 = sshll.u32 %s4311_s29, 7  ;;  %s4387_s25 = sshll.u32 %s4308_s28, 6 }
 0x187   : > { %v452_v29 = vld [vmem:[%s4293_s2 + $0x18] sm:$0xff]  ;;  %v453_v30 = vld [vmem:[%s4293_s2 + $0x20] sm:$0xff]  ;;  %v454_v31 = vld [vmem:[%s4293_s2 + $0x28] sm:$0xff]  ;;  %v4392_v32 = vpack.c.bf16 %v450_v27, %v449_v26  ;;  %s4396_s27 = sadd.s32 127, %s2775_s21 }
 0x188   : > { %v455_v33 = vld [vmem:[%s4293_s2 + $0x30] sm:$0xff]  ;;  %v456_v34 = vld [vmem:[%s4293_s2 + $0x38] sm:$0xff]  ;;  %v457_v35 = vld [vmem:[%s4293_s2 + $0x40] sm:$0xff]  ;;  %v4401_v36 = vpack.c.bf16 %v452_v29, %v451_v28  ;;  %v4403_v37 = vpack.c.bf16 %v454_v31, %v453_v30  ;;  %p2777_p2 = scmp.le.s32.totalorder %s4396_s27, %s4387_s25 }
 0x189   : > { %v458_v38 = vld [vmem:[%s4293_s2 + $0x48] sm:$0xff]  ;;  %v459_v39 = vld [vmem:[%s4293_s2 + $0x50] sm:$0xff]  ;;  %v460_v40 = vld [vmem:[%s4293_s2 + $0x58] sm:$0xff]  ;;  %v4408_v41 = vpack.c.bf16 %v456_v34, %v455_v33  ;;  %vm538_vm2 = vcmask (!%p2777_p2), 523264   ;;  %v504_v22 = vlaneseq (!%p2777_p2)  ;;  %v513_v26 = vstv (!%p2777_p2), %s4387_s25  ;;  %s3804_s15 = smov (!%p2777_p2), 64  }
 0x18a   : > { %5846 = vst [vmem:[#allocation50_spill] sm:$0xff] %v4403_v37  ;;  %v461_v42 = vld [vmem:[%s4293_s2 + $0x60] sm:$0xff]  ;;  %v462_v43 = vld [vmem:[%s4293_s2 + $0x68] sm:$0xff]  ;;  %v463_v44 = vld [vmem:[%s4293_s2 + $0x70] sm:$0xff]  ;;  %v4413_v45 = vpack.c.bf16 %v458_v38, %v457_v35  ;;  %v4415_v46 = vpack.c.bf16 %v460_v40, %v459_v39  ;;  %3095 = vmatprep.subr.msk.bf16.mxu0 (!%p2777_p2), %vm538_vm2, %v4392_v32  ;;  %v552_v11 = vsel (!%p2777_p2), %vm538_vm2, %v4392_v32, 0  ;;  %v555_v12 = vsel (!%p2777_p2), %vm538_vm2, %v4401_v36, 0 }
 0x18b   : > { %5847 = vst [vmem:[#allocation51_spill] sm:$0xff] %v4408_v41  ;;  %v464_v47 = vld [vmem:[%s4293_s2 + $0x78] sm:$0xff]  ;;  %v4418_v48 = vpack.c.bf16 %v462_v43, %v461_v42  ;;  %v473_v49 = vld [vmem:[%s4300_s17] sm:$0xff]  ;;  %v474_v50 = vld [vmem:[%s4300_s17 + $0x8] sm:$0xff]  ;;  %2904 = vmatpush3.bf16.xpose.msra.mxu0 (!%p2777_p2), %v552_v11  ;;  %v558_v13 = vsel (!%p2777_p2), %vm538_vm2, %v4403_v37, 0  ;;  %v561_v14 = vsel (!%p2777_p2), %vm538_vm2, %v4408_v41, 0  ;;  %v524_v27 = vstv (!%p2777_p2), %s2775_s21 }
 0x18c   : > { %5848 = vst [vmem:[#allocation52_spill] sm:$0xff] %v4413_v45  ;;  %5849 = vst [vmem:[#allocation53_spill] sm:$0xff] %v4415_v46  ;;  %v4422_v51 = vpack.c.bf16 %v464_v47, %v463_v44  ;;  %v475_v52 = vld [vmem:[%s4300_s17 + $0x10] sm:$0xff]  ;;  %v476_v53 = vld [vmem:[%s4300_s17 + $0x18] sm:$0xff]  ;;  %v4427_v55 = vpack.c.bf16 %v474_v50, %v473_v49  ;;  %3096 = vmatprep.subr.msk.bf16.mxu0 (!%p2777_p2), %vm538_vm2, %v4401_v36  ;;  %v564_v15 = vsel (!%p2777_p2), %vm538_vm2, %v4413_v45, 0  ;;  %v567_v16 = vsel (!%p2777_p2), %vm538_vm2, %v4415_v46, 0 }
 0x18d   : > { %5850 = vst [vmem:[#allocation54_spill] sm:$0xff] %v4418_v48  ;;  %v477_v54 = vld [vmem:[%s4300_s17 + $0x20] sm:$0xff]  ;;  %v478_v56 = vld [vmem:[%s4300_s17 + $0x28] sm:$0xff]  ;;  %v479_v57 = vld [vmem:[%s4300_s17 + $0x30] sm:$0xff]  ;;  %v4432_v59 = vpack.c.bf16 %v476_v53, %v475_v52  ;;  %503 = sbr.rel (%p2777_p2) target bundleno = 1784 (0x6f8), region = 52  ;;  %v570_v17 = vsel (!%p2777_p2), %vm538_vm2, %v4418_v48, 0 }
 0x18e   : > { %5851 = vst [vmem:[#allocation55_spill] sm:$0xff] %v4422_v51  ;;  %v480_v58 = vld [vmem:[%s4300_s17 + $0x38] sm:$0xff]  ;;  %v481_v60 = vld [vmem:[%s4300_s17 + $0x40] sm:$0xff]  ;;  %v482_v61 = vld [vmem:[%s4300_s17 + $0x48] sm:$0xff]  ;;  %v4437_v63 = vpack.c.bf16 %v478_v56, %v477_v54  ;;  %2927 = vmatprep.subr.bf16.mxu1 (!%p2777_p2), %v4427_v55  ;;  %v573_v18 = vsel (!%p2777_p2), %vm538_vm2, %v4422_v51, 0  ;;  %v505_v23 = vshrl.u32 (!%p2777_p2), %v504_v22, 7 }
 0x18f   : > { %5852 = vst [vmem:[#allocation56_spill] sm:$0xff] %v4432_v59  ;;  %v483_v62 = vld [vmem:[%s4300_s17 + $0x50] sm:$0xff]  ;;  %v4439_v0 = vpack.c.bf16 %v480_v58, %v479_v57  ;;  %v484_v1 = vld [vmem:[%s4300_s17 + $0x58] sm:$0xff]  ;;  %v485_v2 = vld [vmem:[%s4300_s17 + $0x60] sm:$0xff]  ;;  %v4444_v4 = vpack.c.bf16 %v482_v61, %v481_v60  ;;  %2928 = vmatpush3.bf16.msra.mxu1 (!%p2777_p2), %v4427_v55  ;;  %v523_v25 = vand.u32 (!%p2777_p2), 127, %v504_v22  ;;  %v3803_v11 = vmov (!%p2777_p2), 0  }
 0x190   : > { %5853 = vst [vmem:[#allocation57_spill] sm:$0xff] %v4437_v63  ;;  %v486_v3 = vld [vmem:[%s4300_s17 + $0x68] sm:$0xff]  ;;  %v487_v5 = vld [vmem:[%s4300_s17 + $0x70] sm:$0xff]  ;;  %v488_v6 = vld [vmem:[%s4300_s17 + $0x78] sm:$0xff]  ;;  %v4448_v7 = vpack.c.bf16 %v484_v1, %v483_v62  ;;  %2929 = vmatprep.subr.bf16.mxu1 (!%p2777_p2), %v4432_v59  ;;  %v507_v24 = vadd.s32 (!%p2777_p2), 16, %v505_v23  ;;  %v508_v30 = vadd.s32 (!%p2777_p2), 24, %v505_v23  ;;  %v4515_v31 = vadd.s32 (!%p2777_p2), %v513_v26, %v505_v23  ;;  %3336 = vset.pattern.permute.xlu1 (!%p2777_p2), %v3803_v11 }
 0x191   : > { %5854 = vst [vmem:[#allocation58_spill] sm:$0xff] %v4444_v4  ;;  %v4450_v8 = vpack.c.bf16 %v486_v3, %v485_v2  ;;  %v4452_v9 = vpack.c.bf16 %v488_v6, %v487_v5  ;;  %v534_v10 = vld [vmem:[#allocation2] sm:$0xff] (!%p2777_p2)  ;;  %v535_v19 = vld [vmem:[#allocation2 + $0x8] sm:$0xff] (!%p2777_p2)  ;;  %v536_v20 = vld [vmem:[#allocation2 + $0x10] sm:$0xff] (!%p2777_p2)  ;;  %v4513_v29 = vadd.s32 (!%p2777_p2), %v524_v27, %v523_v25  ;;  %v506_v33 = vadd.s32 (!%p2777_p2), 8, %v505_v23  ;;  %3335 = vset.pattern.permute.xlu0 (!%p2777_p2), %v3803_v11 }
 0x192   : > { %5855 = vst [vmem:[#allocation59_spill] sm:$0xff] %v4448_v7  ;;  %2919 = vmatprep.mubr.msk.bf16.mxu0 (!%p2777_p2), %vm538_vm2, %v534_v10  ;;  %v537_v21 = vld [vmem:[#allocation2 + $0x18] sm:$0xff] (!%p2777_p2)  ;;  %v4511_v28 = vadd.s32 (!%p2777_p2), %v513_v26, %v507_v24  ;;  %v4519_v34 = vadd.s32 (!%p2777_p2), %v513_v26, %v508_v30  ;;  %v511_v35 = vadd.s32 (!%p2777_p2), 48, %v505_v23  ;;  %v512_v40 = vadd.s32 (!%p2777_p2), 56, %v505_v23  ;;  %v4627_v27 = vld [vmem:[#allocation3 + $0x30] sm:$0xff] (!%p2777_p2) }
 0x193   : > { %5856 = vst [vmem:[#allocation60_spill] sm:$0xff] %v4450_v8  ;;  %2930 = vmatpush3.bf16.msra.mxu1 (!%p2777_p2), %v4432_v59  ;;  %2906 = vmatpush3.bf16.xpose.msra.mxu0 (!%p2777_p2), %v555_v12  ;;  %vm526_vm4 = vcmp.ge.s32.totalorder (!%p2777_p2), %v4515_v31, %v4513_v29  ;;  %v4523_v38 = vadd.s32 (!%p2777_p2), %v513_v26, %v506_v33  ;;  %v509_v44 = vadd.s32 (!%p2777_p2), 32, %v505_v23  ;;  %v510_v50 = vadd.s32 (!%p2777_p2), 40, %v505_v23  ;;  %v4593_v12 = vld [vmem:[#allocation3 + $0x10] sm:$0xff] (!%p2777_p2)  ;;  %v4634_v33 = vld [vmem:[#allocation3 + $0x38] sm:$0xff] (!%p2777_p2) }
 0x194   : > { %2931 = vmatprep.subr.bf16.mxu1 %v4437_v63  ;;  %3097 = vmatprep.subr.msk.bf16.mxu0 %vm538_vm2, %v4403_v37  ;;  %vm528_vm3 = vcmp.ge.s32.totalorder %v4511_v28, %v4513_v29  ;;  %vm529_vm5 = vcmp.ge.s32.totalorder %v4519_v34, %v4513_v29  ;;  %v4538_v52 = vadd.s32 %v513_v26, %v511_v35  ;;  %vm816_vm11 = vcmask 7168  }
 0x195   : > { %vm527_vm6 = vcmp.ge.s32.totalorder %v4523_v38, %v4513_v29  ;;  %v4543_v54 = vadd.s32 %v513_v26, %v512_v40  ;;  %v4550_v57 = vadd.s32 %v513_v26, %v509_v44  ;;  %v4558_v60 = vadd.s32 %v513_v26, %v510_v50  ;;  %v4642_v44 = vld [vmem:[#allocation3 + $0x20] sm:$0xff] }
 0x196   : > { %vm532_vm7 = vcmp.ge.s32.totalorder %v4538_v52, %v4513_v29  ;;  %v4799_v52 = vld [vmem:[#allocation3 + $0x40] sm:$0xff] }
 0x197   : > { %2932 = vmatpush3.bf16.msra.mxu1 %v4437_v63  ;;  %vm533_vm8 = vcmp.ge.s32.totalorder %v4543_v54, %v4513_v29  ;;  %vm530_vm9 = vcmp.ge.s32.totalorder %v4550_v57, %v4513_v29  ;;  %vm531_vm10 = vcmp.ge.s32.totalorder %v4558_v60, %v4513_v29 }
 0x198   : > { %2933 = vmatprep.subr.bf16.mxu1 %v4439_v0 }
 0x19b   : > { %2934 = vmatpush3.bf16.msra.mxu1 %v4439_v0  ;;  %2908 = vmatpush3.bf16.xpose.msra.mxu0 %v558_v13  ;;  %v4595_v13 = vld [vmem:[#allocation3] sm:$0xff] }
 0x19c   : > { %2935 = vmatprep.subr.bf16.mxu1 %v4444_v4  ;;  %3098 = vmatprep.subr.msk.bf16.mxu0 %vm538_vm2, %v4408_v41 }
 0x19f   : > { %2936 = vmatpush3.bf16.msra.mxu1 %v4444_v4 }
 0x1a0   : > { %2937 = vmatprep.subr.bf16.mxu1 %v4448_v7 }
 0x1a3   : > { %2938 = vmatpush3.bf16.msra.mxu1 %v4448_v7  ;;  %2910 = vmatpush3.bf16.xpose.msra.mxu0 %v561_v14 }
 0x1a4   : > { %2939 = vmatprep.subr.bf16.mxu1 %v4450_v8  ;;  %3099 = vmatprep.subr.msk.bf16.mxu0 %vm538_vm2, %v4413_v45 }
 0x1a7   : > { %2940 = vmatpush3.bf16.msra.mxu1 %v4450_v8 }
 0x1a8   : > { %2941 = vmatprep.subr.bf16.mxu1 %v4452_v9 }
 0x1ab   : > { %2942 = vmatpush3.bf16.msra.mxu1 %v4452_v9  ;;  %2912 = vmatpush3.bf16.xpose.msra.mxu0 %v564_v15 }
 0x1ac   : > { %3100 = vmatprep.subr.msk.bf16.mxu0 %vm538_vm2, %v4415_v46 }
 0x1b3   : > { %2914 = vmatpush3.bf16.xpose.msra.mxu0 %v567_v16 }
 0x1b4   : > { %3101 = vmatprep.subr.msk.bf16.mxu0 %vm538_vm2, %v4418_v48 }
 0x1bb   : > { %2916 = vmatpush3.bf16.xpose.msra.mxu0 %v570_v17 }
 0x1bc   : > { %3102 = vmatprep.subr.msk.bf16.mxu0 %vm538_vm2, %v4422_v51 }
 0x1c3   : > { %2918 = vmatpush3.bf16.xpose.msra.mxu0 %v573_v18  ;;  %v4603_v18 = vld [vmem:[#allocation3 + $0x18] sm:$0xff] }
 0x1ca   : > { %2920 = vmatmul.mubr.msk.bf16.vlgmr.msra.gmra.mrb[0].mxu0 %vm538_vm2, %v535_v19 }
 0x1cb   : > { %2923 = vmatprep.mubr.msk.bf16.mxu0 %vm538_vm2, %v536_v20  ;;  %v4610_v20 = vld [vmem:[#allocation3 + $0x8] sm:$0xff] }
 0x1d2   : > { %2924 = vmatmul.mubr.msk.bf16.gmra.mrb[4].mxu0 %vm538_vm2, %v537_v21 }
 0x29d   : > { %v2921_v39 = vpop.f32.mrb[0].mxu0 }
 0x29e   : > { %v609_v42 = vpop.f32.mrb[1].mxu0  ;;  %v4528_v43 = vsel %vm528_vm3, %v2921_v39, -1e+30 }
 0x29f   : > { %v2922_v47 = vpop.f32.mrb[2].mxu0  ;;  %660 = vmax.xlane.f32.xlu1 %v4528_v43  ;;  %v4534_v49 = vsel %vm526_vm4, %v609_v42, -1e+30 }
 0x2a0   : > { %v612_v53 = vpop.f32.mrb[3].mxu0  ;;  %656 = vmax.xlane.f32.xlu0 %v4534_v49  ;;  %v4548_v56 = vsel %vm529_vm5, %v2922_v47, -1e+30  ;;  %v4645_v47 = vld [vmem:[#allocation3 + $0x28] sm:$0xff] }
 0x2a1   : > { %v4556_v58 = vsel %vm527_vm6, %v612_v53, -1e+30 }
 0x2a3   : > { %662 = vmax.xlane.f32.xlu1 %v4548_v56 }
 0x2a4   : > { %658 = vmax.xlane.f32.xlu0 %v4556_v58 }
 0x2a5   : > { %v2925_v61 = vpop.f32.mrb[4].mxu0 }
 0x2a6   : > { %v625_v62 = vpop.f32.mrb[5].mxu0  ;;  %v4568_v1 = vsel %vm532_vm7, %v2925_v61, -1e+30 }
 0x2a7   : > { %v2926_v2 = vpop.f32.mrb[6].mxu0  ;;  %v4584_v6 = vsel %vm530_vm9, %v625_v62, -1e+30 }
 0x2a8   : > { %v4577_v3 = vsel %vm533_vm8, %v2926_v2, -1e+30  ;;  %v628_v5 = vpop.f32.mrb[7].mxu0  ;;  %668 = vmax.xlane.f32.xlu0 %v4568_v1 }
 0x2a9   : > { %670 = vmax.xlane.f32.xlu1 %v4577_v3  ;;  %v4589_v10 = vsel %vm531_vm10, %v628_v5, -1e+30 }
 0x2ac   : > { %664 = vmax.xlane.f32.xlu0 %v4584_v6 }
 0x2ad   : > { %666 = vmax.xlane.f32.xlu1 %v4589_v10 }
 0x32c   : > { %v661_v14 = vpop.xlane.xlu1 %660 }
 0x32d   : > { %v4598_v15 = vmax.f32 %v4593_v12, %v661_v14  ;;  %v657_v16 = vpop.xlane.xlu0 %656 }
 0x32e   : > { %v4601_v17 = vmax.f32 %v4595_v13, %v657_v16 }
 0x32f   : > { %964 = vst.msk [vmem:[#allocation3 + $0x10] sm:$0xff] %vm816_vm11, %v4598_v15  ;;  %716 = vperm.xlu1 %3336, %v4598_v15  }
 0x330   : > { %962 = vst.msk [vmem:[#allocation3] sm:$0xff] %vm816_vm11, %v4601_v17  ;;  %v663_v22 = vpop.xlane.xlu1 %662  ;;  %706 = vperm.xlu0 %3335, %v4601_v17  }
 0x331   : > { %v4618_v23 = vmax.f32 %v4603_v18, %v663_v22  ;;  %v659_v24 = vpop.xlane.xlu0 %658 }
 0x332   : > { %v4621_v25 = vmax.f32 %v4610_v20, %v659_v24 }
 0x333   : > { %965 = vst.msk [vmem:[#allocation3 + $0x18] sm:$0xff] %vm816_vm11, %v4618_v23 }
 0x334   : > { %963 = vst.msk [vmem:[#allocation3 + $0x8] sm:$0xff] %vm816_vm11, %v4621_v25  ;;  %711 = vperm.xlu1 %3336, %v4621_v25  }
 0x335   : > { %v669_v35 = vpop.xlane.xlu0 %668 }
 0x336   : > { %v671_v39 = vpop.xlane.xlu1 %670  ;;  %v4637_v40 = vmax.f32 %v4627_v27, %v669_v35 }
 0x337   : > { %v4640_v42 = vmax.f32 %v4634_v33, %v671_v39 }
 0x338   : > { %721 = vperm.xlu1 %3336, %v4618_v23   ;;  %968 = vst.msk [vmem:[#allocation3 + $0x30] sm:$0xff] %vm816_vm11, %v4637_v40 }
 0x339   : > { %969 = vst.msk [vmem:[#allocation3 + $0x38] sm:$0xff] %vm816_vm11, %v4640_v42  ;;  %v665_v61 = vpop.xlane.xlu0 %664 }
 0x33a   : > { %v667_v62 = vpop.xlane.xlu1 %666  ;;  %v4656_v2 = vmax.f32 %v4642_v44, %v665_v61 }
 0x33b   : > { %v4659_v5 = vmax.f32 %v4645_v47, %v667_v62 }
 0x33c   : > { %983 = vrot.lane.b32.xlu1 %v4392_v32, %s3804_s15  ;;  %966 = vst.msk [vmem:[#allocation3 + $0x20] sm:$0xff] %vm816_vm11, %v4656_v2 }
 0x33d   : > { %967 = vst.msk [vmem:[#allocation3 + $0x28] sm:$0xff] %vm816_vm11, %v4659_v5  ;;  %731 = vperm.xlu0 %3335, %v4659_v5  }
 0x340   : > { %985 = vrot.lane.b32.xlu1 %v4401_v36, %s3804_s15 }
 0x341   : > { %741 = vperm.xlu0 %3335, %v4640_v42  }
 0x344   : > { %987 = vrot.lane.b32.xlu1 %v4403_v37, %s3804_s15 }
 0x345   : > { %993 = vrot.lane.b32.xlu0 %v4415_v46, %s3804_s15 }
 0x348   : > { %989 = vrot.lane.b32.xlu1 %v4408_v41, %s3804_s15  ;;  %v4850_v41 = vld [vmem:[#allocation3 + $0x78] sm:$0xff] }
 0x349   : > { %997 = vrot.lane.b32.xlu0 %v4422_v51, %s3804_s15 }
 0x34c   : > { %736 = vperm.xlu1 %3336, %v4637_v40  }
 0x350   : > { %726 = vperm.xlu1 %3336, %v4656_v2  }
 0x354   : > { %991 = vrot.lane.b32.xlu1 %v4413_v45, %s3804_s15  ;;  %v4848_v45 = vld [vmem:[#allocation3 + $0x70] sm:$0xff] }
 0x358   : > { %995 = vrot.lane.b32.xlu1 %v4418_v48, %s3804_s15 }
 0x3ae   : > { %v717_v16 = vpop.permute.xlu1 %716 }
 0x3af   : > { %v707_v22 = vpop.permute.xlu0 %706  ;;  %v746_v53 = vsub.f32 %v4528_v43, %v717_v16 }
 0x3b0   : > { %v744_v35 = vsub.f32 %v4534_v49, %v707_v22 }
 0x3b3   : > { %v712_v24 = vpop.permute.xlu1 %711 }
 0x3b4   : > { %v745_v39 = vsub.f32 %v4556_v58, %v712_v24 }
 0x3b6   : > { %v752_v61 = vpack.c.bf16 %v745_v39, %v744_v35 }
 0x3b7   : > { %v722_v62 = vpop.permute.xlu1 %721 }
 0x3b8   : > { %v757_v50 = vmul.bf16 1069105081, %v752_v61  ;;  %v747_v14 = vsub.f32 %v4548_v56, %v722_v62 }
 0x3ba   : > { %3337 = vpow.bf16 %v757_v50  ;;  %v753_v11 = vpack.c.bf16 %v747_v14, %v746_v53 }
 0x3bb   : > { %v984_v26 = vpop.permute.xlu1 %983 }
 0x3bc   : > { %v760_v19 = vmul.bf16 1069105081, %v753_v11  ;;  %3103 = vmatprep.subr.msk.bf16.mxu1 %vm538_vm2, %v984_v26  ;;  %v732_v49 = vpop.permute.xlu0 %731  ;;  %v1012_v43 = vsel %vm538_vm2, %v984_v26, 0 }
 0x3bd   : > { %v749_v14 = vsub.f32 %v4589_v10, %v732_v49 }
 0x3be   : > { %3339 = vpow.bf16 %v760_v19 }
 0x3bf   : > { %v986_v21 = vpop.permute.xlu1 %985 }
 0x3c0   : > { %v742_v56 = vpop.permute.xlu0 %741  ;;  %v1015_v35 = vsel %vm538_vm2, %v986_v21, 0 }
 0x3c1   : > { %v751_v19 = vsub.f32 %v4577_v3, %v742_v56 }
 0x3c3   : > { %v988_v30 = vpop.permute.xlu1 %987 }
 0x3c4   : > { %v994_v49 = vpop.permute.xlu0 %993 }
 0x3c5   : > { %v4694_v51 = vpop.eup %3337 }
 0x3c6   : > { %2943 = vmatprep.mubr.bf16.mxu1 %v4694_v51  ;;  %v784_v37 = vunpack.c.l.bf16 %v4694_v51 }
 0x3c7   : > { %v990_v58 = vpop.permute.xlu1 %989 }
 0x3c9   : > { %v4697_v22 = vpop.eup %3339 }
 0x3ca   : > { %2944 = vmatmul.mubr.bf16.vlgmr.msra.gmra.mrb[0].mxu1 %v4697_v22 }
 0x3cb   : > { %2952 = vmatpush3.bf16.xpose.msra.mxu1 %v1012_v43  ;;  %v737_v50 = vpop.permute.xlu1 %736 }
 0x3cc   : > { %v750_v53 = vsub.f32 %v4568_v1, %v737_v50  ;;  %3104 = vmatprep.subr.msk.bf16.mxu1 %vm538_vm2, %v986_v21  ;;  %v1018_v1 = vsel %vm538_vm2, %v988_v30, 0  ;;  %v971_v21 = vld [vmem:[#allocation2 + $0x20] sm:$0xff]  ;;  %v998_v50 = vpop.permute.xlu0 %997 }
 0x3ce   : > { %v755_v16 = vpack.c.bf16 %v751_v19, %v750_v53  ;;  %v1033_v53 = vsel %vm538_vm2, %v998_v50, 0  ;;  %v972_v19 = vld [vmem:[#allocation2 + $0x28] sm:$0xff] }
 0x3cf   : > { %v727_v11 = vpop.permute.xlu1 %726 }
 0x3d0   : > { %v748_v24 = vsub.f32 %v4584_v6, %v727_v11  ;;  %v766_v39 = vmul.bf16 1069105081, %v755_v16  ;;  %v1021_v6 = vsel %vm538_vm2, %v990_v58, 0  ;;  %v973_v11 = vld [vmem:[#allocation2 + $0x30] sm:$0xff] }
 0x3d2   : > { %v754_v26 = vpack.c.bf16 %v749_v14, %v748_v24  ;;  %v974_v14 = vld [vmem:[#allocation2 + $0x38] sm:$0xff] }
 0x3d3   : > { %2954 = vmatpush3.bf16.xpose.msra.mxu1 %v1015_v35  ;;  %v992_v10 = vpop.permute.xlu1 %991 }
 0x3d4   : > { %v763_v61 = vmul.bf16 1069105081, %v754_v26  ;;  %3105 = vmatprep.subr.msk.bf16.mxu1 %vm538_vm2, %v988_v30  ;;  %v1024_v30 = vsel %vm538_vm2, %v992_v10, 0 }
 0x3d6   : > { %3341 = vpow.bf16 %v763_v61 }
 0x3d7   : > { %3343 = vpow.bf16 %v766_v39  ;;  %v996_v43 = vpop.permute.xlu1 %995 }
 0x3d8   : > { %v1030_v56 = vsel %vm538_vm2, %v996_v43, 0 }
 0x3db   : > { %2956 = vmatpush3.bf16.xpose.msra.mxu1 %v1018_v1 }
 0x3dc   : > { %3106 = vmatprep.subr.msk.bf16.mxu1 %vm538_vm2, %v990_v58  ;;  %v1027_v58 = vsel %vm538_vm2, %v994_v49, 0 }
 0x3e1   : > { %v4710_v3 = vpop.eup %3341 }
 0x3e2   : > { %2947 = vmatprep.mubr.bf16.mxu1 %v4710_v3  ;;  %v4714_v62 = vpop.eup %3343 }
 0x3e3   : > { %2958 = vmatpush3.bf16.xpose.msra.mxu1 %v1021_v6 }
 0x3e4   : > { %2948 = vmatmul.mubr.bf16.gmra.mrb[4].mxu1 %v4714_v62  ;;  %3107 = vmatprep.subr.msk.bf16.mxu1 %vm538_vm2, %v992_v10 }
 0x3e5   : > { %2967 = vmatprep.mubr.msk.bf16.mxu1 %vm538_vm2, %v971_v21 }
 0x3eb   : > { %2960 = vmatpush3.bf16.xpose.msra.mxu1 %v1024_v30 }
 0x3ec   : > { %3108 = vmatprep.subr.msk.bf16.mxu1 %vm538_vm2, %v994_v49 }
 0x3f3   : > { %2962 = vmatpush3.bf16.xpose.msra.mxu1 %v1027_v58 }
 0x3f4   : > { %3109 = vmatprep.subr.msk.bf16.mxu1 %vm538_vm2, %v996_v43 }
 0x3fb   : > { %2964 = vmatpush3.bf16.xpose.msra.mxu1 %v1030_v56 }
 0x3fc   : > { %3110 = vmatprep.subr.msk.bf16.mxu1 %vm538_vm2, %v998_v50 }
 0x403   : > { %2966 = vmatpush3.bf16.xpose.msra.mxu1 %v1033_v53 }
 0x40a   : > { %2968 = vmatmul.mubr.msk.bf16.vlgmr.msra.gmra.mrb[8].mxu1 %vm538_vm2, %v972_v19 }
 0x40b   : > { %2971 = vmatprep.mubr.msk.bf16.mxu1 %vm538_vm2, %v973_v11 }
 0x412   : > { %2972 = vmatmul.mubr.msk.bf16.gmra.mrb[12].mxu1 %vm538_vm2, %v974_v14  ;;  %v4801_v14 = vld [vmem:[#allocation3 + $0x48] sm:$0xff] }
 0x49d   : > { %v4729_v16 = vpop.f32.mrb[0].mxu1 }
 0x49e   : > { %v4731_v24 = vpop.f32.mrb[1].mxu1 }
 0x49f   : > { %v4733_v35 = vpop.f32.mrb[2].mxu1 }
 0x4a0   : > { %v4735_v26 = vpop.f32.mrb[3].mxu1 }
 0x4b7   : > { %v4737_v39 = vpop.f32.mrb[4].mxu1 }
 0x4b8   : > { %v4739_v61 = vpop.f32.mrb[5].mxu1 }
 0x4b9   : > { %v4741_v1 = vpop.f32.mrb[6].mxu1 }
 0x4ba   : > { %v4743_v10 = vpop.f32.mrb[7].mxu1 }
 0x4dd   : > { %v2969_v6 = vpop.f32.mrb[8].mxu1 }
 0x4de   : > { %v1069_v21 = vpop.f32.mrb[9].mxu1  ;;  %v4766_v50 = vsel %vm528_vm3, %v2969_v6, -1e+30  ;;  %v4806_v6 = vld [vmem:[#allocation3 + $0x58] sm:$0xff] }
 0x4df   : > { %v2970_v30 = vpop.f32.mrb[10].mxu1  ;;  %v4748_v49 = vsel %vm526_vm4, %v1069_v21, -1e+30  ;;  %v4832_v21 = vld [vmem:[#allocation3 + $0x60] sm:$0xff] }
 0x4e0   : > { %1117 = vmax.xlane.f32.xlu1 %v4748_v49  ;;  %v1072_v58 = vpop.f32.mrb[11].mxu1  ;;  %v4760_v56 = vsel %vm529_vm5, %v2970_v30, -1e+30 }
 0x4e1   : > { %v4754_v43 = vsel %vm527_vm6, %v1072_v58, -1e+30 }
 0x4e2   : > { %1119 = vmax.xlane.f32.xlu0 %v4754_v43 }
 0x4e4   : > { %1123 = vmax.xlane.f32.xlu1 %v4760_v56 }
 0x4e5   : > { %v2973_v31 = vpop.f32.mrb[12].mxu1 }
 0x4e6   : > { %1121 = vmax.xlane.f32.xlu0 %v4766_v50  ;;  %v1085_v38 = vpop.f32.mrb[13].mxu1  ;;  %v4784_v28 = vsel %vm532_vm7, %v2973_v31, -1e+30  ;;  %v4815_v31 = vld [vmem:[#allocation3 + $0x50] sm:$0xff] }
 0x4e7   : > { %v2974_v53 = vpop.f32.mrb[14].mxu1  ;;  %v4772_v19 = vsel %vm530_vm9, %v1085_v38, -1e+30  ;;  %v4834_v38 = vld [vmem:[#allocation3 + $0x68] sm:$0xff] }
 0x4e8   : > { %v1088_v34 = vpop.f32.mrb[15].mxu1  ;;  %v4789_v57 = vsel %vm533_vm8, %v2974_v53, -1e+30 }
 0x4e9   : > { %v4777_v11 = vsel %vm531_vm10, %v1088_v34, -1e+30 }
 0x4ea   : > { %1125 = vmax.xlane.f32.xlu0 %v4772_v19  ;;  %1127 = vmax.xlane.f32.xlu1 %v4777_v11 }
 0x4ee   : > { %1129 = vmax.xlane.f32.xlu0 %v4784_v28  ;;  %1131 = vmax.xlane.f32.xlu1 %v4789_v57 }
 0x4ff   : > { %1353 = vrot.lane.b32.xlu1 %v4432_v59, %s3804_s15 }
 0x503   : > { %1355 = vrot.lane.b32.xlu1 %v4437_v63, %s3804_s15 }
 0x504   : > { %1351 = vrot.lane.b32.xlu0 %v4427_v55, %s3804_s15 }
 0x56d   : > { %v1118_v60 = vpop.xlane.xlu1 %1117 }
 0x56e   : > { %v4804_v29 = vmax.f32 %v4799_v52, %v1118_v60 }
 0x56f   : > { %v1120_v54 = vpop.xlane.xlu0 %1119 }
 0x570   : > { %1456 = vst.msk [vmem:[#allocation3 + $0x40] sm:$0xff] %vm816_vm11, %v4804_v29  ;;  %v4813_v30 = vmax.f32 %v4801_v14, %v1120_v54 }
 0x571   : > { %v1124_v58 = vpop.xlane.xlu1 %1123 }
 0x572   : > { %1457 = vst.msk [vmem:[#allocation3 + $0x48] sm:$0xff] %vm816_vm11, %v4813_v30  ;;  %v4822_v53 = vmax.f32 %v4806_v6, %v1124_v58 }
 0x573   : > { %v1122_v34 = vpop.xlane.xlu0 %1121 }
 0x574   : > { %1459 = vst.msk [vmem:[#allocation3 + $0x58] sm:$0xff] %vm816_vm11, %v4822_v53  ;;  %v4829_v54 = vmax.f32 %v4815_v31, %v1122_v34  ;;  %1182 = vperm.xlu0 %3335, %v4822_v53  }
 0x576   : > { %1458 = vst.msk [vmem:[#allocation3 + $0x50] sm:$0xff] %vm816_vm11, %v4829_v54  ;;  %1177 = vperm.xlu1 %3336, %v4829_v54  }
 0x577   : > { %v1126_v60 = vpop.xlane.xlu0 %1125  ;;  %v1128_v48 = vpop.xlane.xlu1 %1127 }
 0x578   : > { %v4842_v46 = vmax.f32 %v4832_v21, %v1126_v60  ;;  %v4845_v34 = vmax.f32 %v4834_v38, %v1128_v48  ;;  %1172 = vperm.xlu0 %3335, %v4813_v30  }
 0x57a   : > { %1460 = vst.msk [vmem:[#allocation3 + $0x60] sm:$0xff] %vm816_vm11, %v4842_v46  ;;  %1461 = vst.msk [vmem:[#allocation3 + $0x68] sm:$0xff] %vm816_vm11, %v4845_v34  ;;  %1167 = vperm.xlu1 %3336, %v4804_v29  }
 0x57b   : > { %v1130_v48 = vpop.xlane.xlu0 %1129  ;;  %v1132_v60 = vpop.xlane.xlu1 %1131 }
 0x57c   : > { %v4862_v63 = vmax.f32 %v4848_v45, %v1130_v48  ;;  %v4865_v59 = vmax.f32 %v4850_v41, %v1132_v60  ;;  %1357 = vrot.lane.b32.xlu0 %v4439_v0, %s3804_s15 }
 0x57e   : > { %1462 = vst.msk [vmem:[#allocation3 + $0x70] sm:$0xff] %vm816_vm11, %v4862_v63  ;;  %1463 = vst.msk [vmem:[#allocation3 + $0x78] sm:$0xff] %vm816_vm11, %v4865_v59  ;;  %1197 = vperm.xlu1 %3336, %v4862_v63  }
 0x57f   : > { %v1352_v48 = vpop.permute.xlu0 %1351  ;;  %v1354_v60 = vpop.permute.xlu1 %1353 }
 0x580   : > { %1192 = vperm.xlu0 %3335, %v4845_v34   ;;  %2975 = vmatprep.subr.bf16.mxu0 %v1352_v48 }
 0x581   : > { %2976 = vmatpush3.bf16.msra.mxu0 %v1352_v48  ;;  %v785_v48 = vunpack.c.h.bf16 %v4694_v51  ;;  %v5857_v51 = vsub.f32 %v4610_v20, %v4621_v25 }
 0x582   : > { %1187 = vperm.xlu1 %3336, %v4842_v46   ;;  %2977 = vmatprep.subr.bf16.mxu0 %v1354_v60 }
 0x583   : > { %v1356_v58 = vpop.permute.xlu1 %1355 }
 0x584   : > { %1202 = vperm.xlu0 %3335, %v4865_v59  }
 0x585   : > { %2978 = vmatpush3.bf16.msra.mxu0 %v1354_v60  ;;  %v786_v60 = vunpack.c.l.bf16 %v4697_v22 }
 0x586   : > { %1359 = vrot.lane.b32.xlu1 %v4444_v4, %s3804_s15  ;;  %2979 = vmatprep.subr.bf16.mxu0 %v1356_v58  ;;  %v787_v4 = vunpack.c.h.bf16 %v4697_v22  ;;  %v5858_v22 = vsub.f32 %v4595_v13, %v4601_v17  ;;  %v5862_v13 = vsub.f32 %v4645_v47, %v4659_v5  ;;  %v5865_v47 = vsub.f32 %v4815_v31, %v4829_v54 }
 0x587   : > { %v5867_v5 = vsub.f32 %v4801_v14, %v4813_v30  ;;  %v5868_v54 = vsub.f32 %v4806_v6, %v4822_v53 }
 0x588   : > { %1361 = vrot.lane.b32.xlu0 %v4448_v7, %s3804_s15  ;;  %v788_v7 = vunpack.c.l.bf16 %v4710_v3  ;;  %v698_v17 = vmul.f32 1.442695, %v5862_v13 }
 0x589   : > { %2980 = vmatpush3.bf16.msra.mxu0 %v1356_v58  ;;  %v789_v58 = vunpack.c.h.bf16 %v4710_v3 }
 0x58a   : > { %1363 = vrot.lane.b32.xlu1 %v4450_v8, %s3804_s15  ;;  %v790_v8 = vunpack.c.l.bf16 %v4714_v62 }
 0x58c   : > { %1365 = vrot.lane.b32.xlu0 %v4452_v9, %s3804_s15 }
 0x5ab   : > { %794 = vadd.xlane.f32.xlu0 %v785_v48  ;;  %v791_v48 = vunpack.c.h.bf16 %v4714_v62  ;;  %v5861_v62 = vsub.f32 %v4642_v44, %v4656_v2  ;;  %v1153_v2 = vmul.f32 1.442695, %v5865_v47 }
 0x5ad   : > { %v696_v20 = vmul.f32 1.442695, %v5861_v62 }
 0x5ae   : > { %792 = vadd.xlane.f32.xlu1 %v784_v37  ;;  %v690_v37 = vmul.f32 1.442695, %v5857_v51  ;;  %v5870_v51 = vsub.f32 %v4834_v38, %v4845_v34 }
 0x5af   : > { %796 = vadd.xlane.f32.xlu0 %v786_v60  ;;  %v688_v60 = vmul.f32 1.442695, %v5858_v22 }
 0x5b0   : > { %3345 = vpow2.f32 %v690_v37  ;;  %v1159_v37 = vmul.f32 1.442695, %v5870_v51 }
 0x5b1   : > { %3347 = vpow2.f32 %v688_v60 }
 0x5b2   : > { %798 = vadd.xlane.f32.xlu1 %v787_v4  ;;  %v5859_v4 = vsub.f32 %v4593_v12, %v4598_v15  ;;  %v5863_v12 = vsub.f32 %v4627_v27, %v4637_v40  ;;  %v5866_v40 = vsub.f32 %v4799_v52, %v4804_v29  ;;  %v5869_v29 = vsub.f32 %v4832_v21, %v4842_v46 }
 0x5b3   : > { %800 = vadd.xlane.f32.xlu0 %v788_v7 }
 0x5b4   : > { %v692_v7 = vmul.f32 1.442695, %v5859_v4  ;;  %v700_v15 = vmul.f32 1.442695, %v5863_v12  ;;  %v1157_v14 = vmul.f32 1.442695, %v5869_v29 }
 0x5b6   : > { %802 = vadd.xlane.f32.xlu1 %v789_v58  ;;  %3349 = vpow2.f32 %v692_v7  ;;  %v1151_v58 = vmul.f32 1.442695, %v5867_v5 }
 0x5b7   : > { %804 = vadd.xlane.f32.xlu0 %v790_v8  ;;  %v5860_v8 = vsub.f32 %v4603_v18, %v4618_v23  ;;  %v5864_v18 = vsub.f32 %v4634_v33, %v4640_v42  ;;  %v1149_v33 = vmul.f32 1.442695, %v5866_v40 }
 0x5b9   : > { %v694_v3 = vmul.f32 1.442695, %v5860_v8  ;;  %v702_v23 = vmul.f32 1.442695, %v5864_v18 }
 0x5ba   : > { %806 = vadd.xlane.f32.xlu1 %v791_v48  ;;  %v4918_v25 = vpop.eup %3345  ;;  %v1155_v48 = vmul.f32 1.442695, %v5868_v54 }
 0x5bb   : > { %3351 = vpow2.f32 %v694_v3  ;;  %v4924_v44 = vpop.eup %3347 }
 0x5bc   : > { %3353 = vpow2.f32 %v696_v20 }
 0x5bd   : > { %3355 = vpow2.f32 %v698_v17 }
 0x5be   : > { %3357 = vpow2.f32 %v700_v15 }
 0x5bf   : > { %3359 = vpow2.f32 %v702_v23 }
 0x5c0   : > { %v4930_v27 = vpop.eup %3349  ;;  %3361 = vpow2.f32 %v1153_v2 }
 0x5c1   : > { %3363 = vpow2.f32 %v1149_v33 }
 0x5c2   : > { %3365 = vpow2.f32 %v1151_v58 }
 0x5c3   : > { %3367 = vpow2.f32 %v1155_v48 }
 0x5c4   : > { %3369 = vpow2.f32 %v1157_v14 }
 0x5c5   : > { %v4936_v42 = vpop.eup %3351  ;;  %3371 = vpow2.f32 %v1159_v37 }
 0x5c6   : > { %v4942_v31 = vpop.eup %3353 }
 0x5c7   : > { %v4948_v52 = vpop.eup %3355 }
 0x5c8   : > { %v4954_v30 = vpop.eup %3357 }
 0x5c9   : > { %v4960_v6 = vpop.eup %3359 }
 0x5ca   : > { %v4963_v53 = vpop.eup %3361 }
 0x5cb   : > { %840 = vperm.xlu1 %3336, %v4918_v25   ;;  %v4966_v46 = vpop.eup %3363 }
 0x5cc   : > { %v4969_v21 = vpop.eup %3365 }
 0x5cd   : > { %835 = vperm.xlu0 %3335, %v4924_v44   ;;  %v4972_v38 = vpop.eup %3367 }
 0x5ce   : > { %v4975_v34 = vpop.eup %3369 }
 0x5cf   : > { %845 = vperm.xlu1 %3336, %v4930_v27   ;;  %v4978_v22 = vpop.eup %3371 }
 0x5d1   : > { %850 = vperm.xlu0 %3335, %v4936_v42  }
 0x5d3   : > { %855 = vperm.xlu1 %3336, %v4942_v31  }
 0x5d5   : > { %860 = vperm.xlu0 %3335, %v4948_v52  }
 0x5d7   : > { %865 = vperm.xlu1 %3336, %v4954_v30  }
 0x5d9   : > { %870 = vperm.xlu0 %3335, %v4960_v6  }
 0x5db   : > { %1307 = vperm.xlu1 %3336, %v4963_v53  }
 0x5dd   : > { %1297 = vperm.xlu0 %3335, %v4966_v46  }
 0x5df   : > { %1302 = vperm.xlu1 %3336, %v4969_v21  }
 0x5e1   : > { %1312 = vperm.xlu0 %3335, %v4972_v38  }
 0x5e3   : > { %1317 = vperm.xlu1 %3336, %v4975_v34  }
 0x5e5   : > { %1322 = vperm.xlu0 %3335, %v4978_v22  }
 0x5f3   : > { %v1183_v60 = vpop.permute.xlu0 %1182 }
 0x5f4   : > { %v1208_v7 = vsub.f32 %v4760_v56, %v1183_v60 }
 0x5f5   : > { %v1178_v4 = vpop.permute.xlu1 %1177 }
 0x5f6   : > { %v1207_v8 = vsub.f32 %v4766_v50, %v1178_v4 }
 0x5f7   : > { %v1173_v3 = vpop.permute.xlu0 %1172 }
 0x5f8   : > { %v1214_v62 = vpack.c.bf16 %v1208_v7, %v1207_v8  ;;  %v1206_v17 = vsub.f32 %v4754_v43, %v1173_v3 }
 0x5f9   : > { %v1168_v20 = vpop.permute.xlu1 %1167 }
 0x5fa   : > { %v1221_v13 = vmul.bf16 1069105081, %v1214_v62  ;;  %v1205_v12 = vsub.f32 %v4748_v49, %v1168_v20 }
 0x5fb   : > { %v1358_v15 = vpop.permute.xlu0 %1357 }
 0x5fc   : > { %3373 = vpow.bf16 %v1221_v13  ;;  %v1213_v18 = vpack.c.bf16 %v1206_v17, %v1205_v12  ;;  %2981 = vmatprep.subr.bf16.mxu0 %v1358_v15  ;;  %v5871_v17 = vsub.f32 %v4848_v45, %v4862_v63  ;;  %v768_v45 = vld [vmem:[#allocation4] sm:$0xff] }
 0x5fd   : > { %2982 = vmatpush3.bf16.msra.mxu0 %v1358_v15  ;;  %v1198_v23 = vpop.permute.xlu1 %1197  ;;  %v5872_v15 = vsub.f32 %v4850_v41, %v4865_v59 }
 0x5fe   : > { %v1218_v47 = vmul.bf16 1069105081, %v1213_v18  ;;  %v1211_v5 = vsub.f32 %v4784_v28, %v1198_v23  ;;  %v1161_v12 = vmul.f32 1.442695, %v5871_v17  ;;  %v827_v17 = vld [vmem:[#allocation5 + $0x10] sm:$0xff] }
 0x5ff   : > { %v1193_v2 = vpop.permute.xlu0 %1192  ;;  %v1163_v18 = vmul.f32 1.442695, %v5872_v15  ;;  %v828_v15 = vld [vmem:[#allocation5 + $0x18] sm:$0xff] }
 0x600   : > { %3375 = vpow.bf16 %v1218_v47  ;;  %v1210_v50 = vsub.f32 %v4777_v11, %v1193_v2  ;;  %v769_v2 = vld [vmem:[#allocation4 + $0x8] sm:$0xff] }
 0x601   : > { %v1188_v56 = vpop.permute.xlu1 %1187 }
 0x602   : > { %v1209_v40 = vsub.f32 %v4772_v19, %v1188_v56  ;;  %v777_v56 = vmul.f32 %v4918_v25, %v769_v2 }
 0x603   : > { %v1203_v33 = vpop.permute.xlu0 %1202 }
 0x604   : > { %v1215_v43 = vpack.c.bf16 %v1210_v50, %v1209_v40  ;;  %v1212_v49 = vsub.f32 %v4789_v57, %v1203_v33  ;;  %v770_v50 = vld [vmem:[#allocation4 + $0x10] sm:$0xff]  ;;  %v776_v33 = vmul.f32 %v4924_v44, %v768_v45  ;;  %v773_v44 = vld [vmem:[#allocation4 + $0x28] sm:$0xff] }
 0x605   : > { %v1360_v58 = vpop.permute.xlu1 %1359  ;;  %v778_v59 = vmul.f32 %v4930_v27, %v770_v50  ;;  %v781_v27 = vmul.f32 %v4948_v52, %v773_v44  ;;  %v825_v52 = vld [vmem:[#allocation5] sm:$0xff] }
 0x606   : > { %v1216_v54 = vpack.c.bf16 %v1212_v49, %v1211_v5  ;;  %2983 = vmatprep.subr.bf16.mxu0 %v1360_v58  ;;  %v1224_v29 = vmul.bf16 1069105081, %v1215_v43  ;;  %v771_v5 = vld [vmem:[#allocation4 + $0x18] sm:$0xff] }
 0x607   : > { %v3374_v48 = vpop.eup %3373  ;;  %2984 = vmatpush3.bf16.msra.mxu0 %v1360_v58  ;;  %v1362_v14 = vpop.permute.xlu0 %1361  ;;  %v772_v58 = vld [vmem:[#allocation4 + $0x20] sm:$0xff]  ;;  %v779_v25 = vmul.f32 %v4936_v42, %v771_v5  ;;  %v775_v42 = vld [vmem:[#allocation4 + $0x38] sm:$0xff]  ;;  %v831_v5 = vld [vmem:[#allocation5 + $0x30] sm:$0xff] }
 0x608   : > { %v1227_v51 = vmul.bf16 1069105081, %v1216_v54  ;;  %v1249_v37 = vunpack.c.h.bf16 %v3374_v48  ;;  %v1248_v60 = vunpack.c.l.bf16 %v3374_v48  ;;  %2985 = vmatprep.subr.bf16.mxu0 %v1362_v14 }
 0x609   : > { %v1364_v11 = vpop.permute.xlu1 %1363 }
 0x60a   : > { %3377 = vpow.bf16 %v1227_v51  ;;  %1260 = vadd.xlane.f32.xlu1 %v1249_v37  ;;  %1258 = vadd.xlane.f32.xlu0 %v1248_v60  ;;  %v774_v37 = vld [vmem:[#allocation4 + $0x30] sm:$0xff] }
 0x60b   : > { %v3376_v19 = vpop.eup %3375  ;;  %3379 = vpow.bf16 %v1224_v29  ;;  %2986 = vmatpush3.bf16.msra.mxu0 %v1362_v14  ;;  %v1366_v4 = vpop.permute.xlu0 %1365  ;;  %v780_v29 = vmul.f32 %v4942_v31, %v772_v58  ;;  %v783_v31 = vmul.f32 %v4960_v6, %v775_v42  ;;  %v1231_v42 = vld [vmem:[#allocation4 + $0x48] sm:$0xff] }
 0x60c   : > { %2991 = vmatprep.mubr.bf16.mxu0 %v3376_v19  ;;  %v1247_v28 = vunpack.c.h.bf16 %v3376_v19  ;;  %v1246_v57 = vunpack.c.l.bf16 %v3376_v19  ;;  %2987 = vmatprep.subr.bf16.mxu0 %v1364_v11  ;;  %3381 = vpow2.f32 %v1161_v12  ;;  %v782_v19 = vmul.f32 %v4954_v30, %v774_v37 }
 0x60d   : > { %3383 = vpow2.f32 %v1163_v18 }
 0x60e   : > { %1256 = vadd.xlane.f32.xlu0 %v1247_v28  ;;  %1254 = vadd.xlane.f32.xlu1 %v1246_v57 }
 0x60f   : > { %2988 = vmatpush3.bf16.msra.mxu0 %v1364_v11 }
 0x610   : > { %2989 = vmatprep.subr.bf16.mxu0 %v1366_v4 }
 0x613   : > { %2990 = vmatpush3.bf16.msra.mxu0 %v1366_v4 }
 0x615   : > { %v3378_v7 = vpop.eup %3377 }
 0x616   : > { %v3380_v8 = vpop.eup %3379  ;;  %2992 = vmatmul.mubr.bf16.vlgmr.msra.gmra.mrb[8].mxu0 %v3374_v48  ;;  %v1253_v3 = vunpack.c.h.bf16 %v3378_v7  ;;  %v1252_v62 = vunpack.c.l.bf16 %v3378_v7 }
 0x617   : > { %2995 = vmatprep.mubr.bf16.mxu0 %v3380_v8  ;;  %v1251_v20 = vunpack.c.h.bf16 %v3380_v8  ;;  %v1250_v13 = vunpack.c.l.bf16 %v3380_v8  ;;  %v4995_v23 = vpop.eup %3381 }
 0x618   : > { %1268 = vadd.xlane.f32.xlu1 %v1253_v3  ;;  %1266 = vadd.xlane.f32.xlu0 %v1252_v62  ;;  %v4998_v47 = vpop.eup %3383  ;;  %v826_v3 = vld [vmem:[#allocation5 + $0x8] sm:$0xff] }
 0x61c   : > { %1264 = vadd.xlane.f32.xlu1 %v1251_v20  ;;  %1262 = vadd.xlane.f32.xlu0 %v1250_v13 }
 0x61e   : > { %2996 = vmatmul.mubr.bf16.gmra.mrb[12].mxu0 %v3378_v7 }
 0x62d   : > { %1327 = vperm.xlu1 %3336, %v4995_v23  }
 0x632   : > { %1332 = vperm.xlu0 %3335, %v4998_v47  }
 0x638   : > { %v795_v63 = vpop.xlane.xlu0 %794 }
 0x639   : > { %v809_v40 = vadd.f32 %v795_v63, %v777_v56  ;;  %v829_v63 = vld [vmem:[#allocation5 + $0x20] sm:$0xff] }
 0x63b   : > { %818 = vst.msk [vmem:[#allocation4 + $0x8] sm:$0xff] %vm816_vm11, %v809_v40  ;;  %v793_v41 = vpop.xlane.xlu1 %792  ;;  %v830_v40 = vld [vmem:[#allocation5 + $0x28] sm:$0xff] }
 0x63c   : > { %v808_v43 = vadd.f32 %v793_v41, %v776_v33  ;;  %v797_v49 = vpop.xlane.xlu0 %796 }
 0x63d   : > { %v810_v54 = vadd.f32 %v797_v49, %v778_v59  ;;  %v832_v49 = vld [vmem:[#allocation5 + $0x38] sm:$0xff] }
 0x63e   : > { %817 = vst.msk [vmem:[#allocation4] sm:$0xff] %vm816_vm11, %v808_v43 }
 0x63f   : > { %819 = vst.msk [vmem:[#allocation4 + $0x10] sm:$0xff] %vm816_vm11, %v810_v54  ;;  %v799_v48 = vpop.xlane.xlu1 %798 }
 0x640   : > { %v811_v14 = vadd.f32 %v799_v48, %v779_v25  ;;  %v801_v51 = vpop.xlane.xlu0 %800 }
 0x641   : > { %v812_v60 = vadd.f32 %v801_v51, %v780_v29 }
 0x642   : > { %820 = vst.msk [vmem:[#allocation4 + $0x18] sm:$0xff] %vm816_vm11, %v811_v14 }
 0x643   : > { %821 = vst.msk [vmem:[#allocation4 + $0x20] sm:$0xff] %vm816_vm11, %v812_v60  ;;  %v803_v11 = vpop.xlane.xlu1 %802  ;;  %v1232_v60 = vld [vmem:[#allocation4 + $0x50] sm:$0xff] }
 0x644   : > { %v813_v28 = vadd.f32 %v803_v11, %v781_v27  ;;  %v805_v57 = vpop.xlane.xlu0 %804  ;;  %v1233_v27 = vld [vmem:[#allocation4 + $0x58] sm:$0xff]  ;;  %v1240_v11 = vmul.f32 %v4963_v53, %v1232_v60 }
 0x645   : > { %v814_v4 = vadd.f32 %v805_v57, %v782_v19 }
 0x646   : > { %822 = vst.msk [vmem:[#allocation4 + $0x28] sm:$0xff] %vm816_vm11, %v813_v28  ;;  %v1230_v28 = vld [vmem:[#allocation4 + $0x40] sm:$0xff] }
 0x647   : > { %823 = vst.msk [vmem:[#allocation4 + $0x30] sm:$0xff] %vm816_vm11, %v814_v4  ;;  %v807_v7 = vpop.xlane.xlu1 %806 }
 0x648   : > { %v815_v8 = vadd.f32 %v807_v7, %v783_v31  ;;  %v1239_v31 = vmul.f32 %v4969_v21, %v1231_v42  ;;  %v1238_v7 = vmul.f32 %v4966_v46, %v1230_v28  ;;  %v1235_v21 = vld [vmem:[#allocation4 + $0x68] sm:$0xff] }
 0x64a   : > { %824 = vst.msk [vmem:[#allocation4 + $0x38] sm:$0xff] %vm816_vm11, %v815_v8 }
 0x64b   : > { %v841_v62 = vpop.permute.xlu1 %840 }
 0x64c   : > { %v874_v20 = vmul.f32 %v841_v62, %v826_v3  ;;  %v836_v13 = vpop.permute.xlu0 %835  ;;  %v1237_v62 = vld [vmem:[#allocation4 + $0x78] sm:$0xff] }
 0x64d   : > { %v873_v30 = vmul.f32 %v836_v13, %v825_v52  ;;  %v1245_v13 = vmul.f32 %v4998_v47, %v1237_v62  ;;  %v1289_v47 = vld [vmem:[#allocation5 + $0x50] sm:$0xff] }
 0x64e   : > { %v947_v12 = vadd.f32 %v4735_v26, %v874_v20 }
 0x64f   : > { %v946_v18 = vadd.f32 %v4731_v24, %v873_v30  ;;  %v846_v2 = vpop.permute.xlu1 %845 }
 0x650   : > { %955 = vst.msk [vmem:[#allocation5 + $0x8] sm:$0xff] %vm538_vm2, %v947_v12  ;;  %v875_v6 = vmul.f32 %v846_v2, %v827_v17  ;;  %v851_v56 = vpop.permute.xlu0 %850  ;;  %v1234_v12 = vld [vmem:[#allocation4 + $0x60] sm:$0xff]  ;;  %v1243_v2 = vmul.f32 %v4978_v22, %v1235_v21 }
 0x651   : > { %954 = vst.msk [vmem:[#allocation5] sm:$0xff] %vm538_vm2, %v946_v18  ;;  %v876_v45 = vmul.f32 %v851_v56, %v828_v15  ;;  %v1242_v18 = vmul.f32 %v4975_v34, %v1234_v12 }
 0x652   : > { %v948_v50 = vadd.f32 %v4729_v16, %v875_v6 }
 0x653   : > { %v949_v33 = vadd.f32 %v4733_v35, %v876_v45  ;;  %v856_v41 = vpop.permute.xlu1 %855 }
 0x654   : > { %956 = vst.msk [vmem:[#allocation5 + $0x10] sm:$0xff] %vm538_vm2, %v948_v50  ;;  %v877_v26 = vmul.f32 %v856_v41, %v829_v63  ;;  %v861_v59 = vpop.permute.xlu0 %860  ;;  %v1287_v63 = vld [vmem:[#allocation5 + $0x40] sm:$0xff]  ;;  %v1290_v50 = vld [vmem:[#allocation5 + $0x58] sm:$0xff] }
 0x655   : > { %957 = vst.msk [vmem:[#allocation5 + $0x18] sm:$0xff] %vm538_vm2, %v949_v33  ;;  %v878_v24 = vmul.f32 %v861_v59, %v830_v40  ;;  %v1288_v33 = vld [vmem:[#allocation5 + $0x48] sm:$0xff] }
 0x656   : > { %v950_v43 = vadd.f32 %v4739_v61, %v877_v26 }
 0x657   : > { %v951_v58 = vadd.f32 %v4743_v10, %v878_v24  ;;  %v866_v54 = vpop.permute.xlu1 %865 }
 0x658   : > { %958 = vst.msk [vmem:[#allocation5 + $0x20] sm:$0xff] %vm538_vm2, %v950_v43  ;;  %v879_v16 = vmul.f32 %v866_v54, %v831_v5  ;;  %v871_v25 = vpop.permute.xlu0 %870  ;;  %v1293_v54 = vld [vmem:[#allocation5 + $0x70] sm:$0xff] }
 0x659   : > { %959 = vst.msk [vmem:[#allocation5 + $0x28] sm:$0xff] %vm538_vm2, %v951_v58  ;;  %v880_v35 = vmul.f32 %v871_v25, %v832_v49 }
 0x65a   : > { %v952_v48 = vadd.f32 %v4737_v39, %v879_v16  ;;  %v1241_v39 = vmul.f32 %v4972_v38, %v1233_v27  ;;  %v1236_v38 = vld [vmem:[#allocation4 + $0x70] sm:$0xff] }
 0x65b   : > { %v953_v29 = vadd.f32 %v4741_v1, %v880_v35  ;;  %v1308_v61 = vpop.permute.xlu1 %1307  ;;  %v1244_v20 = vmul.f32 %v4995_v23, %v1236_v38  ;;  %v1291_v35 = vld [vmem:[#allocation5 + $0x60] sm:$0xff] }
 0x65c   : > { %960 = vst.msk [vmem:[#allocation5 + $0x30] sm:$0xff] %vm538_vm2, %v952_v48  ;;  %v1298_v44 = vpop.permute.xlu0 %1297  ;;  %v1337_v40 = vmul.f32 %v1308_v61, %v1289_v47  ;;  %v1294_v48 = vld [vmem:[#allocation5 + $0x78] sm:$0xff]  ;;  %v1292_v61 = vld [vmem:[#allocation5 + $0x68] sm:$0xff] }
 0x65d   : > { %961 = vst.msk [vmem:[#allocation5 + $0x38] sm:$0xff] %vm538_vm2, %v953_v29  ;;  %v1335_v41 = vmul.f32 %v1298_v44, %v1287_v63 }
 0x65f   : > { %v1303_v14 = vpop.permute.xlu1 %1302 }
 0x660   : > { %v1313_v10 = vpop.permute.xlu0 %1312  ;;  %v1336_v5 = vmul.f32 %v1303_v14, %v1288_v33 }
 0x661   : > { %v1338_v59 = vmul.f32 %v1313_v10, %v1290_v50 }
 0x663   : > { %v5033_v51 = vpop.permute.xlu1 %1317 }
 0x664   : > { %v5035_v37 = vpop.permute.xlu0 %1322  ;;  %v1339_v14 = vmul.f32 %v5033_v51, %v1291_v35 }
 0x697   : > { %v1259_v19 = vpop.xlane.xlu0 %1258  ;;  %v1261_v1 = vpop.xlane.xlu1 %1260 }
 0x698   : > { %v1272_v57 = vadd.f32 %v1259_v19, %v1240_v11  ;;  %v1273_v4 = vadd.f32 %v1261_v1, %v1241_v39  ;;  %v1340_v39 = vmul.f32 %v5035_v37, %v1292_v61 }
 0x69a   : > { %1280 = vst.msk [vmem:[#allocation4 + $0x50] sm:$0xff] %vm816_vm11, %v1272_v57  ;;  %1281 = vst.msk [vmem:[#allocation4 + $0x58] sm:$0xff] %vm816_vm11, %v1273_v4 }
 0x69b   : > { %v1257_v8 = vpop.xlane.xlu0 %1256  ;;  %v1255_v3 = vpop.xlane.xlu1 %1254 }
 0x69c   : > { %v1271_v52 = vadd.f32 %v1257_v8, %v1239_v31  ;;  %v1270_v53 = vadd.f32 %v1255_v3, %v1238_v7 }
 0x69e   : > { %1279 = vst.msk [vmem:[#allocation4 + $0x48] sm:$0xff] %vm816_vm11, %v1271_v52  ;;  %1278 = vst.msk [vmem:[#allocation4 + $0x40] sm:$0xff] %vm816_vm11, %v1270_v53 }
 0x6a5   : > { %v1267_v30 = vpop.xlane.xlu0 %1266  ;;  %v1269_v17 = vpop.xlane.xlu1 %1268 }
 0x6a6   : > { %v1276_v15 = vadd.f32 %v1267_v30, %v1244_v20  ;;  %v1277_v46 = vadd.f32 %v1269_v17, %v1245_v13 }
 0x6a8   : > { %1284 = vst.msk [vmem:[#allocation4 + $0x70] sm:$0xff] %vm816_vm11, %v1276_v15  ;;  %1285 = vst.msk [vmem:[#allocation4 + $0x78] sm:$0xff] %vm816_vm11, %v1277_v46 }
 0x6a9   : > { %v1263_v6 = vpop.xlane.xlu0 %1262  ;;  %v1265_v56 = vpop.xlane.xlu1 %1264 }
 0x6aa   : > { %v1274_v45 = vadd.f32 %v1263_v6, %v1242_v18  ;;  %v1275_v23 = vadd.f32 %v1265_v56, %v1243_v2 }
 0x6ac   : > { %1282 = vst.msk [vmem:[#allocation4 + $0x60] sm:$0xff] %vm816_vm11, %v1274_v45  ;;  %1283 = vst.msk [vmem:[#allocation4 + $0x68] sm:$0xff] %vm816_vm11, %v1275_v23 }
 0x6ad   : > { %v1328_v16 = vpop.permute.xlu1 %1327 }
 0x6ae   : > { %v1341_v44 = vmul.f32 %v1328_v16, %v1293_v54 }
 0x6b1   : > { %v1333_v29 = vpop.permute.xlu0 %1332 }
 0x6b2   : > { %v1342_v60 = vmul.f32 %v1333_v29, %v1294_v48 }
 0x6e9   : > { %v2993_v26 = vpop.f32.mrb[8].mxu0 }
 0x6ea   : > { %v1442_v24 = vadd.f32 %v2993_v26, %v1337_v40  ;;  %v1409_v34 = vpop.f32.mrb[9].mxu0 }
 0x6eb   : > { %v1440_v22 = vadd.f32 %v1409_v34, %v1335_v41  ;;  %v2994_v43 = vpop.f32.mrb[10].mxu0 }
 0x6ec   : > { %1450 = vst.msk [vmem:[#allocation5 + $0x50] sm:$0xff] %vm538_vm2, %v1442_v24  ;;  %v1443_v49 = vadd.f32 %v2994_v43, %v1338_v59  ;;  %v1412_v58 = vpop.f32.mrb[11].mxu0 }
 0x6ed   : > { %1448 = vst.msk [vmem:[#allocation5 + $0x40] sm:$0xff] %vm538_vm2, %v1440_v22  ;;  %v1441_v25 = vadd.f32 %v1412_v58, %v1336_v5 }
 0x6ee   : > { %1451 = vst.msk [vmem:[#allocation5 + $0x58] sm:$0xff] %vm538_vm2, %v1443_v49 }
 0x6ef   : > { %1449 = vst.msk [vmem:[#allocation5 + $0x48] sm:$0xff] %vm538_vm2, %v1441_v25 }
 0x6f1   : > { %v2997_v10 = vpop.f32.mrb[12].mxu0 }
 0x6f2   : > { %v1446_v27 = vadd.f32 %v2997_v10, %v1341_v44  ;;  %v1425_v11 = vpop.f32.mrb[13].mxu0 }
 0x6f3   : > { %v1444_v19 = vadd.f32 %v1425_v11, %v1339_v14  ;;  %v2998_v1 = vpop.f32.mrb[14].mxu0 }
 0x6f4   : > { %1454 = vst.msk [vmem:[#allocation5 + $0x70] sm:$0xff] %vm538_vm2, %v1446_v27  ;;  %v1447_v42 = vadd.f32 %v2998_v1, %v1342_v60  ;;  %v1428_v28 = vpop.f32.mrb[15].mxu0 }
 0x6f5   : > { %1452 = vst.msk [vmem:[#allocation5 + $0x60] sm:$0xff] %vm538_vm2, %v1444_v19  ;;  %v1445_v57 = vadd.f32 %v1428_v28, %v1340_v39 }
 0x6f6   : > { %1455 = vst.msk [vmem:[#allocation5 + $0x78] sm:$0xff] %vm538_vm2, %v1447_v42 }
 0x6f7   : > { %1453 = vst.msk [vmem:[#allocation5 + $0x68] sm:$0xff] %vm538_vm2, %v1445_v57 }
 0x6f8 PF: > { %p2786_p1 = scmp.gt.s32.totalorder %s4396_s27, %s4387_s25 }
 0x6f9   : > { %vm1472_vm12 = vcmask (!%p2786_p1), 523264   ;;  %v1468_v51 = vld [vmem:[#allocation2] sm:$0xff] (!%p2786_p1)  ;;  %3023 = vmatprep.subr.bf16.mxu1 (!%p2786_p1), %v4427_v55  ;;  %v5877_v53 = vld [vmem:[#allocation51_spill] sm:$0xff] (!%p2786_p1)  ;;  %v5880_v13 = vld [vmem:[#allocation52_spill] sm:$0xff] (!%p2786_p1)  ;;  %v3805_v26 = vmov (!%p2786_p1), 0   ;;  %vm1742_vm13 = vcmask (!%p2786_p1), 7168  }
 0x6fa   : > { %1467 = sbr.rel (%p2786_p1) target bundleno = 3174 (0xc66), region = 56  ;;  %3111 = vmatprep.subr.msk.bf16.mxu0 (!%p2786_p1), %vm1472_vm12, %v4392_v32  ;;  %v1486_v37 = vsel (!%p2786_p1), %vm1472_vm12, %v4392_v32, 0  ;;  %3015 = vmatprep.mubr.msk.bf16.mxu0 (!%p2786_p1), %vm1472_vm12, %v1468_v51  ;;  %v5873_v4 = vld [vmem:[#allocation56_spill] sm:$0xff] (!%p2786_p1)  ;;  %v1489_v31 = vsel (!%p2786_p1), %vm1472_vm12, %v4401_v36, 0  ;;  %v5875_v8 = vld [vmem:[#allocation50_spill] sm:$0xff] (!%p2786_p1)  ;;  %v1495_v62 = vsel (!%p2786_p1), %vm1472_vm12, %v5877_v53, 0 }
 0x6fb   : > { %3000 = vmatpush3.bf16.xpose.msra.mxu0 (!%p2786_p1), %v1486_v37  ;;  %3024 = vmatpush3.bf16.msra.mxu1 (!%p2786_p1), %v4427_v55  ;;  %v5874_v7 = vld [vmem:[#allocation57_spill] sm:$0xff] (!%p2786_p1)  ;;  %v1492_v3 = vsel (!%p2786_p1), %vm1472_vm12, %v5875_v8, 0  ;;  %v1498_v30 = vsel (!%p2786_p1), %vm1472_vm12, %v5880_v13, 0  ;;  %v5882_v21 = vld [vmem:[#allocation54_spill] sm:$0xff] (!%p2786_p1)  ;;  %v5883_v46 = vld [vmem:[#allocation55_spill] sm:$0xff] (!%p2786_p1)  ;;  %s3806_s11 = smov (!%p2786_p1), 64  }
 0x6fc   : > { %3112 = vmatprep.subr.msk.bf16.mxu0 (!%p2786_p1), %vm1472_vm12, %v4401_v36  ;;  %3025 = vmatprep.subr.bf16.mxu1 (!%p2786_p1), %v5873_v4  ;;  %v5876_v52 = vld [vmem:[#allocation58_spill] sm:$0xff] (!%p2786_p1)  ;;  %v5881_v17 = vld [vmem:[#allocation53_spill] sm:$0xff] (!%p2786_p1)  ;;  %v1504_v15 = vsel (!%p2786_p1), %vm1472_vm12, %v5882_v21, 0  ;;  %v1507_v18 = vsel (!%p2786_p1), %vm1472_vm12, %v5883_v46, 0  ;;  %v1469_v2 = vld [vmem:[#allocation2 + $0x8] sm:$0xff] (!%p2786_p1) }
 0x6fd   : > { %v5878_v38 = vld [vmem:[#allocation59_spill] sm:$0xff] (!%p2786_p1)  ;;  %v1501_v12 = vsel (!%p2786_p1), %vm1472_vm12, %v5881_v17, 0  ;;  %v1470_v6 = vld [vmem:[#allocation2 + $0x10] sm:$0xff] (!%p2786_p1)  ;;  %v1471_v56 = vld [vmem:[#allocation2 + $0x18] sm:$0xff] (!%p2786_p1)  ;;  %3386 = vset.pattern.permute.xlu1 (!%p2786_p1), %v3805_v26  ;;  %3385 = vset.pattern.permute.xlu0 (!%p2786_p1), %v3805_v26 }
 0x6fe   : > { %v5879_v20 = vld [vmem:[#allocation60_spill] sm:$0xff] (!%p2786_p1)  ;;  %v5143_v24 = vld [vmem:[#allocation3] sm:$0xff] (!%p2786_p1)  ;;  %v5151_v49 = vld [vmem:[#allocation3 + $0x18] sm:$0xff] (!%p2786_p1) }
 0x6ff   : > { %3026 = vmatpush3.bf16.msra.mxu1 (!%p2786_p1), %v5873_v4  ;;  %v5141_v59 = vld [vmem:[#allocation3 + $0x10] sm:$0xff] (!%p2786_p1)  ;;  %v5158_v54 = vld [vmem:[#allocation3 + $0x8] sm:$0xff] (!%p2786_p1)  ;;  %v5182_v10 = vld [vmem:[#allocation3 + $0x38] sm:$0xff] (!%p2786_p1) }
 0x700   : > { %3027 = vmatprep.subr.bf16.mxu1 (!%p2786_p1), %v5874_v7  ;;  %v5175_v44 = vld [vmem:[#allocation3 + $0x30] sm:$0xff] (!%p2786_p1)  ;;  %v5190_v19 = vld [vmem:[#allocation3 + $0x20] sm:$0xff] (!%p2786_p1)  ;;  %v5193_v1 = vld [vmem:[#allocation3 + $0x28] sm:$0xff] (!%p2786_p1) }
 0x701   : > { %v5372_v28 = vld [vmem:[#allocation3 + $0x70] sm:$0xff]  ;;  %v5374_v42 = vld [vmem:[#allocation3 + $0x78] sm:$0xff] }
 0x703   : > { %3002 = vmatpush3.bf16.xpose.msra.mxu0 %v1489_v31  ;;  %3028 = vmatpush3.bf16.msra.mxu1 %v5874_v7 }
 0x704   : > { %3113 = vmatprep.subr.msk.bf16.mxu0 %vm1472_vm12, %v5875_v8  ;;  %3029 = vmatprep.subr.bf16.mxu1 %v4439_v0 }
 0x707   : > { %3030 = vmatpush3.bf16.msra.mxu1 %v4439_v0 }
 0x708   : > { %3031 = vmatprep.subr.bf16.mxu1 %v5876_v52 }
 0x70b   : > { %3004 = vmatpush3.bf16.xpose.msra.mxu0 %v1492_v3  ;;  %3032 = vmatpush3.bf16.msra.mxu1 %v5876_v52 }
 0x70c   : > { %3114 = vmatprep.subr.msk.bf16.mxu0 %vm1472_vm12, %v5877_v53  ;;  %3033 = vmatprep.subr.bf16.mxu1 %v5878_v38 }
 0x70f   : > { %3034 = vmatpush3.bf16.msra.mxu1 %v5878_v38 }
 0x710   : > { %3035 = vmatprep.subr.bf16.mxu1 %v5879_v20 }
 0x713   : > { %3006 = vmatpush3.bf16.xpose.msra.mxu0 %v1495_v62  ;;  %3036 = vmatpush3.bf16.msra.mxu1 %v5879_v20 }
 0x714   : > { %3115 = vmatprep.subr.msk.bf16.mxu0 %vm1472_vm12, %v5880_v13  ;;  %3037 = vmatprep.subr.bf16.mxu1 %v4452_v9 }
 0x717   : > { %3038 = vmatpush3.bf16.msra.mxu1 %v4452_v9 }
 0x71b   : > { %3008 = vmatpush3.bf16.xpose.msra.mxu0 %v1498_v30 }
 0x71c   : > { %3116 = vmatprep.subr.msk.bf16.mxu0 %vm1472_vm12, %v5881_v17 }
 0x723   : > { %3010 = vmatpush3.bf16.xpose.msra.mxu0 %v1501_v12 }
 0x724   : > { %3117 = vmatprep.subr.msk.bf16.mxu0 %vm1472_vm12, %v5882_v21 }
 0x72b   : > { %3012 = vmatpush3.bf16.xpose.msra.mxu0 %v1504_v15 }
 0x72c   : > { %3118 = vmatprep.subr.msk.bf16.mxu0 %vm1472_vm12, %v5883_v46 }
 0x733   : > { %3014 = vmatpush3.bf16.xpose.msra.mxu0 %v1507_v18 }
 0x73a   : > { %3016 = vmatmul.mubr.msk.bf16.vlgmr.msra.gmra.mrb[0].mxu0 %vm1472_vm12, %v1469_v2 }
 0x73b   : > { %3019 = vmatprep.mubr.msk.bf16.mxu0 %vm1472_vm12, %v1470_v6 }
 0x742   : > { %3020 = vmatmul.mubr.msk.bf16.gmra.mrb[4].mxu0 %vm1472_vm12, %v1471_v56 }
 0x80d   : > { %v5117_v45 = vpop.f32.mrb[0].mxu0 }
 0x80e   : > { %1586 = vmax.xlane.f32.xlu1 %v5117_v45  ;;  %v5120_v23 = vpop.f32.mrb[1].mxu0 }
 0x80f   : > { %1582 = vmax.xlane.f32.xlu0 %v5120_v23  ;;  %v5123_v47 = vpop.f32.mrb[2].mxu0 }
 0x810   : > { %v5125_v63 = vpop.f32.mrb[3].mxu0 }
 0x812   : > { %1588 = vmax.xlane.f32.xlu1 %v5123_v47 }
 0x813   : > { %1584 = vmax.xlane.f32.xlu0 %v5125_v63 }
 0x815   : > { %v5129_v50 = vpop.f32.mrb[4].mxu0 }
 0x816   : > { %v5131_v40 = vpop.f32.mrb[5].mxu0 }
 0x817   : > { %v5133_v33 = vpop.f32.mrb[6].mxu0  ;;  %1594 = vmax.xlane.f32.xlu0 %v5129_v50 }
 0x818   : > { %1596 = vmax.xlane.f32.xlu1 %v5133_v33  ;;  %v5137_v41 = vpop.f32.mrb[7].mxu0 }
 0x81b   : > { %1590 = vmax.xlane.f32.xlu0 %v5131_v40 }
 0x81c   : > { %1592 = vmax.xlane.f32.xlu1 %v5137_v41 }
 0x89b   : > { %v1587_v34 = vpop.xlane.xlu1 %1586 }
 0x89c   : > { %v5146_v5 = vmax.f32 %v5141_v59, %v1587_v34  ;;  %v1583_v22 = vpop.xlane.xlu0 %1582 }
 0x89d   : > { %v5149_v43 = vmax.f32 %v5143_v24, %v1583_v22 }
 0x89e   : > { %v1608_v58 = vsub.f32 %v5141_v59, %v5146_v5  ;;  %1890 = vst.msk [vmem:[#allocation3 + $0x10] sm:$0xff] %vm1742_vm13, %v5146_v5  ;;  %1642 = vperm.xlu1 %3386, %v5146_v5  }
 0x89f   : > { %v1606_v16 = vsub.f32 %v5143_v24, %v5149_v43  ;;  %1888 = vst.msk [vmem:[#allocation3] sm:$0xff] %vm1742_vm13, %v5149_v43  ;;  %v1589_v25 = vpop.xlane.xlu1 %1588  ;;  %1632 = vperm.xlu0 %3385, %v5149_v43  }
 0x8a0   : > { %v5166_v35 = vmax.f32 %v5151_v49, %v1589_v25  ;;  %v1585_v48 = vpop.xlane.xlu0 %1584 }
 0x8a1   : > { %v5169_v29 = vmax.f32 %v5158_v54, %v1585_v48 }
 0x8a2   : > { %1891 = vst.msk [vmem:[#allocation3 + $0x18] sm:$0xff] %vm1742_vm13, %v5166_v35 }
 0x8a3   : > { %v1607_v14 = vsub.f32 %v5158_v54, %v5169_v29  ;;  %1889 = vst.msk [vmem:[#allocation3 + $0x8] sm:$0xff] %vm1742_vm13, %v5169_v29  ;;  %1637 = vperm.xlu1 %3386, %v5169_v29  }
 0x8a4   : > { %v1595_v60 = vpop.xlane.xlu0 %1594 }
 0x8a5   : > { %v1597_v27 = vpop.xlane.xlu1 %1596  ;;  %v5185_v11 = vmax.f32 %v5175_v44, %v1595_v60 }
 0x8a6   : > { %v5188_v39 = vmax.f32 %v5182_v10, %v1597_v27 }
 0x8a7   : > { %1647 = vperm.xlu1 %3386, %v5166_v35   ;;  %1894 = vst.msk [vmem:[#allocation3 + $0x30] sm:$0xff] %vm1742_vm13, %v5185_v11  ;;  %v5887_v59 = vsub.f32 %v5175_v44, %v5185_v11 }
 0x8a8   : > { %1895 = vst.msk [vmem:[#allocation3 + $0x38] sm:$0xff] %vm1742_vm13, %v5188_v39  ;;  %v1591_v57 = vpop.xlane.xlu0 %1590 }
 0x8a9   : > { %v1593_v51 = vpop.xlane.xlu1 %1592  ;;  %v5204_v37 = vmax.f32 %v5190_v19, %v1591_v57  ;;  %v1626_v5 = vmul.f32 1.442695, %v5887_v59 }
 0x8aa   : > { %v5207_v31 = vmax.f32 %v5193_v1, %v1593_v51 }
 0x8ab   : > { %1909 = vrot.lane.b32.xlu1 %v4392_v32, %s3806_s11  ;;  %1892 = vst.msk [vmem:[#allocation3 + $0x20] sm:$0xff] %vm1742_vm13, %v5204_v37 }
 0x8ac   : > { %1893 = vst.msk [vmem:[#allocation3 + $0x28] sm:$0xff] %vm1742_vm13, %v5207_v31  ;;  %1657 = vperm.xlu0 %3385, %v5207_v31   ;;  %v5886_v24 = vsub.f32 %v5193_v1, %v5207_v31 }
 0x8ae   : > { %v1624_v43 = vmul.f32 1.442695, %v5886_v24 }
 0x8af   : > { %1911 = vrot.lane.b32.xlu1 %v4401_v36, %s3806_s11 }
 0x8b0   : > { %1667 = vperm.xlu0 %3385, %v5188_v39  }
 0x8b3   : > { %1913 = vrot.lane.b32.xlu1 %v5875_v8, %s3806_s11 }
 0x8b4   : > { %1919 = vrot.lane.b32.xlu0 %v5881_v17, %s3806_s11 }
 0x8b7   : > { %1915 = vrot.lane.b32.xlu1 %v5877_v53, %s3806_s11 }
 0x8b8   : > { %1923 = vrot.lane.b32.xlu0 %v5883_v46, %s3806_s11 }
 0x8bb   : > { %1662 = vperm.xlu1 %3386, %v5185_v11  }
 0x8bf   : > { %1652 = vperm.xlu1 %3386, %v5204_v37  }
 0x8c3   : > { %1917 = vrot.lane.b32.xlu1 %v5880_v13, %s3806_s11 }
 0x8c7   : > { %1921 = vrot.lane.b32.xlu1 %v5882_v21, %s3806_s11 }
 0x91d   : > { %v1643_v32 = vpop.permute.xlu1 %1642 }
 0x91e   : > { %v1633_v36 = vpop.permute.xlu0 %1632  ;;  %v1672_v15 = vsub.f32 %v5117_v45, %v1643_v32 }
 0x91f   : > { %v1670_v30 = vsub.f32 %v5120_v23, %v1633_v36 }
 0x922   : > { %v1638_v8 = vpop.permute.xlu1 %1637 }
 0x923   : > { %v1671_v53 = vsub.f32 %v5125_v63, %v1638_v8 }
 0x925   : > { %v1678_v17 = vpack.c.bf16 %v1671_v53, %v1670_v30  ;;  %v1897_v53 = vld [vmem:[#allocation2 + $0x20] sm:$0xff] }
 0x926   : > { %v1648_v12 = vpop.permute.xlu1 %1647 }
 0x927   : > { %v1683_v46 = vmul.bf16 1069105081, %v1678_v17  ;;  %v1673_v18 = vsub.f32 %v5123_v47, %v1648_v12 }
 0x929   : > { %3387 = vpow.bf16 %v1683_v46  ;;  %v1679_v2 = vpack.c.bf16 %v1673_v18, %v1672_v15 }
 0x92a   : > { %v1910_v13 = vpop.permute.xlu1 %1909 }
 0x92b   : > { %v1686_v6 = vmul.bf16 1069105081, %v1679_v2  ;;  %3119 = vmatprep.subr.msk.bf16.mxu1 %vm1472_vm12, %v1910_v13  ;;  %v1658_v56 = vpop.permute.xlu0 %1657  ;;  %v1938_v47 = vsel %vm1472_vm12, %v1910_v13, 0 }
 0x92c   : > { %v1675_v57 = vsub.f32 %v5137_v41, %v1658_v56  ;;  %v1899_v56 = vld [vmem:[#allocation2 + $0x30] sm:$0xff] }
 0x92d   : > { %3389 = vpow.bf16 %v1686_v6 }
 0x92e   : > { %v1912_v21 = vpop.permute.xlu1 %1911 }
 0x92f   : > { %v1668_v45 = vpop.permute.xlu0 %1667  ;;  %v1941_v32 = vsel %vm1472_vm12, %v1912_v21, 0 }
 0x930   : > { %v1677_v25 = vsub.f32 %v5133_v33, %v1668_v45 }
 0x932   : > { %v1914_v26 = vpop.permute.xlu1 %1913 }
 0x933   : > { %v1944_v33 = vsel %vm1472_vm12, %v1914_v26, 0  ;;  %v1920_v15 = vpop.permute.xlu0 %1919 }
 0x934   : > { %v5242_v23 = vpop.eup %3387  ;;  %v1953_v46 = vsel %vm1472_vm12, %v1920_v15, 0 }
 0x935   : > { %3039 = vmatprep.mubr.bf16.mxu1 %v5242_v23  ;;  %v1710_v62 = vunpack.c.l.bf16 %v5242_v23 }
 0x936   : > { %v1916_v63 = vpop.permute.xlu1 %1915 }
 0x937   : > { %v1924_v13 = vpop.permute.xlu0 %1923 }
 0x938   : > { %v5245_v34 = vpop.eup %3389  ;;  %v1959_v6 = vsel %vm1472_vm12, %v1924_v13, 0 }
 0x939   : > { %3040 = vmatmul.mubr.bf16.vlgmr.msra.gmra.mrb[0].mxu1 %v5245_v34 }
 0x93a   : > { %3048 = vmatpush3.bf16.xpose.msra.mxu1 %v1938_v47  ;;  %v1663_v22 = vpop.permute.xlu1 %1662 }
 0x93b   : > { %3120 = vmatprep.subr.msk.bf16.mxu1 %vm1472_vm12, %v1912_v21  ;;  %v1676_v48 = vsub.f32 %v5129_v50, %v1663_v22  ;;  %v1898_v21 = vld [vmem:[#allocation2 + $0x28] sm:$0xff] }
 0x93d   : > { %v1681_v60 = vpack.c.bf16 %v1677_v25, %v1676_v48 }
 0x93e   : > { %v1653_v27 = vpop.permute.xlu1 %1652 }
 0x93f   : > { %v1674_v51 = vsub.f32 %v5131_v40, %v1653_v27  ;;  %v1692_v8 = vmul.bf16 1069105081, %v1681_v60  ;;  %v1947_v40 = vsel %vm1472_vm12, %v1916_v63, 0 }
 0x941   : > { %v1680_v36 = vpack.c.bf16 %v1675_v57, %v1674_v51 }
 0x942   : > { %3050 = vmatpush3.bf16.xpose.msra.mxu1 %v1941_v32  ;;  %v1918_v41 = vpop.permute.xlu1 %1917 }
 0x943   : > { %v1689_v30 = vmul.bf16 1069105081, %v1680_v36  ;;  %3121 = vmatprep.subr.msk.bf16.mxu1 %vm1472_vm12, %v1914_v26  ;;  %v1950_v12 = vsel %vm1472_vm12, %v1918_v41, 0  ;;  %v1900_v26 = vld [vmem:[#allocation2 + $0x38] sm:$0xff] }
 0x945   : > { %3391 = vpow.bf16 %v1689_v30 }
 0x946   : > { %3393 = vpow.bf16 %v1692_v8  ;;  %v1922_v18 = vpop.permute.xlu1 %1921 }
 0x947   : > { %v1956_v2 = vsel %vm1472_vm12, %v1922_v18, 0 }
 0x94a   : > { %3052 = vmatpush3.bf16.xpose.msra.mxu1 %v1944_v33 }
 0x94b   : > { %3122 = vmatprep.subr.msk.bf16.mxu1 %vm1472_vm12, %v1916_v63 }
 0x950   : > { %v5258_v50 = vpop.eup %3391 }
 0x951   : > { %3043 = vmatprep.mubr.bf16.mxu1 %v5258_v50  ;;  %v5262_v17 = vpop.eup %3393 }
 0x952   : > { %3054 = vmatpush3.bf16.xpose.msra.mxu1 %v1947_v40  ;;  %v5323_v40 = vld [vmem:[#allocation3 + $0x40] sm:$0xff] }
 0x953   : > { %3044 = vmatmul.mubr.bf16.gmra.mrb[4].mxu1 %v5262_v17  ;;  %3123 = vmatprep.subr.msk.bf16.mxu1 %vm1472_vm12, %v1918_v41 }
 0x954   : > { %3063 = vmatprep.mubr.msk.bf16.mxu1 %vm1472_vm12, %v1897_v53 }
 0x95a   : > { %3056 = vmatpush3.bf16.xpose.msra.mxu1 %v1950_v12  ;;  %v5325_v12 = vld [vmem:[#allocation3 + $0x48] sm:$0xff] }
 0x95b   : > { %3124 = vmatprep.subr.msk.bf16.mxu1 %vm1472_vm12, %v1920_v15 }
 0x962   : > { %3058 = vmatpush3.bf16.xpose.msra.mxu1 %v1953_v46 }
 0x963   : > { %3125 = vmatprep.subr.msk.bf16.mxu1 %vm1472_vm12, %v1922_v18  ;;  %v5330_v18 = vld [vmem:[#allocation3 + $0x58] sm:$0xff] }
 0x96a   : > { %3060 = vmatpush3.bf16.xpose.msra.mxu1 %v1956_v2  ;;  %v5339_v2 = vld [vmem:[#allocation3 + $0x50] sm:$0xff] }
 0x96b   : > { %3126 = vmatprep.subr.msk.bf16.mxu1 %vm1472_vm12, %v1924_v13 }
 0x972   : > { %3062 = vmatpush3.bf16.xpose.msra.mxu1 %v1959_v6 }
 0x979   : > { %3064 = vmatmul.mubr.msk.bf16.vlgmr.msra.gmra.mrb[8].mxu1 %vm1472_vm12, %v1898_v21 }
 0x97a   : > { %3067 = vmatprep.mubr.msk.bf16.mxu1 %vm1472_vm12, %v1899_v56 }
 0x981   : > { %3068 = vmatmul.mubr.msk.bf16.gmra.mrb[12].mxu1 %vm1472_vm12, %v1900_v26 }
 0xa0c   : > { %v5277_v63 = vpop.f32.mrb[0].mxu1 }
 0xa0d   : > { %v5279_v45 = vpop.f32.mrb[1].mxu1 }
 0xa0e   : > { %v5281_v47 = vpop.f32.mrb[2].mxu1 }
 0xa0f   : > { %v5283_v22 = vpop.f32.mrb[3].mxu1 }
 0xa26   : > { %v5285_v25 = vpop.f32.mrb[4].mxu1 }
 0xa27   : > { %v5287_v48 = vpop.f32.mrb[5].mxu1 }
 0xa28   : > { %v5289_v60 = vpop.f32.mrb[6].mxu1 }
 0xa29   : > { %v5291_v27 = vpop.f32.mrb[7].mxu1 }
 0xa4c   : > { %v5293_v57 = vpop.f32.mrb[8].mxu1 }
 0xa4d   : > { %v5295_v51 = vpop.f32.mrb[9].mxu1 }
 0xa4e   : > { %2035 = vmax.xlane.f32.xlu1 %v5295_v51  ;;  %v5298_v32 = vpop.f32.mrb[10].mxu1 }
 0xa4f   : > { %v5300_v36 = vpop.f32.mrb[11].mxu1 }
 0xa50   : > { %2037 = vmax.xlane.f32.xlu0 %v5300_v36 }
 0xa52   : > { %2041 = vmax.xlane.f32.xlu1 %v5298_v32 }
 0xa54   : > { %2039 = vmax.xlane.f32.xlu0 %v5293_v57  ;;  %v5305_v8 = vpop.f32.mrb[12].mxu1 }
 0xa55   : > { %v5307_v30 = vpop.f32.mrb[13].mxu1 }
 0xa56   : > { %v5309_v33 = vpop.f32.mrb[14].mxu1 }
 0xa57   : > { %v5311_v41 = vpop.f32.mrb[15].mxu1 }
 0xa58   : > { %2043 = vmax.xlane.f32.xlu0 %v5307_v30  ;;  %2045 = vmax.xlane.f32.xlu1 %v5311_v41 }
 0xa5c   : > { %2047 = vmax.xlane.f32.xlu0 %v5305_v8  ;;  %2049 = vmax.xlane.f32.xlu1 %v5309_v33 }
 0xa6d   : > { %2271 = vrot.lane.b32.xlu1 %v5873_v4, %s3806_s11 }
 0xa71   : > { %2273 = vrot.lane.b32.xlu1 %v5874_v7, %s3806_s11 }
 0xa72   : > { %2269 = vrot.lane.b32.xlu0 %v4427_v55, %s3806_s11 }
 0xadb   : > { %v2036_v53 = vpop.xlane.xlu1 %2035 }
 0xadc   : > { %v5328_v15 = vmax.f32 %v5323_v40, %v2036_v53  ;;  %v5356_v53 = vld [vmem:[#allocation3 + $0x60] sm:$0xff] }
 0xadd   : > { %v2038_v46 = vpop.xlane.xlu0 %2037 }
 0xade   : > { %2374 = vst.msk [vmem:[#allocation3 + $0x40] sm:$0xff] %vm1742_vm13, %v5328_v15  ;;  %v5337_v7 = vmax.f32 %v5325_v12, %v2038_v46  ;;  %v5358_v46 = vld [vmem:[#allocation3 + $0x68] sm:$0xff]  ;;  %v5890_v11 = vsub.f32 %v5323_v40, %v5328_v15 }
 0xadf   : > { %v2042_v55 = vpop.xlane.xlu1 %2041 }
 0xae0   : > { %2375 = vst.msk [vmem:[#allocation3 + $0x48] sm:$0xff] %vm1742_vm13, %v5337_v7  ;;  %v5346_v6 = vmax.f32 %v5330_v18, %v2042_v55 }
 0xae1   : > { %v2040_v21 = vpop.xlane.xlu0 %2039 }
 0xae2   : > { %2377 = vst.msk [vmem:[#allocation3 + $0x58] sm:$0xff] %vm1742_vm13, %v5346_v6  ;;  %v5353_v26 = vmax.f32 %v5339_v2, %v2040_v21  ;;  %2100 = vperm.xlu0 %3385, %v5346_v6   ;;  %v5892_v31 = vsub.f32 %v5330_v18, %v5346_v6 }
 0xae4   : > { %2376 = vst.msk [vmem:[#allocation3 + $0x50] sm:$0xff] %vm1742_vm13, %v5353_v26  ;;  %2095 = vperm.xlu1 %3386, %v5353_v26   ;;  %v5889_v29 = vsub.f32 %v5339_v2, %v5353_v26  ;;  %v2073_v2 = vmul.f32 1.442695, %v5892_v31 }
 0xae5   : > { %v2044_v56 = vpop.xlane.xlu0 %2043  ;;  %v2046_v13 = vpop.xlane.xlu1 %2045 }
 0xae6   : > { %v5366_v4 = vmax.f32 %v5356_v53, %v2044_v56  ;;  %v5369_v21 = vmax.f32 %v5358_v46, %v2046_v13  ;;  %2090 = vperm.xlu0 %3385, %v5337_v7  }
 0xae8   : > { %2378 = vst.msk [vmem:[#allocation3 + $0x60] sm:$0xff] %vm1742_vm13, %v5366_v4  ;;  %2379 = vst.msk [vmem:[#allocation3 + $0x68] sm:$0xff] %vm1742_vm13, %v5369_v21  ;;  %2085 = vperm.xlu1 %3386, %v5328_v15   ;;  %v5893_v15 = vsub.f32 %v5356_v53, %v5366_v4  ;;  %v5894_v26 = vsub.f32 %v5358_v46, %v5369_v21 }
 0xae9   : > { %v2048_v13 = vpop.xlane.xlu0 %2047  ;;  %v2050_v56 = vpop.xlane.xlu1 %2049 }
 0xaea   : > { %v5386_v3 = vmax.f32 %v5372_v28, %v2048_v13  ;;  %v5389_v61 = vmax.f32 %v5374_v42, %v2050_v56  ;;  %2275 = vrot.lane.b32.xlu0 %v4439_v0, %s3806_s11 }
 0xaec   : > { %v2065_v55 = vsub.f32 %v5372_v28, %v5386_v3  ;;  %2380 = vst.msk [vmem:[#allocation3 + $0x70] sm:$0xff] %vm1742_vm13, %v5386_v3  ;;  %2381 = vst.msk [vmem:[#allocation3 + $0x78] sm:$0xff] %vm1742_vm13, %v5389_v61  ;;  %2115 = vperm.xlu1 %3386, %v5386_v3   ;;  %v1694_v28 = vld [vmem:[#allocation4] sm:$0xff] }
 0xaed   : > { %v2270_v13 = vpop.permute.xlu0 %2269  ;;  %v2272_v56 = vpop.permute.xlu1 %2271 }
 0xaee   : > { %2110 = vperm.xlu0 %3385, %v5369_v21   ;;  %3071 = vmatprep.subr.bf16.mxu0 %v2270_v13 }
 0xaef   : > { %3072 = vmatpush3.bf16.msra.mxu0 %v2270_v13  ;;  %v1711_v13 = vunpack.c.h.bf16 %v5242_v23  ;;  %v1614_v23 = vmul.f32 1.442695, %v1606_v16 }
 0xaf0   : > { %2105 = vperm.xlu1 %3386, %v5366_v4   ;;  %3073 = vmatprep.subr.bf16.mxu0 %v2272_v56 }
 0xaf1   : > { %v2274_v0 = vpop.permute.xlu1 %2273 }
 0xaf2   : > { %2120 = vperm.xlu0 %3385, %v5389_v61  }
 0xaf3   : > { %3074 = vmatpush3.bf16.msra.mxu0 %v2272_v56  ;;  %v1712_v56 = vunpack.c.l.bf16 %v5245_v34 }
 0xaf4   : > { %2277 = vrot.lane.b32.xlu1 %v5876_v52, %s3806_s11  ;;  %3075 = vmatprep.subr.bf16.mxu0 %v2274_v0  ;;  %v1713_v52 = vunpack.c.h.bf16 %v5245_v34  ;;  %v1618_v34 = vmul.f32 1.442695, %v1608_v58 }
 0xaf6   : > { %2279 = vrot.lane.b32.xlu0 %v5878_v38, %s3806_s11  ;;  %v1714_v38 = vunpack.c.l.bf16 %v5258_v50 }
 0xaf7   : > { %3076 = vmatpush3.bf16.msra.mxu0 %v2274_v0  ;;  %v1716_v0 = vunpack.c.l.bf16 %v5262_v17 }
 0xaf8   : > { %2281 = vrot.lane.b32.xlu1 %v5879_v20, %s3806_s11  ;;  %v1715_v20 = vunpack.c.h.bf16 %v5258_v50  ;;  %v5884_v50 = vsub.f32 %v5151_v49, %v5166_v35  ;;  %v5888_v49 = vsub.f32 %v5182_v10, %v5188_v39  ;;  %v2067_v10 = vmul.f32 1.442695, %v5890_v11 }
 0xafa   : > { %2283 = vrot.lane.b32.xlu0 %v4452_v9, %s3806_s11  ;;  %v1717_v9 = vunpack.c.h.bf16 %v5262_v17  ;;  %v5885_v17 = vsub.f32 %v5190_v19, %v5204_v37  ;;  %v1628_v16 = vmul.f32 1.442695, %v5888_v49  ;;  %v5891_v19 = vsub.f32 %v5325_v12, %v5337_v7 }
 0xafb   : > { %v2075_v12 = vmul.f32 1.442695, %v5893_v15 }
 0xafc   : > { %v1622_v54 = vmul.f32 1.442695, %v5885_v17  ;;  %v2069_v1 = vmul.f32 1.442695, %v5891_v19 }
 0xb19   : > { %1720 = vadd.xlane.f32.xlu0 %v1711_v13  ;;  %v1620_v13 = vmul.f32 1.442695, %v5884_v50 }
 0xb1c   : > { %1718 = vadd.xlane.f32.xlu1 %v1710_v62  ;;  %v1616_v62 = vmul.f32 1.442695, %v1607_v14  ;;  %v2071_v14 = vmul.f32 1.442695, %v5889_v29 }
 0xb1d   : > { %1722 = vadd.xlane.f32.xlu0 %v1712_v56  ;;  %v2077_v56 = vmul.f32 1.442695, %v5894_v26 }
 0xb1e   : > { %3395 = vpow2.f32 %v1616_v62 }
 0xb1f   : > { %3397 = vpow2.f32 %v1614_v23 }
 0xb20   : > { %1724 = vadd.xlane.f32.xlu1 %v1713_v52  ;;  %3399 = vpow2.f32 %v1618_v34 }
 0xb21   : > { %1726 = vadd.xlane.f32.xlu0 %v1714_v38  ;;  %3401 = vpow2.f32 %v1620_v13 }
 0xb22   : > { %3403 = vpow2.f32 %v1622_v54 }
 0xb23   : > { %3405 = vpow2.f32 %v1624_v43 }
 0xb24   : > { %1728 = vadd.xlane.f32.xlu1 %v1715_v20  ;;  %3407 = vpow2.f32 %v1626_v5 }
 0xb25   : > { %1730 = vadd.xlane.f32.xlu0 %v1716_v0  ;;  %3409 = vpow2.f32 %v1628_v16 }
 0xb26   : > { %3411 = vpow2.f32 %v2071_v14 }
 0xb27   : > { %3413 = vpow2.f32 %v2067_v10 }
 0xb28   : > { %1732 = vadd.xlane.f32.xlu1 %v1717_v9  ;;  %v5442_v58 = vpop.eup %3395  ;;  %3415 = vpow2.f32 %v2069_v1 }
 0xb29   : > { %v5448_v35 = vpop.eup %3397  ;;  %3417 = vpow2.f32 %v2073_v2 }
 0xb2a   : > { %v5454_v44 = vpop.eup %3399  ;;  %3419 = vpow2.f32 %v2075_v12 }
 0xb2b   : > { %v5460_v39 = vpop.eup %3401  ;;  %3421 = vpow2.f32 %v2077_v56 }
 0xb2c   : > { %v5466_v37 = vpop.eup %3403 }
 0xb2d   : > { %v5472_v40 = vpop.eup %3405 }
 0xb2e   : > { %v5478_v7 = vpop.eup %3407 }
 0xb2f   : > { %v5484_v18 = vpop.eup %3409 }
 0xb30   : > { %v5487_v6 = vpop.eup %3411 }
 0xb31   : > { %v5490_v4 = vpop.eup %3413 }
 0xb32   : > { %v5493_v53 = vpop.eup %3415 }
 0xb33   : > { %v5496_v46 = vpop.eup %3417 }
 0xb34   : > { %v5499_v21 = vpop.eup %3419 }
 0xb35   : > { %v5502_v52 = vpop.eup %3421 }
 0xb39   : > { %1766 = vperm.xlu1 %3386, %v5442_v58  }
 0xb3b   : > { %1761 = vperm.xlu0 %3385, %v5448_v35  }
 0xb3d   : > { %1771 = vperm.xlu1 %3386, %v5454_v44  }
 0xb3f   : > { %1776 = vperm.xlu0 %3385, %v5460_v39  }
 0xb41   : > { %1781 = vperm.xlu1 %3386, %v5466_v37  }
 0xb43   : > { %1786 = vperm.xlu0 %3385, %v5472_v40  }
 0xb45   : > { %1791 = vperm.xlu1 %3386, %v5478_v7  }
 0xb47   : > { %1796 = vperm.xlu0 %3385, %v5484_v18  }
 0xb49   : > { %2225 = vperm.xlu1 %3386, %v5487_v6  }
 0xb4b   : > { %2215 = vperm.xlu0 %3385, %v5490_v4  }
 0xb4d   : > { %2220 = vperm.xlu1 %3386, %v5493_v53  }
 0xb4f   : > { %2230 = vperm.xlu0 %3385, %v5496_v46  }
 0xb51   : > { %2235 = vperm.xlu1 %3386, %v5499_v21  }
 0xb53   : > { %2240 = vperm.xlu0 %3385, %v5502_v52  }
 0xb61   : > { %v2101_v38 = vpop.permute.xlu0 %2100 }
 0xb62   : > { %v2126_v0 = vsub.f32 %v5298_v32, %v2101_v38 }
 0xb63   : > { %v2096_v20 = vpop.permute.xlu1 %2095 }
 0xb64   : > { %v2125_v9 = vsub.f32 %v5293_v57, %v2096_v20 }
 0xb65   : > { %v2091_v62 = vpop.permute.xlu0 %2090 }
 0xb66   : > { %v2132_v23 = vpack.c.bf16 %v2126_v0, %v2125_v9  ;;  %v2124_v13 = vsub.f32 %v5300_v36, %v2091_v62  ;;  %v2079_v62 = vmul.f32 1.442695, %v2065_v55  ;;  %v1696_v55 = vld [vmem:[#allocation4 + $0x10] sm:$0xff] }
 0xb67   : > { %v2086_v34 = vpop.permute.xlu1 %2085 }
 0xb68   : > { %v2139_v50 = vmul.bf16 1069105081, %v2132_v23  ;;  %v2123_v17 = vsub.f32 %v5295_v51, %v2086_v34  ;;  %v5895_v23 = vsub.f32 %v5374_v42, %v5389_v61  ;;  %v1704_v42 = vmul.f32 %v5454_v44, %v1696_v55  ;;  %v1757_v55 = vld [vmem:[#allocation5 + $0x30] sm:$0xff] }
 0xb69   : > { %v2276_v54 = vpop.permute.xlu0 %2275 }
 0xb6a   : > { %3423 = vpow.bf16 %v2139_v50  ;;  %v2131_v24 = vpack.c.bf16 %v2124_v13, %v2123_v17  ;;  %3077 = vmatprep.subr.bf16.mxu0 %v2276_v54  ;;  %v2081_v34 = vmul.f32 1.442695, %v5895_v23  ;;  %v1695_v17 = vld [vmem:[#allocation4 + $0x8] sm:$0xff]  ;;  %v1755_v23 = vld [vmem:[#allocation5 + $0x20] sm:$0xff] }
 0xb6b   : > { %3078 = vmatpush3.bf16.msra.mxu0 %v2276_v54  ;;  %v2116_v43 = vpop.permute.xlu1 %2115  ;;  %v1703_v54 = vmul.f32 %v5442_v58, %v1695_v17  ;;  %v1756_v17 = vld [vmem:[#allocation5 + $0x28] sm:$0xff] }
 0xb6c   : > { %v2136_v59 = vmul.bf16 1069105081, %v2131_v24  ;;  %v2129_v29 = vsub.f32 %v5305_v8, %v2116_v43  ;;  %v1702_v43 = vmul.f32 %v5448_v35, %v1694_v28  ;;  %v1699_v35 = vld [vmem:[#allocation4 + $0x28] sm:$0xff] }
 0xb6d   : > { %v2111_v5 = vpop.permute.xlu0 %2110  ;;  %v1707_v44 = vmul.f32 %v5472_v40, %v1699_v35  ;;  %v1751_v40 = vld [vmem:[#allocation5] sm:$0xff]  ;;  %v2151_v35 = vld [vmem:[#allocation4 + $0x58] sm:$0xff] }
 0xb6e   : > { %3425 = vpow.bf16 %v2136_v59  ;;  %v2128_v57 = vsub.f32 %v5311_v41, %v2111_v5  ;;  %v1697_v59 = vld [vmem:[#allocation4 + $0x18] sm:$0xff] }
 0xb6f   : > { %v2106_v32 = vpop.permute.xlu1 %2105  ;;  %v1705_v58 = vmul.f32 %v5460_v39, %v1697_v59  ;;  %v1701_v39 = vld [vmem:[#allocation4 + $0x38] sm:$0xff] }
 0xb70   : > { %v2127_v49 = vsub.f32 %v5307_v30, %v2106_v32 }
 0xb71   : > { %v2121_v16 = vpop.permute.xlu0 %2120 }
 0xb72   : > { %v2133_v36 = vpack.c.bf16 %v2128_v57, %v2127_v49  ;;  %v2130_v51 = vsub.f32 %v5309_v33, %v2121_v16  ;;  %v1698_v57 = vld [vmem:[#allocation4 + $0x20] sm:$0xff] }
 0xb73   : > { %v2278_v14 = vpop.permute.xlu1 %2277 }
 0xb74   : > { %v2134_v11 = vpack.c.bf16 %v2130_v51, %v2129_v29  ;;  %3079 = vmatprep.subr.bf16.mxu0 %v2278_v14  ;;  %v2142_v19 = vmul.bf16 1069105081, %v2133_v36  ;;  %v1706_v29 = vmul.f32 %v5466_v37, %v1698_v57  ;;  %v1709_v37 = vmul.f32 %v5484_v18, %v1701_v39 }
 0xb75   : > { %v3424_v10 = vpop.eup %3423  ;;  %3080 = vmatpush3.bf16.msra.mxu0 %v2278_v14  ;;  %v2280_v1 = vpop.permute.xlu0 %2279  ;;  %v1700_v14 = vld [vmem:[#allocation4 + $0x30] sm:$0xff] }
 0xb76   : > { %v2145_v31 = vmul.bf16 1069105081, %v2134_v11  ;;  %v2167_v2 = vunpack.c.h.bf16 %v3424_v10  ;;  %v2166_v15 = vunpack.c.l.bf16 %v3424_v10  ;;  %3081 = vmatprep.subr.bf16.mxu0 %v2280_v1 }
 0xb77   : > { %v2282_v41 = vpop.permute.xlu1 %2281 }
 0xb78   : > { %3427 = vpow.bf16 %v2145_v31  ;;  %2178 = vadd.xlane.f32.xlu1 %v2167_v2  ;;  %2176 = vadd.xlane.f32.xlu0 %v2166_v15 }
 0xb79   : > { %v3426_v30 = vpop.eup %3425  ;;  %3429 = vpow.bf16 %v2142_v19  ;;  %3082 = vmatpush3.bf16.msra.mxu0 %v2280_v1  ;;  %v2284_v12 = vpop.permute.xlu0 %2283  ;;  %v1708_v19 = vmul.f32 %v5478_v7, %v1700_v14  ;;  %v2149_v14 = vld [vmem:[#allocation4 + $0x48] sm:$0xff] }
 0xb7a   : > { %3087 = vmatprep.mubr.bf16.mxu0 %v3426_v30  ;;  %v2165_v8 = vunpack.c.h.bf16 %v3426_v30  ;;  %v2164_v33 = vunpack.c.l.bf16 %v3426_v30  ;;  %3083 = vmatprep.subr.bf16.mxu0 %v2282_v41  ;;  %3431 = vpow2.f32 %v2079_v62  ;;  %v1752_v30 = vld [vmem:[#allocation5 + $0x8] sm:$0xff] }
 0xb7b   : > { %3433 = vpow2.f32 %v2081_v34 }
 0xb7c   : > { %2174 = vadd.xlane.f32.xlu0 %v2165_v8  ;;  %2172 = vadd.xlane.f32.xlu1 %v2164_v33 }
 0xb7d   : > { %3084 = vmatpush3.bf16.msra.mxu0 %v2282_v41 }
 0xb7e   : > { %3085 = vmatprep.subr.bf16.mxu0 %v2284_v12 }
 0xb81   : > { %3086 = vmatpush3.bf16.msra.mxu0 %v2284_v12 }
 0xb83   : > { %v3428_v26 = vpop.eup %3427 }
 0xb84   : > { %v3430_v56 = vpop.eup %3429  ;;  %3088 = vmatmul.mubr.bf16.vlgmr.msra.gmra.mrb[8].mxu0 %v3424_v10  ;;  %v2171_v38 = vunpack.c.h.bf16 %v3428_v26  ;;  %v2170_v20 = vunpack.c.l.bf16 %v3428_v26 }
 0xb85   : > { %3091 = vmatprep.mubr.bf16.mxu0 %v3430_v56  ;;  %v2169_v0 = vunpack.c.h.bf16 %v3430_v56  ;;  %v2168_v9 = vunpack.c.l.bf16 %v3430_v56  ;;  %v5519_v50 = vpop.eup %3431 }
 0xb86   : > { %2186 = vadd.xlane.f32.xlu1 %v2171_v38  ;;  %2184 = vadd.xlane.f32.xlu0 %v2170_v20  ;;  %v5522_v13 = vpop.eup %3433  ;;  %v1754_v38 = vld [vmem:[#allocation5 + $0x18] sm:$0xff] }
 0xb8a   : > { %2182 = vadd.xlane.f32.xlu1 %v2169_v0  ;;  %2180 = vadd.xlane.f32.xlu0 %v2168_v9 }
 0xb8c   : > { %3092 = vmatmul.mubr.bf16.gmra.mrb[12].mxu0 %v3428_v26  ;;  %v1753_v26 = vld [vmem:[#allocation5 + $0x10] sm:$0xff] }
 0xb9b   : > { %2245 = vperm.xlu1 %3386, %v5519_v50  }
 0xba0   : > { %2250 = vperm.xlu0 %3385, %v5522_v13  }
 0xba6   : > { %v1721_v3 = vpop.xlane.xlu0 %1720 }
 0xba7   : > { %v1735_v24 = vadd.f32 %v1721_v3, %v1703_v54 }
 0xba9   : > { %1744 = vst.msk [vmem:[#allocation4 + $0x8] sm:$0xff] %vm1742_vm13, %v1735_v24  ;;  %v1719_v61 = vpop.xlane.xlu1 %1718 }
 0xbaa   : > { %v1734_v5 = vadd.f32 %v1719_v61, %v1702_v43  ;;  %v1723_v32 = vpop.xlane.xlu0 %1722  ;;  %v1758_v43 = vld [vmem:[#allocation5 + $0x38] sm:$0xff] }
 0xbab   : > { %v1736_v49 = vadd.f32 %v1723_v32, %v1704_v42 }
 0xbac   : > { %1743 = vst.msk [vmem:[#allocation4] sm:$0xff] %vm1742_vm13, %v1734_v5 }
 0xbad   : > { %1745 = vst.msk [vmem:[#allocation4 + $0x10] sm:$0xff] %vm1742_vm13, %v1736_v49  ;;  %v1725_v16 = vpop.xlane.xlu1 %1724 }
 0xbae   : > { %v1737_v36 = vadd.f32 %v1725_v16, %v1705_v58  ;;  %v1727_v51 = vpop.xlane.xlu0 %1726 }
 0xbaf   : > { %v1738_v11 = vadd.f32 %v1727_v51, %v1706_v29  ;;  %v2150_v29 = vld [vmem:[#allocation4 + $0x50] sm:$0xff] }
 0xbb0   : > { %1746 = vst.msk [vmem:[#allocation4 + $0x18] sm:$0xff] %vm1742_vm13, %v1737_v36  ;;  %v2158_v36 = vmul.f32 %v5487_v6, %v2150_v29 }
 0xbb1   : > { %1747 = vst.msk [vmem:[#allocation4 + $0x20] sm:$0xff] %vm1742_vm13, %v1738_v11  ;;  %v1729_v10 = vpop.xlane.xlu1 %1728  ;;  %v2148_v11 = vld [vmem:[#allocation4 + $0x40] sm:$0xff] }
 0xbb2   : > { %v1739_v1 = vadd.f32 %v1729_v10, %v1707_v44  ;;  %v1731_v31 = vpop.xlane.xlu0 %1730  ;;  %v2156_v39 = vmul.f32 %v5490_v4, %v2148_v11 }
 0xbb3   : > { %v1740_v2 = vadd.f32 %v1731_v31, %v1708_v19  ;;  %v2157_v19 = vmul.f32 %v5493_v53, %v2149_v14  ;;  %v2153_v53 = vld [vmem:[#allocation4 + $0x68] sm:$0xff] }
 0xbb4   : > { %1748 = vst.msk [vmem:[#allocation4 + $0x28] sm:$0xff] %vm1742_vm13, %v1739_v1 }
 0xbb5   : > { %1749 = vst.msk [vmem:[#allocation4 + $0x30] sm:$0xff] %vm1742_vm13, %v1740_v2  ;;  %v1733_v15 = vpop.xlane.xlu1 %1732 }
 0xbb6   : > { %v1741_v41 = vadd.f32 %v1733_v15, %v1709_v37  ;;  %v2155_v37 = vld [vmem:[#allocation4 + $0x78] sm:$0xff] }
 0xbb8   : > { %1750 = vst.msk [vmem:[#allocation4 + $0x38] sm:$0xff] %vm1742_vm13, %v1741_v41  ;;  %v2163_v41 = vmul.f32 %v5522_v13, %v2155_v37  ;;  %v2207_v13 = vld [vmem:[#allocation5 + $0x50] sm:$0xff] }
 0xbb9   : > { %v1767_v8 = vpop.permute.xlu1 %1766 }
 0xbba   : > { %v1800_v33 = vmul.f32 %v1767_v8, %v1752_v30  ;;  %v1762_v12 = vpop.permute.xlu0 %1761  ;;  %v2152_v8 = vld [vmem:[#allocation4 + $0x60] sm:$0xff] }
 0xbbb   : > { %v1799_v7 = vmul.f32 %v1762_v12, %v1751_v40  ;;  %v2160_v12 = vmul.f32 %v5499_v21, %v2152_v8 }
 0xbbc   : > { %v1873_v56 = vadd.f32 %v5283_v22, %v1800_v33 }
 0xbbd   : > { %v1872_v20 = vadd.f32 %v5279_v45, %v1799_v7  ;;  %v1772_v0 = vpop.permute.xlu1 %1771  ;;  %v2161_v7 = vmul.f32 %v5502_v52, %v2153_v53 }
 0xbbe   : > { %1881 = vst.msk [vmem:[#allocation5 + $0x8] sm:$0xff] %vm1472_vm12, %v1873_v56  ;;  %v1801_v18 = vmul.f32 %v1772_v0, %v1753_v26  ;;  %v1777_v9 = vpop.permute.xlu0 %1776  ;;  %v2208_v0 = vld [vmem:[#allocation5 + $0x58] sm:$0xff] }
 0xbbf   : > { %1880 = vst.msk [vmem:[#allocation5] sm:$0xff] %vm1472_vm12, %v1872_v20  ;;  %v1802_v62 = vmul.f32 %v1777_v9, %v1754_v38  ;;  %v2205_v20 = vld [vmem:[#allocation5 + $0x40] sm:$0xff]  ;;  %v2206_v9 = vld [vmem:[#allocation5 + $0x48] sm:$0xff] }
 0xbc0   : > { %v1874_v34 = vadd.f32 %v5277_v63, %v1801_v18 }
 0xbc1   : > { %v1875_v54 = vadd.f32 %v5281_v47, %v1802_v62  ;;  %v1782_v28 = vpop.permute.xlu1 %1781 }
 0xbc2   : > { %1882 = vst.msk [vmem:[#allocation5 + $0x10] sm:$0xff] %vm1472_vm12, %v1874_v34  ;;  %v1803_v22 = vmul.f32 %v1782_v28, %v1755_v23  ;;  %v1787_v3 = vpop.permute.xlu0 %1786 }
 0xbc3   : > { %1883 = vst.msk [vmem:[#allocation5 + $0x18] sm:$0xff] %vm1472_vm12, %v1875_v54  ;;  %v1804_v45 = vmul.f32 %v1787_v3, %v1756_v17 }
 0xbc4   : > { %v1876_v24 = vadd.f32 %v5287_v48, %v1803_v22 }
 0xbc5   : > { %v1877_v61 = vadd.f32 %v5291_v27, %v1804_v45  ;;  %v1792_v42 = vpop.permute.xlu1 %1791  ;;  %v2211_v45 = vld [vmem:[#allocation5 + $0x70] sm:$0xff] }
 0xbc6   : > { %1884 = vst.msk [vmem:[#allocation5 + $0x20] sm:$0xff] %vm1472_vm12, %v1876_v24  ;;  %v1805_v63 = vmul.f32 %v1792_v42, %v1757_v55  ;;  %v1797_v59 = vpop.permute.xlu0 %1796 }
 0xbc7   : > { %1885 = vst.msk [vmem:[#allocation5 + $0x28] sm:$0xff] %vm1472_vm12, %v1877_v61  ;;  %v1806_v47 = vmul.f32 %v1797_v59, %v1758_v43  ;;  %v2209_v43 = vld [vmem:[#allocation5 + $0x60] sm:$0xff]  ;;  %v2212_v61 = vld [vmem:[#allocation5 + $0x78] sm:$0xff] }
 0xbc8   : > { %v1878_v5 = vadd.f32 %v5285_v25, %v1805_v63  ;;  %v2159_v25 = vmul.f32 %v5496_v46, %v2151_v35  ;;  %v2154_v46 = vld [vmem:[#allocation4 + $0x70] sm:$0xff]  ;;  %v2210_v63 = vld [vmem:[#allocation5 + $0x68] sm:$0xff] }
 0xbc9   : > { %v1879_v32 = vadd.f32 %v5289_v60, %v1806_v47  ;;  %v2226_v48 = vpop.permute.xlu1 %2225  ;;  %v2162_v15 = vmul.f32 %v5519_v50, %v2154_v46 }
 0xbca   : > { %1886 = vst.msk [vmem:[#allocation5 + $0x30] sm:$0xff] %vm1472_vm12, %v1878_v5  ;;  %v2216_v57 = vpop.permute.xlu0 %2215  ;;  %v2255_v18 = vmul.f32 %v2226_v48, %v2207_v13 }
 0xbcb   : > { %1887 = vst.msk [vmem:[#allocation5 + $0x38] sm:$0xff] %vm1472_vm12, %v1879_v32  ;;  %v2253_v62 = vmul.f32 %v2216_v57, %v2205_v20 }
 0xbcd   : > { %v2221_v49 = vpop.permute.xlu1 %2220 }
 0xbce   : > { %v2231_v27 = vpop.permute.xlu0 %2230  ;;  %v2254_v54 = vmul.f32 %v2221_v49, %v2206_v9 }
 0xbcf   : > { %v2256_v34 = vmul.f32 %v2231_v27, %v2208_v0 }
 0xbd1   : > { %v5557_v58 = vpop.permute.xlu1 %2235 }
 0xbd2   : > { %v5559_v16 = vpop.permute.xlu0 %2240  ;;  %v2257_v47 = vmul.f32 %v5557_v58, %v2209_v43 }
 0xbd3   : > { %v2258_v49 = vmul.f32 %v5559_v16, %v2210_v63 }
 0xc05   : > { %v2177_v51 = vpop.xlane.xlu0 %2176  ;;  %v2179_v60 = vpop.xlane.xlu1 %2178 }
 0xc06   : > { %v2190_v44 = vadd.f32 %v2177_v51, %v2158_v36  ;;  %v2191_v10 = vadd.f32 %v2179_v60, %v2159_v25 }
 0xc08   : > { %2198 = vst.msk [vmem:[#allocation4 + $0x50] sm:$0xff] %vm1742_vm13, %v2190_v44  ;;  %2199 = vst.msk [vmem:[#allocation4 + $0x58] sm:$0xff] %vm1742_vm13, %v2191_v10 }
 0xc09   : > { %v2175_v1 = vpop.xlane.xlu0 %2174  ;;  %v2173_v31 = vpop.xlane.xlu1 %2172 }
 0xc0a   : > { %v2189_v2 = vadd.f32 %v2175_v1, %v2157_v19  ;;  %v2188_v6 = vadd.f32 %v2173_v31, %v2156_v39 }
 0xc0c   : > { %2197 = vst.msk [vmem:[#allocation4 + $0x48] sm:$0xff] %vm1742_vm13, %v2189_v2  ;;  %2196 = vst.msk [vmem:[#allocation4 + $0x40] sm:$0xff] %vm1742_vm13, %v2188_v6 }
 0xc13   : > { %v2185_v30 = vpop.xlane.xlu0 %2184  ;;  %v2187_v40 = vpop.xlane.xlu1 %2186 }
 0xc14   : > { %v2194_v33 = vadd.f32 %v2185_v30, %v2162_v15  ;;  %v2195_v4 = vadd.f32 %v2187_v40, %v2163_v41 }
 0xc16   : > { %2202 = vst.msk [vmem:[#allocation4 + $0x70] sm:$0xff] %vm1742_vm13, %v2194_v33  ;;  %2203 = vst.msk [vmem:[#allocation4 + $0x78] sm:$0xff] %vm1742_vm13, %v2195_v4 }
 0xc17   : > { %v2181_v26 = vpop.xlane.xlu0 %2180  ;;  %v2183_v56 = vpop.xlane.xlu1 %2182 }
 0xc18   : > { %v2192_v38 = vadd.f32 %v2181_v26, %v2160_v12  ;;  %v2193_v50 = vadd.f32 %v2183_v56, %v2161_v7 }
 0xc1a   : > { %2200 = vst.msk [vmem:[#allocation4 + $0x60] sm:$0xff] %vm1742_vm13, %v2192_v38  ;;  %2201 = vst.msk [vmem:[#allocation4 + $0x68] sm:$0xff] %vm1742_vm13, %v2193_v50 }
 0xc1b   : > { %v2246_v55 = vpop.permute.xlu1 %2245 }
 0xc1c   : > { %v2259_v59 = vmul.f32 %v2246_v55, %v2211_v45 }
 0xc1f   : > { %v2251_v42 = vpop.permute.xlu0 %2250 }
 0xc20   : > { %v2260_v32 = vmul.f32 %v2251_v42, %v2212_v61 }
 0xc57   : > { %v3089_v23 = vpop.f32.mrb[8].mxu0 }
 0xc58   : > { %v2360_v17 = vadd.f32 %v3089_v23, %v2255_v18  ;;  %v2327_v21 = vpop.f32.mrb[9].mxu0 }
 0xc59   : > { %v2358_v52 = vadd.f32 %v2327_v21, %v2253_v62  ;;  %v3090_v28 = vpop.f32.mrb[10].mxu0 }
 0xc5a   : > { %2368 = vst.msk [vmem:[#allocation5 + $0x50] sm:$0xff] %vm1472_vm12, %v2360_v17  ;;  %v2361_v22 = vadd.f32 %v3090_v28, %v2256_v34  ;;  %v2330_v3 = vpop.f32.mrb[11].mxu0 }
 0xc5b   : > { %2366 = vst.msk [vmem:[#allocation5 + $0x40] sm:$0xff] %vm1472_vm12, %v2358_v52  ;;  %v2359_v24 = vadd.f32 %v2330_v3, %v2254_v54 }
 0xc5c   : > { %2369 = vst.msk [vmem:[#allocation5 + $0x58] sm:$0xff] %vm1472_vm12, %v2361_v22 }
 0xc5d   : > { %2367 = vst.msk [vmem:[#allocation5 + $0x48] sm:$0xff] %vm1472_vm12, %v2359_v24 }
 0xc5f   : > { %v3093_v5 = vpop.f32.mrb[12].mxu0 }
 0xc60   : > { %v2364_v48 = vadd.f32 %v3093_v5, %v2259_v59  ;;  %v2343_v57 = vpop.f32.mrb[13].mxu0 }
 0xc61   : > { %v2362_v27 = vadd.f32 %v2343_v57, %v2257_v47  ;;  %v3094_v29 = vpop.f32.mrb[14].mxu0 }
 0xc62   : > { %2372 = vst.msk [vmem:[#allocation5 + $0x70] sm:$0xff] %vm1472_vm12, %v2364_v48  ;;  %v2365_v35 = vadd.f32 %v3094_v29, %v2260_v32  ;;  %v2346_v36 = vpop.f32.mrb[15].mxu0 }
 0xc63   : > { %2370 = vst.msk [vmem:[#allocation5 + $0x60] sm:$0xff] %vm1472_vm12, %v2362_v27  ;;  %v2363_v25 = vadd.f32 %v2346_v36, %v2258_v49 }
 0xc64   : > { %2373 = vst.msk [vmem:[#allocation5 + $0x78] sm:$0xff] %vm1472_vm12, %v2365_v35 }
 0xc65   : > { %2371 = vst.msk [vmem:[#allocation5 + $0x68] sm:$0xff] %vm1472_vm12, %v2363_v25 }
 0xc66 PF: > { %s5896_s23 = sld [smem:[#allocation36_spill]] }
 0xc6c   : > { %s2382_s22 = sld [smem:[#allocation9 + %s5896_s23]] }
 0xc72   : > { %p2795_p9 = scmp.ne.s32.totalorder %s2382_s22, 1 }
 0xc73   : > { %v2462_v58 = vld [vmem:[#allocation4 + $0x50] sm:$0xff] (!%p2795_p9)  ;;  %v2460_v16 = vld [vmem:[#allocation4 + $0x40] sm:$0xff] (!%p2795_p9)  ;;  %v2463_v51 = vld [vmem:[#allocation4 + $0x58] sm:$0xff] (!%p2795_p9)  ;;  %v3807_v60 = vmov (!%p2795_p9), 0   ;;  %s3808_s12 = smov (!%p2795_p9), 64   ;;  %vm2565_vm14 = vcmask (!%p2795_p9), 523264  }
 0xc74   : > { %2386 = sbr.rel (%p2795_p9) target bundleno = 3463 (0xd87), region = 60  ;;  %3436 = vset.pattern.permute.xlu1 (!%p2795_p9), %v3807_v60  ;;  %3435 = vset.pattern.permute.xlu0 (!%p2795_p9), %v3807_v60  ;;  %3437 = vrcp.f32 (!%p2795_p9), %v2462_v58  ;;  %v2461_v14 = vld [vmem:[#allocation4 + $0x48] sm:$0xff] (!%p2795_p9)  ;;  %v2464_v44 = vld [vmem:[#allocation4 + $0x60] sm:$0xff] (!%p2795_p9)  ;;  %v2467_v10 = vld [vmem:[#allocation4 + $0x78] sm:$0xff] (!%p2795_p9) }
 0xc75   : > { %3439 = vrcp.f32 (!%p2795_p9), %v2460_v16  ;;  %v2465_v11 = vld [vmem:[#allocation4 + $0x68] sm:$0xff] (!%p2795_p9)  ;;  %v2466_v19 = vld [vmem:[#allocation4 + $0x70] sm:$0xff] (!%p2795_p9)  ;;  %v2387_v6 = vld [vmem:[#allocation4] sm:$0xff] (!%p2795_p9) }
 0xc76   : > { %3441 = vrcp.f32 (!%p2795_p9), %v2463_v51  ;;  %v2388_v31 = vld [vmem:[#allocation4 + $0x8] sm:$0xff] (!%p2795_p9)  ;;  %v2390_v37 = vld [vmem:[#allocation4 + $0x18] sm:$0xff] (!%p2795_p9)  ;;  %v2389_v41 = vld [vmem:[#allocation4 + $0x10] sm:$0xff] (!%p2795_p9) }
 0xc77   : > { %3443 = vrcp.f32 (!%p2795_p9), %v2461_v14  ;;  %v2392_v40 = vld [vmem:[#allocation4 + $0x28] sm:$0xff] (!%p2795_p9)  ;;  %v2391_v53 = vld [vmem:[#allocation4 + $0x20] sm:$0xff] (!%p2795_p9)  ;;  %v2394_v4 = vld [vmem:[#allocation4 + $0x38] sm:$0xff] (!%p2795_p9) }
 0xc78   : > { %3445 = vrcp.f32 (!%p2795_p9), %v2465_v11  ;;  %v2393_v7 = vld [vmem:[#allocation4 + $0x30] sm:$0xff] (!%p2795_p9)  ;;  %v2477_v18 = vld [vmem:[#allocation5 + $0x40] sm:$0xff] (!%p2795_p9)  ;;  %v2478_v17 = vld [vmem:[#allocation5 + $0x48] sm:$0xff] (!%p2795_p9) }
 0xc79   : > { %3447 = vrcp.f32 (!%p2795_p9), %v2464_v44  ;;  %v2479_v62 = vld [vmem:[#allocation5 + $0x50] sm:$0xff] (!%p2795_p9)  ;;  %v2480_v22 = vld [vmem:[#allocation5 + $0x58] sm:$0xff] (!%p2795_p9)  ;;  %v2481_v3 = vld [vmem:[#allocation5 + $0x60] sm:$0xff] (!%p2795_p9) }
 0xc7a   : > { %3449 = vrcp.f32 (!%p2795_p9), %v2467_v10  ;;  %v2482_v61 = vld [vmem:[#allocation5 + $0x68] sm:$0xff] (!%p2795_p9)  ;;  %v2483_v42 = vld [vmem:[#allocation5 + $0x70] sm:$0xff] (!%p2795_p9)  ;;  %v2484_v5 = vld [vmem:[#allocation5 + $0x78] sm:$0xff] (!%p2795_p9) }
 0xc7b   : > { %3451 = vrcp.f32 %v2466_v19  ;;  %v2403_v25 = vld [vmem:[#allocation5] sm:$0xff]  ;;  %v2404_v51 = vld [vmem:[#allocation5 + $0x8] sm:$0xff]  ;;  %v2405_v60 = vld [vmem:[#allocation5 + $0x10] sm:$0xff] }
 0xc7c   : > { %3453 = vrcp.f32 %v2388_v31 }
 0xc7d   : > { %3455 = vrcp.f32 %v2387_v6 }
 0xc7e   : > { %v3438_v39 = vpop.eup %3437  ;;  %3457 = vrcp.f32 %v2390_v37 }
 0xc7f   : > { %v3440_v1 = vpop.eup %3439  ;;  %2497 = vperm.xlu1 %3436, %v3438_v39   ;;  %3459 = vrcp.f32 %v2389_v41  ;;  %v2406_v39 = vld [vmem:[#allocation5 + $0x18] sm:$0xff]  ;;  %v2408_v41 = vld [vmem:[#allocation5 + $0x28] sm:$0xff] }
 0xc80   : > { %v3442_v2 = vpop.eup %3441  ;;  %2487 = vperm.xlu0 %3435, %v3440_v1   ;;  %3461 = vrcp.f32 %v2392_v40  ;;  %v2407_v1 = vld [vmem:[#allocation5 + $0x20] sm:$0xff] }
 0xc81   : > { %v3444_v46 = vpop.eup %3443  ;;  %3463 = vrcp.f32 %v2391_v53 }
 0xc82   : > { %v3446_v15 = vpop.eup %3445  ;;  %3465 = vrcp.f32 %v2394_v4 }
 0xc83   : > { %2502 = vperm.xlu1 %3436, %v3442_v2   ;;  %v3448_v30 = vpop.eup %3447  ;;  %3467 = vrcp.f32 %v2393_v7  ;;  %v2410_v7 = vld [vmem:[#allocation5 + $0x38] sm:$0xff] }
 0xc84   : > { %2492 = vperm.xlu0 %3435, %v3444_v46   ;;  %v3450_v8 = vpop.eup %3449 }
 0xc85   : > { %v3452_v33 = vpop.eup %3451 }
 0xc86   : > { %v3454_v12 = vpop.eup %3453 }
 0xc87   : > { %2512 = vperm.xlu1 %3436, %v3446_v15   ;;  %v3456_v26 = vpop.eup %3455 }
 0xc88   : > { %2507 = vperm.xlu0 %3435, %v3448_v30   ;;  %v3458_v56 = vpop.eup %3457  ;;  %v2409_v30 = vld [vmem:[#allocation5 + $0x30] sm:$0xff] }
 0xc89   : > { %v3460_v38 = vpop.eup %3459 }
 0xc8a   : > { %v3462_v50 = vpop.eup %3461 }
 0xc8b   : > { %2522 = vperm.xlu1 %3436, %v3450_v8   ;;  %v3464_v13 = vpop.eup %3463 }
 0xc8c   : > { %2517 = vperm.xlu0 %3435, %v3452_v33   ;;  %v3466_v20 = vpop.eup %3465 }
 0xc8d   : > { %v3468_v0 = vpop.eup %3467 }
 0xc8f   : > { %2418 = vperm.xlu1 %3436, %v3454_v12  }
 0xc90   : > { %2413 = vperm.xlu0 %3435, %v3456_v26  }
 0xc93   : > { %2428 = vperm.xlu1 %3436, %v3458_v56  }
 0xc94   : > { %2423 = vperm.xlu0 %3435, %v3460_v38  }
 0xc97   : > { %2438 = vperm.xlu1 %3436, %v3462_v50  }
 0xc98   : > { %2433 = vperm.xlu0 %3435, %v3464_v13  }
 0xc9b   : > { %2448 = vperm.xlu1 %3436, %v3466_v20  }
 0xc9c   : > { %2443 = vperm.xlu0 %3435, %v3468_v0  }
 0xcfe   : > { %v2498_v9 = vpop.permute.xlu1 %2497 }
 0xcff   : > { %v2488_v23 = vpop.permute.xlu0 %2487  ;;  %v2527_v21 = vmul.f32 %v2498_v9, %v2479_v62 }
 0xd00   : > { %v2525_v34 = vmul.f32 %v2488_v23, %v2477_v18 }
 0xd02   : > { %2541 = vrot.lane.b32.xlu0 %v2525_v34, %s3808_s12  ;;  %v2503_v54 = vpop.permute.xlu1 %2502 }
 0xd03   : > { %v2493_v52 = vpop.permute.xlu0 %2492  ;;  %v2528_v24 = vmul.f32 %v2503_v54, %v2480_v22 }
 0xd04   : > { %v2526_v28 = vmul.f32 %v2493_v52, %v2478_v17 }
 0xd06   : > { %2543 = vrot.lane.b32.xlu1 %v2526_v28, %s3808_s12  ;;  %2545 = vrot.lane.b32.xlu0 %v2527_v21, %s3808_s12  ;;  %v2513_v45 = vpop.permute.xlu1 %2512 }
 0xd07   : > { %v2508_v55 = vpop.permute.xlu0 %2507  ;;  %v2530_v59 = vmul.f32 %v2513_v45, %v2482_v61 }
 0xd08   : > { %v2529_v43 = vmul.f32 %v2508_v55, %v2481_v3 }
 0xd0a   : > { %2547 = vrot.lane.b32.xlu1 %v2528_v24, %s3808_s12  ;;  %2549 = vrot.lane.b32.xlu0 %v2529_v43, %s3808_s12  ;;  %v2523_v32 = vpop.permute.xlu1 %2522 }
 0xd0b   : > { %v2518_v63 = vpop.permute.xlu0 %2517  ;;  %v2532_v48 = vmul.f32 %v2523_v32, %v2484_v5 }
 0xd0c   : > { %v2531_v47 = vmul.f32 %v2518_v63, %v2483_v42 }
 0xd0e   : > { %2551 = vrot.lane.b32.xlu1 %v2530_v59, %s3808_s12  ;;  %2553 = vrot.lane.b32.xlu0 %v2531_v47, %s3808_s12  ;;  %v2419_v49 = vpop.permute.xlu1 %2418 }
 0xd0f   : > { %v2414_v57 = vpop.permute.xlu0 %2413  ;;  %v2452_v10 = vmul.f32 %v2419_v49, %v2404_v51 }
 0xd10   : > { %v2451_v16 = vmul.f32 %v2414_v57, %v2403_v25 }
 0xd12   : > { %2555 = vrot.lane.b32.xlu1 %v2532_v48, %s3808_s12  ;;  %v2429_v29 = vpop.permute.xlu1 %2428 }
 0xd13   : > { %v2424_v27 = vpop.permute.xlu0 %2423  ;;  %v2454_v37 = vmul.f32 %v2429_v29, %v2406_v39 }
 0xd14   : > { %v2453_v19 = vmul.f32 %v2424_v27, %v2405_v60 }
 0xd16   : > { %v2439_v36 = vpop.permute.xlu1 %2438 }
 0xd17   : > { %v2434_v35 = vpop.permute.xlu0 %2433  ;;  %v2456_v4 = vmul.f32 %v2439_v36, %v2408_v41 }
 0xd18   : > { %v2455_v15 = vmul.f32 %v2434_v35, %v2407_v1 }
 0xd1a   : > { %v2449_v14 = vpop.permute.xlu1 %2448 }
 0xd1b   : > { %v2444_v58 = vpop.permute.xlu0 %2443  ;;  %v2458_v13 = vmul.f32 %v2449_v14, %v2410_v7 }
 0xd1c   : > { %v2457_v12 = vmul.f32 %v2444_v58, %v2409_v30 }
 0xd74   : > { %v2542_v11 = vpop.permute.xlu0 %2541 }
 0xd75   : > { %v2566_v44 = vsel %vm2565_vm14, %v2451_v16, %v2542_v11 }
 0xd76   : > { %2574 = vst [vmem:[%s4315_s6] sm:$0xff] %v2566_v44 }
 0xd78   : > { %v2544_v31 = vpop.permute.xlu1 %2543  ;;  %v2546_v2 = vpop.permute.xlu0 %2545 }
 0xd79   : > { %v2567_v6 = vsel %vm2565_vm14, %v2452_v10, %v2544_v31  ;;  %v2568_v46 = vsel %vm2565_vm14, %v2453_v19, %v2546_v2 }
 0xd7a   : > { %2575 = vst [vmem:[%s4315_s6 + $0x8] sm:$0xff] %v2567_v6  ;;  %2576 = vst [vmem:[%s4315_s6 + $0x10] sm:$0xff] %v2568_v46 }
 0xd7c   : > { %v2548_v40 = vpop.permute.xlu1 %2547  ;;  %v2550_v8 = vpop.permute.xlu0 %2549 }
 0xd7d   : > { %v2569_v53 = vsel %vm2565_vm14, %v2454_v37, %v2548_v40  ;;  %v2570_v33 = vsel %vm2565_vm14, %v2455_v15, %v2550_v8 }
 0xd7e   : > { %2577 = vst [vmem:[%s4315_s6 + $0x18] sm:$0xff] %v2569_v53  ;;  %2578 = vst [vmem:[%s4315_s6 + $0x20] sm:$0xff] %v2570_v33 }
 0xd80   : > { %v2552_v26 = vpop.permute.xlu1 %2551  ;;  %v2554_v56 = vpop.permute.xlu0 %2553 }
 0xd81   : > { %v2571_v38 = vsel %vm2565_vm14, %v2456_v4, %v2552_v26  ;;  %v2572_v50 = vsel %vm2565_vm14, %v2457_v12, %v2554_v56 }
 0xd82   : > { %2579 = vst [vmem:[%s4315_s6 + $0x28] sm:$0xff] %v2571_v38  ;;  %2580 = vst [vmem:[%s4315_s6 + $0x30] sm:$0xff] %v2572_v50 }
 0xd84   : > { %v2556_v20 = vpop.permute.xlu1 %2555 }
 0xd85   : > { %v2573_v0 = vsel %vm2565_vm14, %v2458_v13, %v2556_v20 }
 0xd86   : > { %2581 = vst [vmem:[%s4315_s6 + $0x38] sm:$0xff] %v2573_v0 }
 0xd87 PF: > { %s5897_s7 = sld [smem:[#allocation46_spill]]  ;;  %s5899_s5 = sld [smem:[#allocation36_spill]] }
 0xd88   : > { %s5900_s3 = sld [smem:[#allocation38_spill]]  ;;  %s5901_s2 = sld [smem:[#allocation37_spill]] }
 0xd89   : > { %s2601_s17 = sshll.u32 %s4315_s6, 4  ;;  %s5903_s25 = sld [smem:[#allocation64_spill]]  ;;  %s5611_s17 = int_to_ptr.vmem [resolvable:$true] %s2601_s17 }
 0xd8a   : > { %s5621_s15 = scalar_lea.sflag [#allocation12], %s336_s4  ;;  %s3593_s23 = scalar_lea.vmem %s5611_s17, 1024 }
 0xd8b   : > { %p3594_p0 = scmp.ne.s32.totalorder %s5611_s17, %s3593_s23  ;;  %s3809_s6 = smov [#allocation16]  }
 0xd8c   : > { %s3597_s22 = sshll.u32 %s3809_s6, 4  ;;  %s3598_s22 = int_to_ptr.vmem [resolvable:$false] %s3597_s22 }
 0xd8d   : > { %p5898_p6 = scmp.ne.s32.totalorder %s5897_s7, 0  ;;  %s3599_s12 = scalar_lea.vmem %s3598_s22, 2048 }
 0xd8e   : > { %s2799_s9 = sshll.u32 %s5900_s3, 6  ;;  %p3600_p3 = scmp.lt.s32.totalorder %s5611_s17, %s3598_s22 }
 0xd8f   : > { %s3139_s14 = scalar_select %p5898_p6, [#allocation7], [#allocation20] }
 0xd90   : > { %s5957_s5 = smov (!%p5898_p6, %s5899_s5), 0  ;;  %s5904_s11 = smov %s5903_s25 }
 0xd91   : > { %s2590_s16 = sld [smem:[%s3139_s14 + %s5957_s5]]  ;;  %p3595_p10 = pnand %p3594_p0, %p5898_p6 }
 0xd92   : > { %p3601_p11 = scmp.lt.s32.totalorder %s3599_s12, %s3593_s23 }
 0xd93   : > { %p3596_p7 = pneg %p3595_p10 }
 0xd94   : > { %p3602_p4 = por %p3601_p11, %p3600_p3 }
 0xd96   : > { %p3603_p5 = pnand %p3602_p4, %p3596_p7 }
 0xd97   : > { %s2806_s1 = sshll.u32 %s2590_s16, 4 }
 0xd98   : > { %s2596_s28 = sadd.s32 %s5901_s2, %s2806_s1 }
 0xd99   : > { %s2598_s29 = sadd.s32 %s2799_s9, %s2596_s28 }
 0xd9a   : > { %s2800_s10 = sshll.u32 %s2598_s29, 7 }
 0xd9b   : > { %s5617_s27 = scalar_lea.hbm %s5903_s25, %s2800_s10 }
 0xd9c   : > { %3606 = shalt.err (!%p3603_p5)
}
 0xd9d   : > { %s3607_s4 = scalar_lea.hbm %s5617_s27, 1024  ;;  %s3611_s2 = scalar_lea.hbm %s5904_s11, 16384 }
 0xd9e   : > { %p3608_p13 = scmp.ne.s32.totalorder %s5617_s27, %s3607_s4  ;;  %p3612_p2 = scmp.lt.u32.totalorder %s5617_s27, %s5904_s11 }
 0xd9f   : > { %p3613_p1 = scmp.lt.u32.totalorder %s3611_s2, %s3607_s4  ;;  %p3615_p0 = scmp.lt.u32.totalorder %s3607_s4, %s5617_s27 }
 0xda0   : > { %p3609_p12 = pnand %p3608_p13, %p5898_p6 }
 0xda1   : > { %p3614_p9 = por %p3613_p1, %p3612_p2 }
 0xda2   : > { %p3610_p8 = pneg %p3609_p12 }
 0xda3   : > { %p3616_p10 = por %p3615_p0, %p3614_p9 }
 0xda5   : > { %p3617_p7 = pnand %p3616_p10, %p3610_p8 }
 0xda7   : > { %3620 = shalt.err (!%p3617_p7)
}
 0xda8   : > { %s3810_s16 = smov 128   ;;  %s3811_s9 = smov 256  }
 0xda9   : > { %s3812_s1 = smov 8  }
 0xdaa   : > { %3141 = dma.vmem_to_hbm [thread:$0]  (%p5898_p6), %s5611_s17, 1024, %s5617_s27, %s5621_s15, %s3810_s16, %s3811_s9, %s3812_s1  }
 0xdab PF: > { %s5905_s28 = sld [smem:[#allocation29_spill]]  ;;  %s5906_s29 = sld [smem:[#allocation47_spill]] }
 0xdac   : > { %p3164_p3 = scmp.ge.s32.totalorder %s3789_s8, 2 }
 0xdb1   : > { %s2616_s10 = sand.u32 1, %s5905_s28   ;;  %p5907_p11 = scmp.ne.s32.totalorder %s5906_s29, 0 }
 0xdb2   : > { %s2617_s13 = scalar_lea.sflag [#allocation12], %s2616_s10 }
 0xdb3   : > { %p3160_p4 = pnand %p3164_p3, %p5907_p11 }
 0xdb5   : > { %3712 = dma.done.wait (!%p3160_p4), %s2617_s13, 1024  }
 0xdb6   : > { %3714 = vsyncadd (!%p3160_p4), %s2617_s13, 4294966272  ;;  %s37_s8 = sadd.s32 1, %s3789_s8   ;;  %s5909_s2 = sld [smem:[#allocation30_spill]] }
 0xdb7   : > { %p5650_p5 = scmp.ge.s32.totalorder %s37_s8, 26   ;;  %s5910_s15 = sld [smem:[#allocation31_spill]] }
 0xdb8   : > { %s5911_s16 = sld [smem:[#allocation48_spill]]  ;;  %s5912_s7 = sld [smem:[#allocation33_spill]] }
 0xdb9   : > { %s5913_s25 = sld [smem:[#allocation34_spill]]  ;;  %s5914_s22 = sld [smem:[#allocation45_spill]] }
 0xdba   : > { %s5915_s27 = sld [smem:[#allocation35_spill]]  ;;  %s5917_s26 = sld [smem:[#allocation39_spill]] }
 0xdbb   : > { %s5916_s6 = sld [smem:[#allocation49_spill]]  ;;  %s5918_s28 = sld [smem:[#allocation40_spill]] }
 0xdbc   : > { %s5919_s29 = sld [smem:[#allocation41_spill]]  ;;  %s5920_s12 = sld [smem:[#allocation42_spill]] }
 0xdbd   : > { %s5921_s4 = sld [smem:[#allocation44_spill]]  ;;  %s5922_s17 = smov %s3733_s18 }
 0xdbe   : > { %s5924_s18 = smov %s3737_s19  ;;  %s5925_s19 = smov %s4164_s20 }
 0xdbf   : > { %s5926_s20 = smov %s5912_s7  ;;  %s5927_s21 = smov %s5913_s25 }
 0xdc0   : > { %s5928_s23 = smov %s3757_s24  ;;  %s5929_s24 = smov %s5915_s27 }
 0xdc1   : > { %s5930_s25 = smov %s5916_s6  ;;  %s5931_s27 = smov %s3781_s30 }
 0xdc2   : > { %s5932_s30 = smov %s5920_s12  ;;  %36 = sbr.rel (!%p5650_p5) target bundleno = 49 (0x31), region = 128 }
 0xdc3   : > { %s5933_s7 = smov %s5921_s4 }
 0xdc9   :  { %2622 = vsyncpa [#allocation11], 1 }
 0xdca   :  { %2624 = vsyncpa [#allocation11 + $0x1], 1 }
 0xdcb   :  { %2625 = vsyncpa [#allocation14], 1 }
 0xdcc   :  { %2627 = vsyncpa [#allocation14 + $0x1], 1 }
 0xdcd   :  { %2628 = vsyncpa [#allocation12], 1 }
 0xdce   :  { %2630 = vsyncpa [#allocation12 + $0x1], 1 }

</bundles_post_ra>
